<compile_context>
chip_gen: v6e
topology: v6e:2x2x1
jax: 0.10.0
libtpu: 0.0.40
codegen_flags: <defaults>
</compile_context>

<pallas_src>
import jax
import jax.numpy as jnp
from jax import lax
from jax.experimental import pallas as pl
from jax.experimental.pallas import tpu as pltpu


DILATIONS = (1, 2, 4, 4, 2, 1)                      # static, matches the module
_UNIQ_DIL = tuple(sorted(set(DILATIONS)))           # (1, 2, 4)
_DIL_ROW = {d: 9 * i for i, d in enumerate(_UNIQ_DIL)}


def _round_up(x, m):
    return ((x + m - 1) // m) * m


def _shift_cols(a, s, size):
    """Cyclic lane shift: out[:, m] = a[:, (m + s) % size]   (s, size static)."""
    s = s % size
    if s == 0:
        return a
    return jnp.concatenate([a[:, s:], a[:, :s]], axis=1)


# ----------------------------------------------------------------------------
# Fused kernel: 6 dilated conv / convT layers + ReLU + 1x1 gate, one image per
# grid step.  All intermediate activations live in VMEM / vregs.
# ----------------------------------------------------------------------------
def _make_fused_kernel(img_w, mp):
    n_layers = len(DILATIONS)

    def kernel(x_ref, mask_ref, *refs):
        # refs = (w0, b0, ..., w5, b5, gate_w, gate_b, out)
        out_ref = refs[-1]
        gw_ref, gb_ref = refs[-3], refs[-2]

        a = x_ref[...]                                          # (C0, mp) bf16
        for li in range(n_layers):
            w_ref, b_ref = refs[2 * li], refs[2 * li + 1]       # (9,Cout,Cin), (Cout,1)
            _, cout, _ = w_ref.shape
            d = DILATIONS[li]
            row0 = _DIL_ROW[d]
            acc = jnp.zeros((cout, mp), jnp.float32)
            for t in range(9):
                ky, kx = t // 3, t % 3
                # flat spatial offset of this tap (within one image)
                s = (ky - 1) * d * img_w + (kx - 1) * d
                tap = _shift_cols(a, s, mp) * mask_ref[row0 + t:row0 + t + 1, :]
                acc = acc + jnp.dot(w_ref[t], tap,
                                    preferred_element_type=jnp.float32)
            act = jnp.maximum(acc + b_ref[...], 0.0)            # bias + ReLU (f32)
            a = act.astype(jnp.bfloat16) if li + 1 < n_layers else act
        # Fused 1x1 gate: channel reduction + bias, all f32, lane-dense store.
        g = jnp.sum(gw_ref[...] * a, axis=0, keepdims=True) + gb_ref[...]
        out_ref[...] = g.astype(out_ref.dtype)

    return kernel


def _build_tap_masks(h, w, mp):
    """(9*len(_UNIQ_DIL), mp) bf16 {0,1} masks.

    Row _DIL_ROW[d] + (ky*3+kx) says, per flattened destination pixel, whether
    the source pixel (y+(ky-1)d, x+(kx-1)d) is inside the image ("same" conv
    zero padding) and whether the destination column is a real (non-pad) pixel.
    """
    m_img = h * w
    col = jnp.arange(mp, dtype=jnp.int32)
    y, x = col // w, col % w
    in_img = col < m_img
    rows = []
    for d in _UNIQ_DIL:
        for ky in range(3):
            for kx in range(3):
                dy, dx = (ky - 1) * d, (kx - 1) * d
                ok = (in_img & (y + dy >= 0) & (y + dy < h)
                      & (x + dx >= 0) & (x + dx < w))
                rows.append(ok)
    return jnp.stack(rows, axis=0).astype(jnp.bfloat16)


# ----------------------------------------------------------------------------
# Parameter setup (deterministic, PyTorch-default-like uniform init)
# ----------------------------------------------------------------------------
def _uniform(key, shape, fan_in):
    bound = float(fan_in) ** -0.5
    return jax.random.uniform(key, shape, jnp.float32, -bound, bound)


def init_params(key, n_channels):
    """Returns (kernel_params, reference_params)."""
    c = n_channels
    layer_defs = [
        ("conv", c, 2 * c), ("conv", 2 * c, 4 * c), ("conv", 4 * c, 8 * c),
        ("convT", 8 * c, 4 * c), ("convT", 4 * c, 2 * c), ("convT", 2 * c, c),
    ]
    keys = jax.random.split(key, 2 * len(layer_defs) + 2)
    ws, bs, ref_ws, ref_bs = [], [], [], []
    for i, (kind, cin, cout) in enumerate(layer_defs):
        kw, kb = keys[2 * i], keys[2 * i + 1]
        if kind == "conv":
            fan_in = cin * 9
            w_conv = _uniform(kw, (cout, cin, 3, 3), fan_in)             # OIHW
        else:
            # PyTorch ConvTranspose2d weight is (Cin, Cout, kh, kw); fan_in = Cout*9.
            fan_in = cout * 9
            w_pt = _uniform(kw, (cin, cout, 3, 3), fan_in)
            # stride=1, pad=d, dil=d ConvTranspose == dilated conv with the
            # spatial kernel flipped and the channel axes swapped.
            w_conv = jnp.transpose(w_pt[:, :, ::-1, ::-1], (1, 0, 2, 3))  # OIHW
        b = _uniform(kb, (cout,), fan_in)
        # Tap-major layout for the kernel: (Cout, Cin, 3, 3) -> (9, Cout, Cin).
        w_taps = jnp.transpose(w_conv, (2, 3, 0, 1)).reshape(9, cout, cin)
        ws.append(w_taps.astype(jnp.bfloat16))
        bs.append(b.reshape(cout, 1))                                    # f32
        ref_ws.append(w_conv)
        ref_bs.append(b)
    kgw, kgb = keys[-2], keys[-1]
    gate_w = _uniform(kgw, (c, 1), c)        # Conv2d(c, 1, 1) weight[0, :, 0, 0]
    gate_b = _uniform(kgb, (1, 1), c)
    params = {"w": ws, "b": bs, "gate_w": gate_w, "gate_b": gate_b}
    ref_params = {"w": ref_ws, "b": ref_bs, "gate_w": gate_w, "gate_b": gate_b}
    return params, ref_params


# ----------------------------------------------------------------------------
# Full forward (matches DiEnDec.forward): NCHW in, (N, 1, H, W) out
# ----------------------------------------------------------------------------
@jax.jit
def diendec_forward(x_nchw, params):
    n, c0, h, w = x_nchw.shape
    m_img = h * w
    mp = _round_up(m_img, 128)

    # Channel-major, per-image lane-dense layout:
    # (N, C, H, W) -> (C, N, H*W) -> pad H*W to a multiple of 128 -> (C, N*mp)
    x = jnp.transpose(x_nchw, (1, 0, 2, 3)).reshape(c0, n, m_img)
    x = jnp.pad(x, ((0, 0), (0, 0), (0, mp - m_img)))
    x = x.reshape(c0, n * mp).astype(jnp.bfloat16)

    masks = _build_tap_masks(h, w, mp)

    ws, bs = params["w"], params["b"]
    gw, gb = params["gate_w"], params["gate_b"]

    # Advisory scheduling hint.
    flops = 2 * n * mp * (sum(w_.shape[0] * w_.shape[1] * w_.shape[2] for w_ in ws)
                          + gw.shape[0])
    bytes_accessed = (2 * x.size + 2 * masks.size
                      + sum(2 * w_.size + 4 * b_.size for w_, b_ in zip(ws, bs))
                      + 4 * (gw.size + gb.size) + 4 * n * mp)

    in_specs = [
        pl.BlockSpec((c0, mp), lambda i: (0, i)),         # per-image input slab
        pl.BlockSpec(masks.shape, lambda i: (0, 0)),      # resident tap masks
    ]
    operands = [x, masks]
    for w_, b_ in zip(ws, bs):
        in_specs.append(pl.BlockSpec(w_.shape, lambda i: (0, 0, 0)))  # resident
        in_specs.append(pl.BlockSpec(b_.shape, lambda i: (0, 0)))     # resident
        operands += [w_, b_]
    in_specs.append(pl.BlockSpec(gw.shape, lambda i: (0, 0)))
    in_specs.append(pl.BlockSpec(gb.shape, lambda i: (0, 0)))
    operands += [gw, gb]

    out = pl.pallas_call(
        _make_fused_kernel(w, mp),
        out_shape=jax.ShapeDtypeStruct((1, n * mp), jnp.float32),
        grid=(n,),
        in_specs=in_specs,
        out_specs=pl.BlockSpec((1, mp), lambda i: (0, i)),
        compiler_params=pltpu.CompilerParams(dimension_semantics=("parallel",)),
        cost_estimate=pl.CostEstimate(flops=int(flops), transcendentals=0,
                                      bytes_accessed=int(bytes_accessed)),
    )(*operands)

    y = out.reshape(1, n, mp)[:, :, :m_img].reshape(1, n, h, w)
    return jnp.transpose(y, (1, 0, 2, 3))                 # (N, 1, H, W), f32


# ----------------------------------------------------------------------------
# Pure-JAX f32 reference of DiEnDec.forward: gate(decoder(encoder(x)))
# ----------------------------------------------------------------------------
def diendec_reference(x_nchw, ref_params):
    a = x_nchw
    for w_conv, b, d in zip(ref_params["w"], ref_params["b"], DILATIONS):
        a = lax.conv_general_dilated(
            a, w_conv, window_strides=(1, 1), padding=[(d, d), (d, d)],
            rhs_dilation=(d, d), dimension_numbers=("NCHW", "OIHW", "NCHW"))
        a = jnp.maximum(a + b.reshape(1, -1, 1, 1), 0.0)
    g = jnp.einsum("nchw,c->nhw", a, ref_params["gate_w"][:, 0])
    return g[:, None, :, :] + ref_params["gate_b"][0, 0]


if __name__ == "__main__":
    key = jax.random.PRNGKey(0)
    k_x, k_p = jax.random.split(key)

    n_channels = 4
    N, H, W = 2, 16, 16
    x = jax.random.normal(k_x, (N, n_channels, H, W), jnp.float32)
    params, ref_params = init_params(k_p, n_channels)

    y = jax.block_until_ready(diendec_forward(x, params))

    assert y.shape == (N, 1, H, W), y.shape
    assert y.dtype == jnp.float32
    assert bool(jnp.all(jnp.isfinite(y)))

    # bf16 MXU inputs -> allow a few percent divergence from the f32 reference.
    y_ref = jax.block_until_ready(diendec_reference(x, ref_params))
    err = float(jnp.max(jnp.abs(y - y_ref)))
    scale = float(jnp.max(jnp.abs(y_ref)))
    assert err <= 0.08 * scale + 1e-3, (err, scale)

    print("KERNEL_OK")
</pallas_src>

<mosaic_0001>
module attributes {stable_mosaic.version = 11 : i64} {
  func.func @kernel(%arg0: i32, %arg1: memref<4x256xbf16, #tpu.memory_space<vmem>>, %arg2: memref<27x256xbf16, #tpu.memory_space<vmem>>, %arg3: memref<9x8x4xbf16, #tpu.memory_space<vmem>>, %arg4: memref<8x1xf32, #tpu.memory_space<vmem>>, %arg5: memref<9x16x8xbf16, #tpu.memory_space<vmem>>, %arg6: memref<16x1xf32, #tpu.memory_space<vmem>>, %arg7: memref<9x32x16xbf16, #tpu.memory_space<vmem>>, %arg8: memref<32x1xf32, #tpu.memory_space<vmem>>, %arg9: memref<9x16x32xbf16, #tpu.memory_space<vmem>>, %arg10: memref<16x1xf32, #tpu.memory_space<vmem>>, %arg11: memref<9x8x16xbf16, #tpu.memory_space<vmem>>, %arg12: memref<8x1xf32, #tpu.memory_space<vmem>>, %arg13: memref<9x4x8xbf16, #tpu.memory_space<vmem>>, %arg14: memref<4x1xf32, #tpu.memory_space<vmem>>, %arg15: memref<4x1xf32, #tpu.memory_space<vmem>>, %arg16: memref<1x1xf32, #tpu.memory_space<vmem>>, %arg17: memref<1x256xf32, #tpu.memory_space<vmem>>) attributes {dimension_semantics = [#tpu.dimension_semantics<parallel>], iteration_bounds = array<i64: 2>, scalar_prefetch = 0 : i64, scratch_operands = 0 : i64, tpu.core_type = #tpu.core_type<tc>, window_params = [{transform_indices = @transform_0, window_bounds = array<i64: 4, 256>}, {pipeline_mode = #tpu.pipeline_mode<synchronous>, transform_indices = @transform_1, window_bounds = array<i64: 27, 256>}, {pipeline_mode = #tpu.pipeline_mode<synchronous>, transform_indices = @transform_2, window_bounds = array<i64: 9, 8, 4>}, {pipeline_mode = #tpu.pipeline_mode<synchronous>, transform_indices = @transform_3, window_bounds = array<i64: 8, 1>}, {pipeline_mode = #tpu.pipeline_mode<synchronous>, transform_indices = @transform_4, window_bounds = array<i64: 9, 16, 8>}, {pipeline_mode = #tpu.pipeline_mode<synchronous>, transform_indices = @transform_5, window_bounds = array<i64: 16, 1>}, {pipeline_mode = #tpu.pipeline_mode<synchronous>, transform_indices = @transform_6, window_bounds = array<i64: 9, 32, 16>}, {pipeline_mode = #tpu.pipeline_mode<synchronous>, transform_indices = @transform_7, window_bounds = array<i64: 32, 1>}, {pipeline_mode = #tpu.pipeline_mode<synchronous>, transform_indices = @transform_8, window_bounds = array<i64: 9, 16, 32>}, {pipeline_mode = #tpu.pipeline_mode<synchronous>, transform_indices = @transform_9, window_bounds = array<i64: 16, 1>}, {pipeline_mode = #tpu.pipeline_mode<synchronous>, transform_indices = @transform_10, window_bounds = array<i64: 9, 8, 16>}, {pipeline_mode = #tpu.pipeline_mode<synchronous>, transform_indices = @transform_11, window_bounds = array<i64: 8, 1>}, {pipeline_mode = #tpu.pipeline_mode<synchronous>, transform_indices = @transform_12, window_bounds = array<i64: 9, 4, 8>}, {pipeline_mode = #tpu.pipeline_mode<synchronous>, transform_indices = @transform_13, window_bounds = array<i64: 4, 1>}, {pipeline_mode = #tpu.pipeline_mode<synchronous>, transform_indices = @transform_14, window_bounds = array<i64: 4, 1>}, {pipeline_mode = #tpu.pipeline_mode<synchronous>, transform_indices = @transform_15, window_bounds = array<i64: 1, 1>}, {transform_indices = @transform_16, window_bounds = array<i64: 1, 256>}]} {
    %c0 = arith.constant 0 : index
    %c0_0 = arith.constant 0 : index
    %0 = vector.load %arg1[%c0, %c0_0] : memref<4x256xbf16, #tpu.memory_space<vmem>>, vector<4x256xbf16>
    %cst = arith.constant 0.000000e+00 : f32
    %1 = vector.broadcast %cst : f32 to vector<8x256xf32>
    %2 = vector.extract_strided_slice %0 {offsets = [0, 239], sizes = [4, 17], strides = [1, 1]} : vector<4x256xbf16> to vector<4x17xbf16>
    %3 = vector.extract_strided_slice %0 {offsets = [0, 0], sizes = [4, 239], strides = [1, 1]} : vector<4x256xbf16> to vector<4x239xbf16>
    %4 = tpu.concatenate %2, %3 in 1 : vector<4x17xbf16>, vector<4x239xbf16> -> vector<4x256xbf16>
    %c0_1 = arith.constant 0 : index
    %c0_2 = arith.constant 0 : index
    %5 = vector.load %arg2[%c0_1, %c0_2] : memref<27x256xbf16, #tpu.memory_space<vmem>>, vector<1x256xbf16>
    %6 = vector.broadcast %5 : vector<1x256xbf16> to vector<4x256xbf16>
    %7 = arith.mulf %4, %6 : vector<4x256xbf16>
    %c0_3 = arith.constant 0 : index
    %c0_4 = arith.constant 0 : index
    %c0_5 = arith.constant 0 : index
    %8 = vector.load %arg3[%c0_3, %c0_4, %c0_5] : memref<9x8x4xbf16, #tpu.memory_space<vmem>>, vector<1x8x4xbf16>
    %9 = vector.shape_cast %8 : vector<1x8x4xbf16> to vector<8x4xbf16>
    %cst_6 = arith.constant dense<0.000000e+00> : vector<8x256xf32>
    %10 = tpu.matmul %9, %7, %cst_6 {dimension_numbers = #tpu.dot_dimension_numbers<[1], [0], [0], [1], [0, 0, 1, 1], [], []>} : vector<8x4xbf16>, vector<4x256xbf16>, vector<8x256xf32> -> vector<8x256xf32>
    %11 = arith.addf %1, %10 : vector<8x256xf32>
    %12 = vector.extract_strided_slice %0 {offsets = [0, 240], sizes = [4, 16], strides = [1, 1]} : vector<4x256xbf16> to vector<4x16xbf16>
    %13 = vector.extract_strided_slice %0 {offsets = [0, 0], sizes = [4, 240], strides = [1, 1]} : vector<4x256xbf16> to vector<4x240xbf16>
    %14 = tpu.concatenate %12, %13 in 1 : vector<4x16xbf16>, vector<4x240xbf16> -> vector<4x256xbf16>
    %c1 = arith.constant 1 : index
    %c0_7 = arith.constant 0 : index
    %15 = vector.load %arg2[%c1, %c0_7] : memref<27x256xbf16, #tpu.memory_space<vmem>>, vector<1x256xbf16>
    %16 = vector.broadcast %15 : vector<1x256xbf16> to vector<4x256xbf16>
    %17 = arith.mulf %14, %16 : vector<4x256xbf16>
    %c1_8 = arith.constant 1 : index
    %c0_9 = arith.constant 0 : index
    %c0_10 = arith.constant 0 : index
    %18 = vector.load %arg3[%c1_8, %c0_9, %c0_10] : memref<9x8x4xbf16, #tpu.memory_space<vmem>>, vector<1x8x4xbf16>
    %19 = vector.shape_cast %18 : vector<1x8x4xbf16> to vector<8x4xbf16>
    %cst_11 = arith.constant dense<0.000000e+00> : vector<8x256xf32>
    %20 = tpu.matmul %19, %17, %cst_11 {dimension_numbers = #tpu.dot_dimension_numbers<[1], [0], [0], [1], [0, 0, 1, 1], [], []>} : vector<8x4xbf16>, vector<4x256xbf16>, vector<8x256xf32> -> vector<8x256xf32>
    %21 = arith.addf %11, %20 : vector<8x256xf32>
    %22 = vector.extract_strided_slice %0 {offsets = [0, 241], sizes = [4, 15], strides = [1, 1]} : vector<4x256xbf16> to vector<4x15xbf16>
    %23 = vector.extract_strided_slice %0 {offsets = [0, 0], sizes = [4, 241], strides = [1, 1]} : vector<4x256xbf16> to vector<4x241xbf16>
    %24 = tpu.concatenate %22, %23 in 1 : vector<4x15xbf16>, vector<4x241xbf16> -> vector<4x256xbf16>
    %c2 = arith.constant 2 : index
    %c0_12 = arith.constant 0 : index
    %25 = vector.load %arg2[%c2, %c0_12] : memref<27x256xbf16, #tpu.memory_space<vmem>>, vector<1x256xbf16>
    %26 = vector.broadcast %25 : vector<1x256xbf16> to vector<4x256xbf16>
    %27 = arith.mulf %24, %26 : vector<4x256xbf16>
    %c2_13 = arith.constant 2 : index
    %c0_14 = arith.constant 0 : index
    %c0_15 = arith.constant 0 : index
    %28 = vector.load %arg3[%c2_13, %c0_14, %c0_15] : memref<9x8x4xbf16, #tpu.memory_space<vmem>>, vector<1x8x4xbf16>
    %29 = vector.shape_cast %28 : vector<1x8x4xbf16> to vector<8x4xbf16>
    %cst_16 = arith.constant dense<0.000000e+00> : vector<8x256xf32>
    %30 = tpu.matmul %29, %27, %cst_16 {dimension_numbers = #tpu.dot_dimension_numbers<[1], [0], [0], [1], [0, 0, 1, 1], [], []>} : vector<8x4xbf16>, vector<4x256xbf16>, vector<8x256xf32> -> vector<8x256xf32>
    %31 = arith.addf %21, %30 : vector<8x256xf32>
    %32 = vector.extract_strided_slice %0 {offsets = [0, 255], sizes = [4, 1], strides = [1, 1]} : vector<4x256xbf16> to vector<4x1xbf16>
    %33 = vector.extract_strided_slice %0 {offsets = [0, 0], sizes = [4, 255], strides = [1, 1]} : vector<4x256xbf16> to vector<4x255xbf16>
    %34 = tpu.concatenate %32, %33 in 1 : vector<4x1xbf16>, vector<4x255xbf16> -> vector<4x256xbf16>
    %c3 = arith.constant 3 : index
    %c0_17 = arith.constant 0 : index
    %35 = vector.load %arg2[%c3, %c0_17] : memref<27x256xbf16, #tpu.memory_space<vmem>>, vector<1x256xbf16>
    %36 = vector.broadcast %35 : vector<1x256xbf16> to vector<4x256xbf16>
    %37 = arith.mulf %34, %36 : vector<4x256xbf16>
    %c3_18 = arith.constant 3 : index
    %c0_19 = arith.constant 0 : index
    %c0_20 = arith.constant 0 : index
    %38 = vector.load %arg3[%c3_18, %c0_19, %c0_20] : memref<9x8x4xbf16, #tpu.memory_space<vmem>>, vector<1x8x4xbf16>
    %39 = vector.shape_cast %38 : vector<1x8x4xbf16> to vector<8x4xbf16>
    %cst_21 = arith.constant dense<0.000000e+00> : vector<8x256xf32>
    %40 = tpu.matmul %39, %37, %cst_21 {dimension_numbers = #tpu.dot_dimension_numbers<[1], [0], [0], [1], [0, 0, 1, 1], [], []>} : vector<8x4xbf16>, vector<4x256xbf16>, vector<8x256xf32> -> vector<8x256xf32>
    %41 = arith.addf %31, %40 : vector<8x256xf32>
    %c4 = arith.constant 4 : index
    %c0_22 = arith.constant 0 : index
    %42 = vector.load %arg2[%c4, %c0_22] : memref<27x256xbf16, #tpu.memory_space<vmem>>, vector<1x256xbf16>
    %43 = vector.broadcast %42 : vector<1x256xbf16> to vector<4x256xbf16>
    %44 = arith.mulf %0, %43 : vector<4x256xbf16>
    %c4_23 = arith.constant 4 : index
    %c0_24 = arith.constant 0 : index
    %c0_25 = arith.constant 0 : index
    %45 = vector.load %arg3[%c4_23, %c0_24, %c0_25] : memref<9x8x4xbf16, #tpu.memory_space<vmem>>, vector<1x8x4xbf16>
    %46 = vector.shape_cast %45 : vector<1x8x4xbf16> to vector<8x4xbf16>
    %cst_26 = arith.constant dense<0.000000e+00> : vector<8x256xf32>
    %47 = tpu.matmul %46, %44, %cst_26 {dimension_numbers = #tpu.dot_dimension_numbers<[1], [0], [0], [1], [0, 0, 1, 1], [], []>} : vector<8x4xbf16>, vector<4x256xbf16>, vector<8x256xf32> -> vector<8x256xf32>
    %48 = arith.addf %41, %47 : vector<8x256xf32>
    %49 = vector.extract_strided_slice %0 {offsets = [0, 1], sizes = [4, 255], strides = [1, 1]} : vector<4x256xbf16> to vector<4x255xbf16>
    %50 = vector.extract_strided_slice %0 {offsets = [0, 0], sizes = [4, 1], strides = [1, 1]} : vector<4x256xbf16> to vector<4x1xbf16>
    %51 = tpu.concatenate %49, %50 in 1 : vector<4x255xbf16>, vector<4x1xbf16> -> vector<4x256xbf16>
    %c5 = arith.constant 5 : index
    %c0_27 = arith.constant 0 : index
    %52 = vector.load %arg2[%c5, %c0_27] : memref<27x256xbf16, #tpu.memory_space<vmem>>, vector<1x256xbf16>
    %53 = vector.broadcast %52 : vector<1x256xbf16> to vector<4x256xbf16>
    %54 = arith.mulf %51, %53 : vector<4x256xbf16>
    %c5_28 = arith.constant 5 : index
    %c0_29 = arith.constant 0 : index
    %c0_30 = arith.constant 0 : index
    %55 = vector.load %arg3[%c5_28, %c0_29, %c0_30] : memref<9x8x4xbf16, #tpu.memory_space<vmem>>, vector<1x8x4xbf16>
    %56 = vector.shape_cast %55 : vector<1x8x4xbf16> to vector<8x4xbf16>
    %cst_31 = arith.constant dense<0.000000e+00> : vector<8x256xf32>
    %57 = tpu.matmul %56, %54, %cst_31 {dimension_numbers = #tpu.dot_dimension_numbers<[1], [0], [0], [1], [0, 0, 1, 1], [], []>} : vector<8x4xbf16>, vector<4x256xbf16>, vector<8x256xf32> -> vector<8x256xf32>
    %58 = arith.addf %48, %57 : vector<8x256xf32>
    %59 = vector.extract_strided_slice %0 {offsets = [0, 15], sizes = [4, 241], strides = [1, 1]} : vector<4x256xbf16> to vector<4x241xbf16>
    %60 = vector.extract_strided_slice %0 {offsets = [0, 0], sizes = [4, 15], strides = [1, 1]} : vector<4x256xbf16> to vector<4x15xbf16>
    %61 = tpu.concatenate %59, %60 in 1 : vector<4x241xbf16>, vector<4x15xbf16> -> vector<4x256xbf16>
    %c6 = arith.constant 6 : index
    %c0_32 = arith.constant 0 : index
    %62 = vector.load %arg2[%c6, %c0_32] : memref<27x256xbf16, #tpu.memory_space<vmem>>, vector<1x256xbf16>
    %63 = vector.broadcast %62 : vector<1x256xbf16> to vector<4x256xbf16>
    %64 = arith.mulf %61, %63 : vector<4x256xbf16>
    %c6_33 = arith.constant 6 : index
    %c0_34 = arith.constant 0 : index
    %c0_35 = arith.constant 0 : index
    %65 = vector.load %arg3[%c6_33, %c0_34, %c0_35] : memref<9x8x4xbf16, #tpu.memory_space<vmem>>, vector<1x8x4xbf16>
    %66 = vector.shape_cast %65 : vector<1x8x4xbf16> to vector<8x4xbf16>
    %cst_36 = arith.constant dense<0.000000e+00> : vector<8x256xf32>
    %67 = tpu.matmul %66, %64, %cst_36 {dimension_numbers = #tpu.dot_dimension_numbers<[1], [0], [0], [1], [0, 0, 1, 1], [], []>} : vector<8x4xbf16>, vector<4x256xbf16>, vector<8x256xf32> -> vector<8x256xf32>
    %68 = arith.addf %58, %67 : vector<8x256xf32>
    %69 = vector.extract_strided_slice %0 {offsets = [0, 16], sizes = [4, 240], strides = [1, 1]} : vector<4x256xbf16> to vector<4x240xbf16>
    %70 = vector.extract_strided_slice %0 {offsets = [0, 0], sizes = [4, 16], strides = [1, 1]} : vector<4x256xbf16> to vector<4x16xbf16>
    %71 = tpu.concatenate %69, %70 in 1 : vector<4x240xbf16>, vector<4x16xbf16> -> vector<4x256xbf16>
    %c7 = arith.constant 7 : index
    %c0_37 = arith.constant 0 : index
    %72 = vector.load %arg2[%c7, %c0_37] : memref<27x256xbf16, #tpu.memory_space<vmem>>, vector<1x256xbf16>
    %73 = vector.broadcast %72 : vector<1x256xbf16> to vector<4x256xbf16>
    %74 = arith.mulf %71, %73 : vector<4x256xbf16>
    %c7_38 = arith.constant 7 : index
    %c0_39 = arith.constant 0 : index
    %c0_40 = arith.constant 0 : index
    %75 = vector.load %arg3[%c7_38, %c0_39, %c0_40] : memref<9x8x4xbf16, #tpu.memory_space<vmem>>, vector<1x8x4xbf16>
    %76 = vector.shape_cast %75 : vector<1x8x4xbf16> to vector<8x4xbf16>
    %cst_41 = arith.constant dense<0.000000e+00> : vector<8x256xf32>
    %77 = tpu.matmul %76, %74, %cst_41 {dimension_numbers = #tpu.dot_dimension_numbers<[1], [0], [0], [1], [0, 0, 1, 1], [], []>} : vector<8x4xbf16>, vector<4x256xbf16>, vector<8x256xf32> -> vector<8x256xf32>
    %78 = arith.addf %68, %77 : vector<8x256xf32>
    %79 = vector.extract_strided_slice %0 {offsets = [0, 17], sizes = [4, 239], strides = [1, 1]} : vector<4x256xbf16> to vector<4x239xbf16>
    %80 = vector.extract_strided_slice %0 {offsets = [0, 0], sizes = [4, 17], strides = [1, 1]} : vector<4x256xbf16> to vector<4x17xbf16>
    %81 = tpu.concatenate %79, %80 in 1 : vector<4x239xbf16>, vector<4x17xbf16> -> vector<4x256xbf16>
    %c8 = arith.constant 8 : index
    %c0_42 = arith.constant 0 : index
    %82 = vector.load %arg2[%c8, %c0_42] : memref<27x256xbf16, #tpu.memory_space<vmem>>, vector<1x256xbf16>
    %83 = vector.broadcast %82 : vector<1x256xbf16> to vector<4x256xbf16>
    %84 = arith.mulf %81, %83 : vector<4x256xbf16>
    %c8_43 = arith.constant 8 : index
    %c0_44 = arith.constant 0 : index
    %c0_45 = arith.constant 0 : index
    %85 = vector.load %arg3[%c8_43, %c0_44, %c0_45] : memref<9x8x4xbf16, #tpu.memory_space<vmem>>, vector<1x8x4xbf16>
    %86 = vector.shape_cast %85 : vector<1x8x4xbf16> to vector<8x4xbf16>
    %cst_46 = arith.constant dense<0.000000e+00> : vector<8x256xf32>
    %87 = tpu.matmul %86, %84, %cst_46 {dimension_numbers = #tpu.dot_dimension_numbers<[1], [0], [0], [1], [0, 0, 1, 1], [], []>} : vector<8x4xbf16>, vector<4x256xbf16>, vector<8x256xf32> -> vector<8x256xf32>
    %88 = arith.addf %78, %87 : vector<8x256xf32>
    %c0_47 = arith.constant 0 : index
    %c0_48 = arith.constant 0 : index
    %89 = vector.load %arg4[%c0_47, %c0_48] : memref<8x1xf32, #tpu.memory_space<vmem>>, vector<8x1xf32>
    %90 = vector.broadcast %89 : vector<8x1xf32> to vector<8x256xf32>
    %91 = arith.addf %88, %90 : vector<8x256xf32>
    %cst_49 = arith.constant 0.000000e+00 : f32
    %92 = vector.broadcast %cst_49 : f32 to vector<8x256xf32>
    %93 = arith.maximumf %91, %92 : vector<8x256xf32>
    %94 = arith.truncf %93 : vector<8x256xf32> to vector<8x256xbf16>
    %cst_50 = arith.constant 0.000000e+00 : f32
    %95 = vector.broadcast %cst_50 : f32 to vector<16x256xf32>
    %96 = vector.extract_strided_slice %94 {offsets = [0, 222], sizes = [8, 34], strides = [1, 1]} : vector<8x256xbf16> to vector<8x34xbf16>
    %97 = vector.extract_strided_slice %94 {offsets = [0, 0], sizes = [8, 222], strides = [1, 1]} : vector<8x256xbf16> to vector<8x222xbf16>
    %98 = tpu.concatenate %96, %97 in 1 : vector<8x34xbf16>, vector<8x222xbf16> -> vector<8x256xbf16>
    %c9 = arith.constant 9 : index
    %c0_51 = arith.constant 0 : index
    %99 = vector.load %arg2[%c9, %c0_51] : memref<27x256xbf16, #tpu.memory_space<vmem>>, vector<1x256xbf16>
    %100 = vector.broadcast %99 : vector<1x256xbf16> to vector<8x256xbf16>
    %101 = arith.mulf %98, %100 : vector<8x256xbf16>
    %c0_52 = arith.constant 0 : index
    %c0_53 = arith.constant 0 : index
    %c0_54 = arith.constant 0 : index
    %102 = vector.load %arg5[%c0_52, %c0_53, %c0_54] : memref<9x16x8xbf16, #tpu.memory_space<vmem>>, vector<1x16x8xbf16>
    %103 = vector.shape_cast %102 : vector<1x16x8xbf16> to vector<16x8xbf16>
    %cst_55 = arith.constant dense<0.000000e+00> : vector<16x256xf32>
    %104 = tpu.matmul %103, %101, %cst_55 {dimension_numbers = #tpu.dot_dimension_numbers<[1], [0], [0], [1], [0, 0, 1, 1], [], []>} : vector<16x8xbf16>, vector<8x256xbf16>, vector<16x256xf32> -> vector<16x256xf32>
    %105 = arith.addf %95, %104 : vector<16x256xf32>
    %106 = vector.extract_strided_slice %94 {offsets = [0, 224], sizes = [8, 32], strides = [1, 1]} : vector<8x256xbf16> to vector<8x32xbf16>
    %107 = vector.extract_strided_slice %94 {offsets = [0, 0], sizes = [8, 224], strides = [1, 1]} : vector<8x256xbf16> to vector<8x224xbf16>
    %108 = tpu.concatenate %106, %107 in 1 : vector<8x32xbf16>, vector<8x224xbf16> -> vector<8x256xbf16>
    %c10 = arith.constant 10 : index
    %c0_56 = arith.constant 0 : index
    %109 = vector.load %arg2[%c10, %c0_56] : memref<27x256xbf16, #tpu.memory_space<vmem>>, vector<1x256xbf16>
    %110 = vector.broadcast %109 : vector<1x256xbf16> to vector<8x256xbf16>
    %111 = arith.mulf %108, %110 : vector<8x256xbf16>
    %c1_57 = arith.constant 1 : index
    %c0_58 = arith.constant 0 : index
    %c0_59 = arith.constant 0 : index
    %112 = vector.load %arg5[%c1_57, %c0_58, %c0_59] : memref<9x16x8xbf16, #tpu.memory_space<vmem>>, vector<1x16x8xbf16>
    %113 = vector.shape_cast %112 : vector<1x16x8xbf16> to vector<16x8xbf16>
    %cst_60 = arith.constant dense<0.000000e+00> : vector<16x256xf32>
    %114 = tpu.matmul %113, %111, %cst_60 {dimension_numbers = #tpu.dot_dimension_numbers<[1], [0], [0], [1], [0, 0, 1, 1], [], []>} : vector<16x8xbf16>, vector<8x256xbf16>, vector<16x256xf32> -> vector<16x256xf32>
    %115 = arith.addf %105, %114 : vector<16x256xf32>
    %116 = vector.extract_strided_slice %94 {offsets = [0, 226], sizes = [8, 30], strides = [1, 1]} : vector<8x256xbf16> to vector<8x30xbf16>
    %117 = vector.extract_strided_slice %94 {offsets = [0, 0], sizes = [8, 226], strides = [1, 1]} : vector<8x256xbf16> to vector<8x226xbf16>
    %118 = tpu.concatenate %116, %117 in 1 : vector<8x30xbf16>, vector<8x226xbf16> -> vector<8x256xbf16>
    %c11 = arith.constant 11 : index
    %c0_61 = arith.constant 0 : index
    %119 = vector.load %arg2[%c11, %c0_61] : memref<27x256xbf16, #tpu.memory_space<vmem>>, vector<1x256xbf16>
    %120 = vector.broadcast %119 : vector<1x256xbf16> to vector<8x256xbf16>
    %121 = arith.mulf %118, %120 : vector<8x256xbf16>
    %c2_62 = arith.constant 2 : index
    %c0_63 = arith.constant 0 : index
    %c0_64 = arith.constant 0 : index
    %122 = vector.load %arg5[%c2_62, %c0_63, %c0_64] : memref<9x16x8xbf16, #tpu.memory_space<vmem>>, vector<1x16x8xbf16>
    %123 = vector.shape_cast %122 : vector<1x16x8xbf16> to vector<16x8xbf16>
    %cst_65 = arith.constant dense<0.000000e+00> : vector<16x256xf32>
    %124 = tpu.matmul %123, %121, %cst_65 {dimension_numbers = #tpu.dot_dimension_numbers<[1], [0], [0], [1], [0, 0, 1, 1], [], []>} : vector<16x8xbf16>, vector<8x256xbf16>, vector<16x256xf32> -> vector<16x256xf32>
    %125 = arith.addf %115, %124 : vector<16x256xf32>
    %126 = vector.extract_strided_slice %94 {offsets = [0, 254], sizes = [8, 2], strides = [1, 1]} : vector<8x256xbf16> to vector<8x2xbf16>
    %127 = vector.extract_strided_slice %94 {offsets = [0, 0], sizes = [8, 254], strides = [1, 1]} : vector<8x256xbf16> to vector<8x254xbf16>
    %128 = tpu.concatenate %126, %127 in 1 : vector<8x2xbf16>, vector<8x254xbf16> -> vector<8x256xbf16>
    %c12 = arith.constant 12 : index
    %c0_66 = arith.constant 0 : index
    %129 = vector.load %arg2[%c12, %c0_66] : memref<27x256xbf16, #tpu.memory_space<vmem>>, vector<1x256xbf16>
    %130 = vector.broadcast %129 : vector<1x256xbf16> to vector<8x256xbf16>
    %131 = arith.mulf %128, %130 : vector<8x256xbf16>
    %c3_67 = arith.constant 3 : index
    %c0_68 = arith.constant 0 : index
    %c0_69 = arith.constant 0 : index
    %132 = vector.load %arg5[%c3_67, %c0_68, %c0_69] : memref<9x16x8xbf16, #tpu.memory_space<vmem>>, vector<1x16x8xbf16>
    %133 = vector.shape_cast %132 : vector<1x16x8xbf16> to vector<16x8xbf16>
    %cst_70 = arith.constant dense<0.000000e+00> : vector<16x256xf32>
    %134 = tpu.matmul %133, %131, %cst_70 {dimension_numbers = #tpu.dot_dimension_numbers<[1], [0], [0], [1], [0, 0, 1, 1], [], []>} : vector<16x8xbf16>, vector<8x256xbf16>, vector<16x256xf32> -> vector<16x256xf32>
    %135 = arith.addf %125, %134 : vector<16x256xf32>
    %c13 = arith.constant 13 : index
    %c0_71 = arith.constant 0 : index
    %136 = vector.load %arg2[%c13, %c0_71] : memref<27x256xbf16, #tpu.memory_space<vmem>>, vector<1x256xbf16>
    %137 = vector.broadcast %136 : vector<1x256xbf16> to vector<8x256xbf16>
    %138 = arith.mulf %94, %137 : vector<8x256xbf16>
    %c4_72 = arith.constant 4 : index
    %c0_73 = arith.constant 0 : index
    %c0_74 = arith.constant 0 : index
    %139 = vector.load %arg5[%c4_72, %c0_73, %c0_74] : memref<9x16x8xbf16, #tpu.memory_space<vmem>>, vector<1x16x8xbf16>
    %140 = vector.shape_cast %139 : vector<1x16x8xbf16> to vector<16x8xbf16>
    %cst_75 = arith.constant dense<0.000000e+00> : vector<16x256xf32>
    %141 = tpu.matmul %140, %138, %cst_75 {dimension_numbers = #tpu.dot_dimension_numbers<[1], [0], [0], [1], [0, 0, 1, 1], [], []>} : vector<16x8xbf16>, vector<8x256xbf16>, vector<16x256xf32> -> vector<16x256xf32>
    %142 = arith.addf %135, %141 : vector<16x256xf32>
    %143 = vector.extract_strided_slice %94 {offsets = [0, 2], sizes = [8, 254], strides = [1, 1]} : vector<8x256xbf16> to vector<8x254xbf16>
    %144 = vector.extract_strided_slice %94 {offsets = [0, 0], sizes = [8, 2], strides = [1, 1]} : vector<8x256xbf16> to vector<8x2xbf16>
    %145 = tpu.concatenate %143, %144 in 1 : vector<8x254xbf16>, vector<8x2xbf16> -> vector<8x256xbf16>
    %c14 = arith.constant 14 : index
    %c0_76 = arith.constant 0 : index
    %146 = vector.load %arg2[%c14, %c0_76] : memref<27x256xbf16, #tpu.memory_space<vmem>>, vector<1x256xbf16>
    %147 = vector.broadcast %146 : vector<1x256xbf16> to vector<8x256xbf16>
    %148 = arith.mulf %145, %147 : vector<8x256xbf16>
    %c5_77 = arith.constant 5 : index
    %c0_78 = arith.constant 0 : index
    %c0_79 = arith.constant 0 : index
    %149 = vector.load %arg5[%c5_77, %c0_78, %c0_79] : memref<9x16x8xbf16, #tpu.memory_space<vmem>>, vector<1x16x8xbf16>
    %150 = vector.shape_cast %149 : vector<1x16x8xbf16> to vector<16x8xbf16>
    %cst_80 = arith.constant dense<0.000000e+00> : vector<16x256xf32>
    %151 = tpu.matmul %150, %148, %cst_80 {dimension_numbers = #tpu.dot_dimension_numbers<[1], [0], [0], [1], [0, 0, 1, 1], [], []>} : vector<16x8xbf16>, vector<8x256xbf16>, vector<16x256xf32> -> vector<16x256xf32>
    %152 = arith.addf %142, %151 : vector<16x256xf32>
    %153 = vector.extract_strided_slice %94 {offsets = [0, 30], sizes = [8, 226], strides = [1, 1]} : vector<8x256xbf16> to vector<8x226xbf16>
    %154 = vector.extract_strided_slice %94 {offsets = [0, 0], sizes = [8, 30], strides = [1, 1]} : vector<8x256xbf16> to vector<8x30xbf16>
    %155 = tpu.concatenate %153, %154 in 1 : vector<8x226xbf16>, vector<8x30xbf16> -> vector<8x256xbf16>
    %c15 = arith.constant 15 : index
    %c0_81 = arith.constant 0 : index
    %156 = vector.load %arg2[%c15, %c0_81] : memref<27x256xbf16, #tpu.memory_space<vmem>>, vector<1x256xbf16>
    %157 = vector.broadcast %156 : vector<1x256xbf16> to vector<8x256xbf16>
    %158 = arith.mulf %155, %157 : vector<8x256xbf16>
    %c6_82 = arith.constant 6 : index
    %c0_83 = arith.constant 0 : index
    %c0_84 = arith.constant 0 : index
    %159 = vector.load %arg5[%c6_82, %c0_83, %c0_84] : memref<9x16x8xbf16, #tpu.memory_space<vmem>>, vector<1x16x8xbf16>
    %160 = vector.shape_cast %159 : vector<1x16x8xbf16> to vector<16x8xbf16>
    %cst_85 = arith.constant dense<0.000000e+00> : vector<16x256xf32>
    %161 = tpu.matmul %160, %158, %cst_85 {dimension_numbers = #tpu.dot_dimension_numbers<[1], [0], [0], [1], [0, 0, 1, 1], [], []>} : vector<16x8xbf16>, vector<8x256xbf16>, vector<16x256xf32> -> vector<16x256xf32>
    %162 = arith.addf %152, %161 : vector<16x256xf32>
    %163 = vector.extract_strided_slice %94 {offsets = [0, 32], sizes = [8, 224], strides = [1, 1]} : vector<8x256xbf16> to vector<8x224xbf16>
    %164 = vector.extract_strided_slice %94 {offsets = [0, 0], sizes = [8, 32], strides = [1, 1]} : vector<8x256xbf16> to vector<8x32xbf16>
    %165 = tpu.concatenate %163, %164 in 1 : vector<8x224xbf16>, vector<8x32xbf16> -> vector<8x256xbf16>
    %c16 = arith.constant 16 : index
    %c0_86 = arith.constant 0 : index
    %166 = vector.load %arg2[%c16, %c0_86] : memref<27x256xbf16, #tpu.memory_space<vmem>>, vector<1x256xbf16>
    %167 = vector.broadcast %166 : vector<1x256xbf16> to vector<8x256xbf16>
    %168 = arith.mulf %165, %167 : vector<8x256xbf16>
    %c7_87 = arith.constant 7 : index
    %c0_88 = arith.constant 0 : index
    %c0_89 = arith.constant 0 : index
    %169 = vector.load %arg5[%c7_87, %c0_88, %c0_89] : memref<9x16x8xbf16, #tpu.memory_space<vmem>>, vector<1x16x8xbf16>
    %170 = vector.shape_cast %169 : vector<1x16x8xbf16> to vector<16x8xbf16>
    %cst_90 = arith.constant dense<0.000000e+00> : vector<16x256xf32>
    %171 = tpu.matmul %170, %168, %cst_90 {dimension_numbers = #tpu.dot_dimension_numbers<[1], [0], [0], [1], [0, 0, 1, 1], [], []>} : vector<16x8xbf16>, vector<8x256xbf16>, vector<16x256xf32> -> vector<16x256xf32>
    %172 = arith.addf %162, %171 : vector<16x256xf32>
    %173 = vector.extract_strided_slice %94 {offsets = [0, 34], sizes = [8, 222], strides = [1, 1]} : vector<8x256xbf16> to vector<8x222xbf16>
    %174 = vector.extract_strided_slice %94 {offsets = [0, 0], sizes = [8, 34], strides = [1, 1]} : vector<8x256xbf16> to vector<8x34xbf16>
    %175 = tpu.concatenate %173, %174 in 1 : vector<8x222xbf16>, vector<8x34xbf16> -> vector<8x256xbf16>
    %c17 = arith.constant 17 : index
    %c0_91 = arith.constant 0 : index
    %176 = vector.load %arg2[%c17, %c0_91] : memref<27x256xbf16, #tpu.memory_space<vmem>>, vector<1x256xbf16>
    %177 = vector.broadcast %176 : vector<1x256xbf16> to vector<8x256xbf16>
    %178 = arith.mulf %175, %177 : vector<8x256xbf16>
    %c8_92 = arith.constant 8 : index
    %c0_93 = arith.constant 0 : index
    %c0_94 = arith.constant 0 : index
    %179 = vector.load %arg5[%c8_92, %c0_93, %c0_94] : memref<9x16x8xbf16, #tpu.memory_space<vmem>>, vector<1x16x8xbf16>
    %180 = vector.shape_cast %179 : vector<1x16x8xbf16> to vector<16x8xbf16>
    %cst_95 = arith.constant dense<0.000000e+00> : vector<16x256xf32>
    %181 = tpu.matmul %180, %178, %cst_95 {dimension_numbers = #tpu.dot_dimension_numbers<[1], [0], [0], [1], [0, 0, 1, 1], [], []>} : vector<16x8xbf16>, vector<8x256xbf16>, vector<16x256xf32> -> vector<16x256xf32>
    %182 = arith.addf %172, %181 : vector<16x256xf32>
    %c0_96 = arith.constant 0 : index
    %c0_97 = arith.constant 0 : index
    %183 = vector.load %arg6[%c0_96, %c0_97] : memref<16x1xf32, #tpu.memory_space<vmem>>, vector<16x1xf32>
    %184 = vector.broadcast %183 : vector<16x1xf32> to vector<16x256xf32>
    %185 = arith.addf %182, %184 : vector<16x256xf32>
    %cst_98 = arith.constant 0.000000e+00 : f32
    %186 = vector.broadcast %cst_98 : f32 to vector<16x256xf32>
    %187 = arith.maximumf %185, %186 : vector<16x256xf32>
    %188 = arith.truncf %187 : vector<16x256xf32> to vector<16x256xbf16>
    %cst_99 = arith.constant 0.000000e+00 : f32
    %189 = vector.broadcast %cst_99 : f32 to vector<32x256xf32>
    %190 = vector.extract_strided_slice %188 {offsets = [0, 188], sizes = [16, 68], strides = [1, 1]} : vector<16x256xbf16> to vector<16x68xbf16>
    %191 = vector.extract_strided_slice %188 {offsets = [0, 0], sizes = [16, 188], strides = [1, 1]} : vector<16x256xbf16> to vector<16x188xbf16>
    %192 = tpu.concatenate %190, %191 in 1 : vector<16x68xbf16>, vector<16x188xbf16> -> vector<16x256xbf16>
    %c18 = arith.constant 18 : index
    %c0_100 = arith.constant 0 : index
    %193 = vector.load %arg2[%c18, %c0_100] : memref<27x256xbf16, #tpu.memory_space<vmem>>, vector<1x256xbf16>
    %194 = vector.broadcast %193 : vector<1x256xbf16> to vector<16x256xbf16>
    %195 = arith.mulf %192, %194 : vector<16x256xbf16>
    %c0_101 = arith.constant 0 : index
    %c0_102 = arith.constant 0 : index
    %c0_103 = arith.constant 0 : index
    %196 = vector.load %arg7[%c0_101, %c0_102, %c0_103] : memref<9x32x16xbf16, #tpu.memory_space<vmem>>, vector<1x32x16xbf16>
    %197 = vector.shape_cast %196 : vector<1x32x16xbf16> to vector<32x16xbf16>
    %cst_104 = arith.constant dense<0.000000e+00> : vector<32x256xf32>
    %198 = tpu.matmul %197, %195, %cst_104 {dimension_numbers = #tpu.dot_dimension_numbers<[1], [0], [0], [1], [0, 0, 1, 1], [], []>} : vector<32x16xbf16>, vector<16x256xbf16>, vector<32x256xf32> -> vector<32x256xf32>
    %199 = arith.addf %189, %198 : vector<32x256xf32>
    %200 = vector.extract_strided_slice %188 {offsets = [0, 192], sizes = [16, 64], strides = [1, 1]} : vector<16x256xbf16> to vector<16x64xbf16>
    %201 = vector.extract_strided_slice %188 {offsets = [0, 0], sizes = [16, 192], strides = [1, 1]} : vector<16x256xbf16> to vector<16x192xbf16>
    %202 = tpu.concatenate %200, %201 in 1 : vector<16x64xbf16>, vector<16x192xbf16> -> vector<16x256xbf16>
    %c19 = arith.constant 19 : index
    %c0_105 = arith.constant 0 : index
    %203 = vector.load %arg2[%c19, %c0_105] : memref<27x256xbf16, #tpu.memory_space<vmem>>, vector<1x256xbf16>
    %204 = vector.broadcast %203 : vector<1x256xbf16> to vector<16x256xbf16>
    %205 = arith.mulf %202, %204 : vector<16x256xbf16>
    %c1_106 = arith.constant 1 : index
    %c0_107 = arith.constant 0 : index
    %c0_108 = arith.constant 0 : index
    %206 = vector.load %arg7[%c1_106, %c0_107, %c0_108] : memref<9x32x16xbf16, #tpu.memory_space<vmem>>, vector<1x32x16xbf16>
    %207 = vector.shape_cast %206 : vector<1x32x16xbf16> to vector<32x16xbf16>
    %cst_109 = arith.constant dense<0.000000e+00> : vector<32x256xf32>
    %208 = tpu.matmul %207, %205, %cst_109 {dimension_numbers = #tpu.dot_dimension_numbers<[1], [0], [0], [1], [0, 0, 1, 1], [], []>} : vector<32x16xbf16>, vector<16x256xbf16>, vector<32x256xf32> -> vector<32x256xf32>
    %209 = arith.addf %199, %208 : vector<32x256xf32>
    %210 = vector.extract_strided_slice %188 {offsets = [0, 196], sizes = [16, 60], strides = [1, 1]} : vector<16x256xbf16> to vector<16x60xbf16>
    %211 = vector.extract_strided_slice %188 {offsets = [0, 0], sizes = [16, 196], strides = [1, 1]} : vector<16x256xbf16> to vector<16x196xbf16>
    %212 = tpu.concatenate %210, %211 in 1 : vector<16x60xbf16>, vector<16x196xbf16> -> vector<16x256xbf16>
    %c20 = arith.constant 20 : index
    %c0_110 = arith.constant 0 : index
    %213 = vector.load %arg2[%c20, %c0_110] : memref<27x256xbf16, #tpu.memory_space<vmem>>, vector<1x256xbf16>
    %214 = vector.broadcast %213 : vector<1x256xbf16> to vector<16x256xbf16>
    %215 = arith.mulf %212, %214 : vector<16x256xbf16>
    %c2_111 = arith.constant 2 : index
    %c0_112 = arith.constant 0 : index
    %c0_113 = arith.constant 0 : index
    %216 = vector.load %arg7[%c2_111, %c0_112, %c0_113] : memref<9x32x16xbf16, #tpu.memory_space<vmem>>, vector<1x32x16xbf16>
    %217 = vector.shape_cast %216 : vector<1x32x16xbf16> to vector<32x16xbf16>
    %cst_114 = arith.constant dense<0.000000e+00> : vector<32x256xf32>
    %218 = tpu.matmul %217, %215, %cst_114 {dimension_numbers = #tpu.dot_dimension_numbers<[1], [0], [0], [1], [0, 0, 1, 1], [], []>} : vector<32x16xbf16>, vector<16x256xbf16>, vector<32x256xf32> -> vector<32x256xf32>
    %219 = arith.addf %209, %218 : vector<32x256xf32>
    %220 = vector.extract_strided_slice %188 {offsets = [0, 252], sizes = [16, 4], strides = [1, 1]} : vector<16x256xbf16> to vector<16x4xbf16>
    %221 = vector.extract_strided_slice %188 {offsets = [0, 0], sizes = [16, 252], strides = [1, 1]} : vector<16x256xbf16> to vector<16x252xbf16>
    %222 = tpu.concatenate %220, %221 in 1 : vector<16x4xbf16>, vector<16x252xbf16> -> vector<16x256xbf16>
    %c21 = arith.constant 21 : index
    %c0_115 = arith.constant 0 : index
    %223 = vector.load %arg2[%c21, %c0_115] : memref<27x256xbf16, #tpu.memory_space<vmem>>, vector<1x256xbf16>
    %224 = vector.broadcast %223 : vector<1x256xbf16> to vector<16x256xbf16>
    %225 = arith.mulf %222, %224 : vector<16x256xbf16>
    %c3_116 = arith.constant 3 : index
    %c0_117 = arith.constant 0 : index
    %c0_118 = arith.constant 0 : index
    %226 = vector.load %arg7[%c3_116, %c0_117, %c0_118] : memref<9x32x16xbf16, #tpu.memory_space<vmem>>, vector<1x32x16xbf16>
    %227 = vector.shape_cast %226 : vector<1x32x16xbf16> to vector<32x16xbf16>
    %cst_119 = arith.constant dense<0.000000e+00> : vector<32x256xf32>
    %228 = tpu.matmul %227, %225, %cst_119 {dimension_numbers = #tpu.dot_dimension_numbers<[1], [0], [0], [1], [0, 0, 1, 1], [], []>} : vector<32x16xbf16>, vector<16x256xbf16>, vector<32x256xf32> -> vector<32x256xf32>
    %229 = arith.addf %219, %228 : vector<32x256xf32>
    %c22 = arith.constant 22 : index
    %c0_120 = arith.constant 0 : index
    %230 = vector.load %arg2[%c22, %c0_120] : memref<27x256xbf16, #tpu.memory_space<vmem>>, vector<1x256xbf16>
    %231 = vector.broadcast %230 : vector<1x256xbf16> to vector<16x256xbf16>
    %232 = arith.mulf %188, %231 : vector<16x256xbf16>
    %c4_121 = arith.constant 4 : index
    %c0_122 = arith.constant 0 : index
    %c0_123 = arith.constant 0 : index
    %233 = vector.load %arg7[%c4_121, %c0_122, %c0_123] : memref<9x32x16xbf16, #tpu.memory_space<vmem>>, vector<1x32x16xbf16>
    %234 = vector.shape_cast %233 : vector<1x32x16xbf16> to vector<32x16xbf16>
    %cst_124 = arith.constant dense<0.000000e+00> : vector<32x256xf32>
    %235 = tpu.matmul %234, %232, %cst_124 {dimension_numbers = #tpu.dot_dimension_numbers<[1], [0], [0], [1], [0, 0, 1, 1], [], []>} : vector<32x16xbf16>, vector<16x256xbf16>, vector<32x256xf32> -> vector<32x256xf32>
    %236 = arith.addf %229, %235 : vector<32x256xf32>
    %237 = vector.extract_strided_slice %188 {offsets = [0, 4], sizes = [16, 252], strides = [1, 1]} : vector<16x256xbf16> to vector<16x252xbf16>
    %238 = vector.extract_strided_slice %188 {offsets = [0, 0], sizes = [16, 4], strides = [1, 1]} : vector<16x256xbf16> to vector<16x4xbf16>
    %239 = tpu.concatenate %237, %238 in 1 : vector<16x252xbf16>, vector<16x4xbf16> -> vector<16x256xbf16>
    %c23 = arith.constant 23 : index
    %c0_125 = arith.constant 0 : index
    %240 = vector.load %arg2[%c23, %c0_125] : memref<27x256xbf16, #tpu.memory_space<vmem>>, vector<1x256xbf16>
    %241 = vector.broadcast %240 : vector<1x256xbf16> to vector<16x256xbf16>
    %242 = arith.mulf %239, %241 : vector<16x256xbf16>
    %c5_126 = arith.constant 5 : index
    %c0_127 = arith.constant 0 : index
    %c0_128 = arith.constant 0 : index
    %243 = vector.load %arg7[%c5_126, %c0_127, %c0_128] : memref<9x32x16xbf16, #tpu.memory_space<vmem>>, vector<1x32x16xbf16>
    %244 = vector.shape_cast %243 : vector<1x32x16xbf16> to vector<32x16xbf16>
    %cst_129 = arith.constant dense<0.000000e+00> : vector<32x256xf32>
    %245 = tpu.matmul %244, %242, %cst_129 {dimension_numbers = #tpu.dot_dimension_numbers<[1], [0], [0], [1], [0, 0, 1, 1], [], []>} : vector<32x16xbf16>, vector<16x256xbf16>, vector<32x256xf32> -> vector<32x256xf32>
    %246 = arith.addf %236, %245 : vector<32x256xf32>
    %247 = vector.extract_strided_slice %188 {offsets = [0, 60], sizes = [16, 196], strides = [1, 1]} : vector<16x256xbf16> to vector<16x196xbf16>
    %248 = vector.extract_strided_slice %188 {offsets = [0, 0], sizes = [16, 60], strides = [1, 1]} : vector<16x256xbf16> to vector<16x60xbf16>
    %249 = tpu.concatenate %247, %248 in 1 : vector<16x196xbf16>, vector<16x60xbf16> -> vector<16x256xbf16>
    %c24 = arith.constant 24 : index
    %c0_130 = arith.constant 0 : index
    %250 = vector.load %arg2[%c24, %c0_130] : memref<27x256xbf16, #tpu.memory_space<vmem>>, vector<1x256xbf16>
    %251 = vector.broadcast %250 : vector<1x256xbf16> to vector<16x256xbf16>
    %252 = arith.mulf %249, %251 : vector<16x256xbf16>
    %c6_131 = arith.constant 6 : index
    %c0_132 = arith.constant 0 : index
    %c0_133 = arith.constant 0 : index
    %253 = vector.load %arg7[%c6_131, %c0_132, %c0_133] : memref<9x32x16xbf16, #tpu.memory_space<vmem>>, vector<1x32x16xbf16>
    %254 = vector.shape_cast %253 : vector<1x32x16xbf16> to vector<32x16xbf16>
    %cst_134 = arith.constant dense<0.000000e+00> : vector<32x256xf32>
    %255 = tpu.matmul %254, %252, %cst_134 {dimension_numbers = #tpu.dot_dimension_numbers<[1], [0], [0], [1], [0, 0, 1, 1], [], []>} : vector<32x16xbf16>, vector<16x256xbf16>, vector<32x256xf32> -> vector<32x256xf32>
    %256 = arith.addf %246, %255 : vector<32x256xf32>
    %257 = vector.extract_strided_slice %188 {offsets = [0, 64], sizes = [16, 192], strides = [1, 1]} : vector<16x256xbf16> to vector<16x192xbf16>
    %258 = vector.extract_strided_slice %188 {offsets = [0, 0], sizes = [16, 64], strides = [1, 1]} : vector<16x256xbf16> to vector<16x64xbf16>
    %259 = tpu.concatenate %257, %258 in 1 : vector<16x192xbf16>, vector<16x64xbf16> -> vector<16x256xbf16>
    %c25 = arith.constant 25 : index
    %c0_135 = arith.constant 0 : index
    %260 = vector.load %arg2[%c25, %c0_135] : memref<27x256xbf16, #tpu.memory_space<vmem>>, vector<1x256xbf16>
    %261 = vector.broadcast %260 : vector<1x256xbf16> to vector<16x256xbf16>
    %262 = arith.mulf %259, %261 : vector<16x256xbf16>
    %c7_136 = arith.constant 7 : index
    %c0_137 = arith.constant 0 : index
    %c0_138 = arith.constant 0 : index
    %263 = vector.load %arg7[%c7_136, %c0_137, %c0_138] : memref<9x32x16xbf16, #tpu.memory_space<vmem>>, vector<1x32x16xbf16>
    %264 = vector.shape_cast %263 : vector<1x32x16xbf16> to vector<32x16xbf16>
    %cst_139 = arith.constant dense<0.000000e+00> : vector<32x256xf32>
    %265 = tpu.matmul %264, %262, %cst_139 {dimension_numbers = #tpu.dot_dimension_numbers<[1], [0], [0], [1], [0, 0, 1, 1], [], []>} : vector<32x16xbf16>, vector<16x256xbf16>, vector<32x256xf32> -> vector<32x256xf32>
    %266 = arith.addf %256, %265 : vector<32x256xf32>
    %267 = vector.extract_strided_slice %188 {offsets = [0, 68], sizes = [16, 188], strides = [1, 1]} : vector<16x256xbf16> to vector<16x188xbf16>
    %268 = vector.extract_strided_slice %188 {offsets = [0, 0], sizes = [16, 68], strides = [1, 1]} : vector<16x256xbf16> to vector<16x68xbf16>
    %269 = tpu.concatenate %267, %268 in 1 : vector<16x188xbf16>, vector<16x68xbf16> -> vector<16x256xbf16>
    %c26 = arith.constant 26 : index
    %c0_140 = arith.constant 0 : index
    %270 = vector.load %arg2[%c26, %c0_140] : memref<27x256xbf16, #tpu.memory_space<vmem>>, vector<1x256xbf16>
    %271 = vector.broadcast %270 : vector<1x256xbf16> to vector<16x256xbf16>
    %272 = arith.mulf %269, %271 : vector<16x256xbf16>
    %c8_141 = arith.constant 8 : index
    %c0_142 = arith.constant 0 : index
    %c0_143 = arith.constant 0 : index
    %273 = vector.load %arg7[%c8_141, %c0_142, %c0_143] : memref<9x32x16xbf16, #tpu.memory_space<vmem>>, vector<1x32x16xbf16>
    %274 = vector.shape_cast %273 : vector<1x32x16xbf16> to vector<32x16xbf16>
    %cst_144 = arith.constant dense<0.000000e+00> : vector<32x256xf32>
    %275 = tpu.matmul %274, %272, %cst_144 {dimension_numbers = #tpu.dot_dimension_numbers<[1], [0], [0], [1], [0, 0, 1, 1], [], []>} : vector<32x16xbf16>, vector<16x256xbf16>, vector<32x256xf32> -> vector<32x256xf32>
    %276 = arith.addf %266, %275 : vector<32x256xf32>
    %c0_145 = arith.constant 0 : index
    %c0_146 = arith.constant 0 : index
    %277 = vector.load %arg8[%c0_145, %c0_146] : memref<32x1xf32, #tpu.memory_space<vmem>>, vector<32x1xf32>
    %278 = vector.broadcast %277 : vector<32x1xf32> to vector<32x256xf32>
    %279 = arith.addf %276, %278 : vector<32x256xf32>
    %cst_147 = arith.constant 0.000000e+00 : f32
    %280 = vector.broadcast %cst_147 : f32 to vector<32x256xf32>
    %281 = arith.maximumf %279, %280 : vector<32x256xf32>
    %282 = arith.truncf %281 : vector<32x256xf32> to vector<32x256xbf16>
    %cst_148 = arith.constant 0.000000e+00 : f32
    %283 = vector.broadcast %cst_148 : f32 to vector<16x256xf32>
    %284 = vector.extract_strided_slice %282 {offsets = [0, 188], sizes = [32, 68], strides = [1, 1]} : vector<32x256xbf16> to vector<32x68xbf16>
    %285 = vector.extract_strided_slice %282 {offsets = [0, 0], sizes = [32, 188], strides = [1, 1]} : vector<32x256xbf16> to vector<32x188xbf16>
    %286 = tpu.concatenate %284, %285 in 1 : vector<32x68xbf16>, vector<32x188xbf16> -> vector<32x256xbf16>
    %c18_149 = arith.constant 18 : index
    %c0_150 = arith.constant 0 : index
    %287 = vector.load %arg2[%c18_149, %c0_150] : memref<27x256xbf16, #tpu.memory_space<vmem>>, vector<1x256xbf16>
    %288 = vector.broadcast %287 : vector<1x256xbf16> to vector<32x256xbf16>
    %289 = arith.mulf %286, %288 : vector<32x256xbf16>
    %c0_151 = arith.constant 0 : index
    %c0_152 = arith.constant 0 : index
    %c0_153 = arith.constant 0 : index
    %290 = vector.load %arg9[%c0_151, %c0_152, %c0_153] : memref<9x16x32xbf16, #tpu.memory_space<vmem>>, vector<1x16x32xbf16>
    %291 = vector.shape_cast %290 : vector<1x16x32xbf16> to vector<16x32xbf16>
    %cst_154 = arith.constant dense<0.000000e+00> : vector<16x256xf32>
    %292 = tpu.matmul %291, %289, %cst_154 {dimension_numbers = #tpu.dot_dimension_numbers<[1], [0], [0], [1], [0, 0, 1, 1], [], []>} : vector<16x32xbf16>, vector<32x256xbf16>, vector<16x256xf32> -> vector<16x256xf32>
    %293 = arith.addf %283, %292 : vector<16x256xf32>
    %294 = vector.extract_strided_slice %282 {offsets = [0, 192], sizes = [32, 64], strides = [1, 1]} : vector<32x256xbf16> to vector<32x64xbf16>
    %295 = vector.extract_strided_slice %282 {offsets = [0, 0], sizes = [32, 192], strides = [1, 1]} : vector<32x256xbf16> to vector<32x192xbf16>
    %296 = tpu.concatenate %294, %295 in 1 : vector<32x64xbf16>, vector<32x192xbf16> -> vector<32x256xbf16>
    %c19_155 = arith.constant 19 : index
    %c0_156 = arith.constant 0 : index
    %297 = vector.load %arg2[%c19_155, %c0_156] : memref<27x256xbf16, #tpu.memory_space<vmem>>, vector<1x256xbf16>
    %298 = vector.broadcast %297 : vector<1x256xbf16> to vector<32x256xbf16>
    %299 = arith.mulf %296, %298 : vector<32x256xbf16>
    %c1_157 = arith.constant 1 : index
    %c0_158 = arith.constant 0 : index
    %c0_159 = arith.constant 0 : index
    %300 = vector.load %arg9[%c1_157, %c0_158, %c0_159] : memref<9x16x32xbf16, #tpu.memory_space<vmem>>, vector<1x16x32xbf16>
    %301 = vector.shape_cast %300 : vector<1x16x32xbf16> to vector<16x32xbf16>
    %cst_160 = arith.constant dense<0.000000e+00> : vector<16x256xf32>
    %302 = tpu.matmul %301, %299, %cst_160 {dimension_numbers = #tpu.dot_dimension_numbers<[1], [0], [0], [1], [0, 0, 1, 1], [], []>} : vector<16x32xbf16>, vector<32x256xbf16>, vector<16x256xf32> -> vector<16x256xf32>
    %303 = arith.addf %293, %302 : vector<16x256xf32>
    %304 = vector.extract_strided_slice %282 {offsets = [0, 196], sizes = [32, 60], strides = [1, 1]} : vector<32x256xbf16> to vector<32x60xbf16>
    %305 = vector.extract_strided_slice %282 {offsets = [0, 0], sizes = [32, 196], strides = [1, 1]} : vector<32x256xbf16> to vector<32x196xbf16>
    %306 = tpu.concatenate %304, %305 in 1 : vector<32x60xbf16>, vector<32x196xbf16> -> vector<32x256xbf16>
    %c20_161 = arith.constant 20 : index
    %c0_162 = arith.constant 0 : index
    %307 = vector.load %arg2[%c20_161, %c0_162] : memref<27x256xbf16, #tpu.memory_space<vmem>>, vector<1x256xbf16>
    %308 = vector.broadcast %307 : vector<1x256xbf16> to vector<32x256xbf16>
    %309 = arith.mulf %306, %308 : vector<32x256xbf16>
    %c2_163 = arith.constant 2 : index
    %c0_164 = arith.constant 0 : index
    %c0_165 = arith.constant 0 : index
    %310 = vector.load %arg9[%c2_163, %c0_164, %c0_165] : memref<9x16x32xbf16, #tpu.memory_space<vmem>>, vector<1x16x32xbf16>
    %311 = vector.shape_cast %310 : vector<1x16x32xbf16> to vector<16x32xbf16>
    %cst_166 = arith.constant dense<0.000000e+00> : vector<16x256xf32>
    %312 = tpu.matmul %311, %309, %cst_166 {dimension_numbers = #tpu.dot_dimension_numbers<[1], [0], [0], [1], [0, 0, 1, 1], [], []>} : vector<16x32xbf16>, vector<32x256xbf16>, vector<16x256xf32> -> vector<16x256xf32>
    %313 = arith.addf %303, %312 : vector<16x256xf32>
    %314 = vector.extract_strided_slice %282 {offsets = [0, 252], sizes = [32, 4], strides = [1, 1]} : vector<32x256xbf16> to vector<32x4xbf16>
    %315 = vector.extract_strided_slice %282 {offsets = [0, 0], sizes = [32, 252], strides = [1, 1]} : vector<32x256xbf16> to vector<32x252xbf16>
    %316 = tpu.concatenate %314, %315 in 1 : vector<32x4xbf16>, vector<32x252xbf16> -> vector<32x256xbf16>
    %c21_167 = arith.constant 21 : index
    %c0_168 = arith.constant 0 : index
    %317 = vector.load %arg2[%c21_167, %c0_168] : memref<27x256xbf16, #tpu.memory_space<vmem>>, vector<1x256xbf16>
    %318 = vector.broadcast %317 : vector<1x256xbf16> to vector<32x256xbf16>
    %319 = arith.mulf %316, %318 : vector<32x256xbf16>
    %c3_169 = arith.constant 3 : index
    %c0_170 = arith.constant 0 : index
    %c0_171 = arith.constant 0 : index
    %320 = vector.load %arg9[%c3_169, %c0_170, %c0_171] : memref<9x16x32xbf16, #tpu.memory_space<vmem>>, vector<1x16x32xbf16>
    %321 = vector.shape_cast %320 : vector<1x16x32xbf16> to vector<16x32xbf16>
    %cst_172 = arith.constant dense<0.000000e+00> : vector<16x256xf32>
    %322 = tpu.matmul %321, %319, %cst_172 {dimension_numbers = #tpu.dot_dimension_numbers<[1], [0], [0], [1], [0, 0, 1, 1], [], []>} : vector<16x32xbf16>, vector<32x256xbf16>, vector<16x256xf32> -> vector<16x256xf32>
    %323 = arith.addf %313, %322 : vector<16x256xf32>
    %c22_173 = arith.constant 22 : index
    %c0_174 = arith.constant 0 : index
    %324 = vector.load %arg2[%c22_173, %c0_174] : memref<27x256xbf16, #tpu.memory_space<vmem>>, vector<1x256xbf16>
    %325 = vector.broadcast %324 : vector<1x256xbf16> to vector<32x256xbf16>
    %326 = arith.mulf %282, %325 : vector<32x256xbf16>
    %c4_175 = arith.constant 4 : index
    %c0_176 = arith.constant 0 : index
    %c0_177 = arith.constant 0 : index
    %327 = vector.load %arg9[%c4_175, %c0_176, %c0_177] : memref<9x16x32xbf16, #tpu.memory_space<vmem>>, vector<1x16x32xbf16>
    %328 = vector.shape_cast %327 : vector<1x16x32xbf16> to vector<16x32xbf16>
    %cst_178 = arith.constant dense<0.000000e+00> : vector<16x256xf32>
    %329 = tpu.matmul %328, %326, %cst_178 {dimension_numbers = #tpu.dot_dimension_numbers<[1], [0], [0], [1], [0, 0, 1, 1], [], []>} : vector<16x32xbf16>, vector<32x256xbf16>, vector<16x256xf32> -> vector<16x256xf32>
    %330 = arith.addf %323, %329 : vector<16x256xf32>
    %331 = vector.extract_strided_slice %282 {offsets = [0, 4], sizes = [32, 252], strides = [1, 1]} : vector<32x256xbf16> to vector<32x252xbf16>
    %332 = vector.extract_strided_slice %282 {offsets = [0, 0], sizes = [32, 4], strides = [1, 1]} : vector<32x256xbf16> to vector<32x4xbf16>
    %333 = tpu.concatenate %331, %332 in 1 : vector<32x252xbf16>, vector<32x4xbf16> -> vector<32x256xbf16>
    %c23_179 = arith.constant 23 : index
    %c0_180 = arith.constant 0 : index
    %334 = vector.load %arg2[%c23_179, %c0_180] : memref<27x256xbf16, #tpu.memory_space<vmem>>, vector<1x256xbf16>
    %335 = vector.broadcast %334 : vector<1x256xbf16> to vector<32x256xbf16>
    %336 = arith.mulf %333, %335 : vector<32x256xbf16>
    %c5_181 = arith.constant 5 : index
    %c0_182 = arith.constant 0 : index
    %c0_183 = arith.constant 0 : index
    %337 = vector.load %arg9[%c5_181, %c0_182, %c0_183] : memref<9x16x32xbf16, #tpu.memory_space<vmem>>, vector<1x16x32xbf16>
    %338 = vector.shape_cast %337 : vector<1x16x32xbf16> to vector<16x32xbf16>
    %cst_184 = arith.constant dense<0.000000e+00> : vector<16x256xf32>
    %339 = tpu.matmul %338, %336, %cst_184 {dimension_numbers = #tpu.dot_dimension_numbers<[1], [0], [0], [1], [0, 0, 1, 1], [], []>} : vector<16x32xbf16>, vector<32x256xbf16>, vector<16x256xf32> -> vector<16x256xf32>
    %340 = arith.addf %330, %339 : vector<16x256xf32>
    %341 = vector.extract_strided_slice %282 {offsets = [0, 60], sizes = [32, 196], strides = [1, 1]} : vector<32x256xbf16> to vector<32x196xbf16>
    %342 = vector.extract_strided_slice %282 {offsets = [0, 0], sizes = [32, 60], strides = [1, 1]} : vector<32x256xbf16> to vector<32x60xbf16>
    %343 = tpu.concatenate %341, %342 in 1 : vector<32x196xbf16>, vector<32x60xbf16> -> vector<32x256xbf16>
    %c24_185 = arith.constant 24 : index
    %c0_186 = arith.constant 0 : index
    %344 = vector.load %arg2[%c24_185, %c0_186] : memref<27x256xbf16, #tpu.memory_space<vmem>>, vector<1x256xbf16>
    %345 = vector.broadcast %344 : vector<1x256xbf16> to vector<32x256xbf16>
    %346 = arith.mulf %343, %345 : vector<32x256xbf16>
    %c6_187 = arith.constant 6 : index
    %c0_188 = arith.constant 0 : index
    %c0_189 = arith.constant 0 : index
    %347 = vector.load %arg9[%c6_187, %c0_188, %c0_189] : memref<9x16x32xbf16, #tpu.memory_space<vmem>>, vector<1x16x32xbf16>
    %348 = vector.shape_cast %347 : vector<1x16x32xbf16> to vector<16x32xbf16>
    %cst_190 = arith.constant dense<0.000000e+00> : vector<16x256xf32>
    %349 = tpu.matmul %348, %346, %cst_190 {dimension_numbers = #tpu.dot_dimension_numbers<[1], [0], [0], [1], [0, 0, 1, 1], [], []>} : vector<16x32xbf16>, vector<32x256xbf16>, vector<16x256xf32> -> vector<16x256xf32>
    %350 = arith.addf %340, %349 : vector<16x256xf32>
    %351 = vector.extract_strided_slice %282 {offsets = [0, 64], sizes = [32, 192], strides = [1, 1]} : vector<32x256xbf16> to vector<32x192xbf16>
    %352 = vector.extract_strided_slice %282 {offsets = [0, 0], sizes = [32, 64], strides = [1, 1]} : vector<32x256xbf16> to vector<32x64xbf16>
    %353 = tpu.concatenate %351, %352 in 1 : vector<32x192xbf16>, vector<32x64xbf16> -> vector<32x256xbf16>
    %c25_191 = arith.constant 25 : index
    %c0_192 = arith.constant 0 : index
    %354 = vector.load %arg2[%c25_191, %c0_192] : memref<27x256xbf16, #tpu.memory_space<vmem>>, vector<1x256xbf16>
    %355 = vector.broadcast %354 : vector<1x256xbf16> to vector<32x256xbf16>
    %356 = arith.mulf %353, %355 : vector<32x256xbf16>
    %c7_193 = arith.constant 7 : index
    %c0_194 = arith.constant 0 : index
    %c0_195 = arith.constant 0 : index
    %357 = vector.load %arg9[%c7_193, %c0_194, %c0_195] : memref<9x16x32xbf16, #tpu.memory_space<vmem>>, vector<1x16x32xbf16>
    %358 = vector.shape_cast %357 : vector<1x16x32xbf16> to vector<16x32xbf16>
    %cst_196 = arith.constant dense<0.000000e+00> : vector<16x256xf32>
    %359 = tpu.matmul %358, %356, %cst_196 {dimension_numbers = #tpu.dot_dimension_numbers<[1], [0], [0], [1], [0, 0, 1, 1], [], []>} : vector<16x32xbf16>, vector<32x256xbf16>, vector<16x256xf32> -> vector<16x256xf32>
    %360 = arith.addf %350, %359 : vector<16x256xf32>
    %361 = vector.extract_strided_slice %282 {offsets = [0, 68], sizes = [32, 188], strides = [1, 1]} : vector<32x256xbf16> to vector<32x188xbf16>
    %362 = vector.extract_strided_slice %282 {offsets = [0, 0], sizes = [32, 68], strides = [1, 1]} : vector<32x256xbf16> to vector<32x68xbf16>
    %363 = tpu.concatenate %361, %362 in 1 : vector<32x188xbf16>, vector<32x68xbf16> -> vector<32x256xbf16>
    %c26_197 = arith.constant 26 : index
    %c0_198 = arith.constant 0 : index
    %364 = vector.load %arg2[%c26_197, %c0_198] : memref<27x256xbf16, #tpu.memory_space<vmem>>, vector<1x256xbf16>
    %365 = vector.broadcast %364 : vector<1x256xbf16> to vector<32x256xbf16>
    %366 = arith.mulf %363, %365 : vector<32x256xbf16>
    %c8_199 = arith.constant 8 : index
    %c0_200 = arith.constant 0 : index
    %c0_201 = arith.constant 0 : index
    %367 = vector.load %arg9[%c8_199, %c0_200, %c0_201] : memref<9x16x32xbf16, #tpu.memory_space<vmem>>, vector<1x16x32xbf16>
    %368 = vector.shape_cast %367 : vector<1x16x32xbf16> to vector<16x32xbf16>
    %cst_202 = arith.constant dense<0.000000e+00> : vector<16x256xf32>
    %369 = tpu.matmul %368, %366, %cst_202 {dimension_numbers = #tpu.dot_dimension_numbers<[1], [0], [0], [1], [0, 0, 1, 1], [], []>} : vector<16x32xbf16>, vector<32x256xbf16>, vector<16x256xf32> -> vector<16x256xf32>
    %370 = arith.addf %360, %369 : vector<16x256xf32>
    %c0_203 = arith.constant 0 : index
    %c0_204 = arith.constant 0 : index
    %371 = vector.load %arg10[%c0_203, %c0_204] : memref<16x1xf32, #tpu.memory_space<vmem>>, vector<16x1xf32>
    %372 = vector.broadcast %371 : vector<16x1xf32> to vector<16x256xf32>
    %373 = arith.addf %370, %372 : vector<16x256xf32>
    %cst_205 = arith.constant 0.000000e+00 : f32
    %374 = vector.broadcast %cst_205 : f32 to vector<16x256xf32>
    %375 = arith.maximumf %373, %374 : vector<16x256xf32>
    %376 = arith.truncf %375 : vector<16x256xf32> to vector<16x256xbf16>
    %cst_206 = arith.constant 0.000000e+00 : f32
    %377 = vector.broadcast %cst_206 : f32 to vector<8x256xf32>
    %378 = vector.extract_strided_slice %376 {offsets = [0, 222], sizes = [16, 34], strides = [1, 1]} : vector<16x256xbf16> to vector<16x34xbf16>
    %379 = vector.extract_strided_slice %376 {offsets = [0, 0], sizes = [16, 222], strides = [1, 1]} : vector<16x256xbf16> to vector<16x222xbf16>
    %380 = tpu.concatenate %378, %379 in 1 : vector<16x34xbf16>, vector<16x222xbf16> -> vector<16x256xbf16>
    %c9_207 = arith.constant 9 : index
    %c0_208 = arith.constant 0 : index
    %381 = vector.load %arg2[%c9_207, %c0_208] : memref<27x256xbf16, #tpu.memory_space<vmem>>, vector<1x256xbf16>
    %382 = vector.broadcast %381 : vector<1x256xbf16> to vector<16x256xbf16>
    %383 = arith.mulf %380, %382 : vector<16x256xbf16>
    %c0_209 = arith.constant 0 : index
    %c0_210 = arith.constant 0 : index
    %c0_211 = arith.constant 0 : index
    %384 = vector.load %arg11[%c0_209, %c0_210, %c0_211] : memref<9x8x16xbf16, #tpu.memory_space<vmem>>, vector<1x8x16xbf16>
    %385 = vector.shape_cast %384 : vector<1x8x16xbf16> to vector<8x16xbf16>
    %cst_212 = arith.constant dense<0.000000e+00> : vector<8x256xf32>
    %386 = tpu.matmul %385, %383, %cst_212 {dimension_numbers = #tpu.dot_dimension_numbers<[1], [0], [0], [1], [0, 0, 1, 1], [], []>} : vector<8x16xbf16>, vector<16x256xbf16>, vector<8x256xf32> -> vector<8x256xf32>
    %387 = arith.addf %377, %386 : vector<8x256xf32>
    %388 = vector.extract_strided_slice %376 {offsets = [0, 224], sizes = [16, 32], strides = [1, 1]} : vector<16x256xbf16> to vector<16x32xbf16>
    %389 = vector.extract_strided_slice %376 {offsets = [0, 0], sizes = [16, 224], strides = [1, 1]} : vector<16x256xbf16> to vector<16x224xbf16>
    %390 = tpu.concatenate %388, %389 in 1 : vector<16x32xbf16>, vector<16x224xbf16> -> vector<16x256xbf16>
    %c10_213 = arith.constant 10 : index
    %c0_214 = arith.constant 0 : index
    %391 = vector.load %arg2[%c10_213, %c0_214] : memref<27x256xbf16, #tpu.memory_space<vmem>>, vector<1x256xbf16>
    %392 = vector.broadcast %391 : vector<1x256xbf16> to vector<16x256xbf16>
    %393 = arith.mulf %390, %392 : vector<16x256xbf16>
    %c1_215 = arith.constant 1 : index
    %c0_216 = arith.constant 0 : index
    %c0_217 = arith.constant 0 : index
    %394 = vector.load %arg11[%c1_215, %c0_216, %c0_217] : memref<9x8x16xbf16, #tpu.memory_space<vmem>>, vector<1x8x16xbf16>
    %395 = vector.shape_cast %394 : vector<1x8x16xbf16> to vector<8x16xbf16>
    %cst_218 = arith.constant dense<0.000000e+00> : vector<8x256xf32>
    %396 = tpu.matmul %395, %393, %cst_218 {dimension_numbers = #tpu.dot_dimension_numbers<[1], [0], [0], [1], [0, 0, 1, 1], [], []>} : vector<8x16xbf16>, vector<16x256xbf16>, vector<8x256xf32> -> vector<8x256xf32>
    %397 = arith.addf %387, %396 : vector<8x256xf32>
    %398 = vector.extract_strided_slice %376 {offsets = [0, 226], sizes = [16, 30], strides = [1, 1]} : vector<16x256xbf16> to vector<16x30xbf16>
    %399 = vector.extract_strided_slice %376 {offsets = [0, 0], sizes = [16, 226], strides = [1, 1]} : vector<16x256xbf16> to vector<16x226xbf16>
    %400 = tpu.concatenate %398, %399 in 1 : vector<16x30xbf16>, vector<16x226xbf16> -> vector<16x256xbf16>
    %c11_219 = arith.constant 11 : index
    %c0_220 = arith.constant 0 : index
    %401 = vector.load %arg2[%c11_219, %c0_220] : memref<27x256xbf16, #tpu.memory_space<vmem>>, vector<1x256xbf16>
    %402 = vector.broadcast %401 : vector<1x256xbf16> to vector<16x256xbf16>
    %403 = arith.mulf %400, %402 : vector<16x256xbf16>
    %c2_221 = arith.constant 2 : index
    %c0_222 = arith.constant 0 : index
    %c0_223 = arith.constant 0 : index
    %404 = vector.load %arg11[%c2_221, %c0_222, %c0_223] : memref<9x8x16xbf16, #tpu.memory_space<vmem>>, vector<1x8x16xbf16>
    %405 = vector.shape_cast %404 : vector<1x8x16xbf16> to vector<8x16xbf16>
    %cst_224 = arith.constant dense<0.000000e+00> : vector<8x256xf32>
    %406 = tpu.matmul %405, %403, %cst_224 {dimension_numbers = #tpu.dot_dimension_numbers<[1], [0], [0], [1], [0, 0, 1, 1], [], []>} : vector<8x16xbf16>, vector<16x256xbf16>, vector<8x256xf32> -> vector<8x256xf32>
    %407 = arith.addf %397, %406 : vector<8x256xf32>
    %408 = vector.extract_strided_slice %376 {offsets = [0, 254], sizes = [16, 2], strides = [1, 1]} : vector<16x256xbf16> to vector<16x2xbf16>
    %409 = vector.extract_strided_slice %376 {offsets = [0, 0], sizes = [16, 254], strides = [1, 1]} : vector<16x256xbf16> to vector<16x254xbf16>
    %410 = tpu.concatenate %408, %409 in 1 : vector<16x2xbf16>, vector<16x254xbf16> -> vector<16x256xbf16>
    %c12_225 = arith.constant 12 : index
    %c0_226 = arith.constant 0 : index
    %411 = vector.load %arg2[%c12_225, %c0_226] : memref<27x256xbf16, #tpu.memory_space<vmem>>, vector<1x256xbf16>
    %412 = vector.broadcast %411 : vector<1x256xbf16> to vector<16x256xbf16>
    %413 = arith.mulf %410, %412 : vector<16x256xbf16>
    %c3_227 = arith.constant 3 : index
    %c0_228 = arith.constant 0 : index
    %c0_229 = arith.constant 0 : index
    %414 = vector.load %arg11[%c3_227, %c0_228, %c0_229] : memref<9x8x16xbf16, #tpu.memory_space<vmem>>, vector<1x8x16xbf16>
    %415 = vector.shape_cast %414 : vector<1x8x16xbf16> to vector<8x16xbf16>
    %cst_230 = arith.constant dense<0.000000e+00> : vector<8x256xf32>
    %416 = tpu.matmul %415, %413, %cst_230 {dimension_numbers = #tpu.dot_dimension_numbers<[1], [0], [0], [1], [0, 0, 1, 1], [], []>} : vector<8x16xbf16>, vector<16x256xbf16>, vector<8x256xf32> -> vector<8x256xf32>
    %417 = arith.addf %407, %416 : vector<8x256xf32>
    %c13_231 = arith.constant 13 : index
    %c0_232 = arith.constant 0 : index
    %418 = vector.load %arg2[%c13_231, %c0_232] : memref<27x256xbf16, #tpu.memory_space<vmem>>, vector<1x256xbf16>
    %419 = vector.broadcast %418 : vector<1x256xbf16> to vector<16x256xbf16>
    %420 = arith.mulf %376, %419 : vector<16x256xbf16>
    %c4_233 = arith.constant 4 : index
    %c0_234 = arith.constant 0 : index
    %c0_235 = arith.constant 0 : index
    %421 = vector.load %arg11[%c4_233, %c0_234, %c0_235] : memref<9x8x16xbf16, #tpu.memory_space<vmem>>, vector<1x8x16xbf16>
    %422 = vector.shape_cast %421 : vector<1x8x16xbf16> to vector<8x16xbf16>
    %cst_236 = arith.constant dense<0.000000e+00> : vector<8x256xf32>
    %423 = tpu.matmul %422, %420, %cst_236 {dimension_numbers = #tpu.dot_dimension_numbers<[1], [0], [0], [1], [0, 0, 1, 1], [], []>} : vector<8x16xbf16>, vector<16x256xbf16>, vector<8x256xf32> -> vector<8x256xf32>
    %424 = arith.addf %417, %423 : vector<8x256xf32>
    %425 = vector.extract_strided_slice %376 {offsets = [0, 2], sizes = [16, 254], strides = [1, 1]} : vector<16x256xbf16> to vector<16x254xbf16>
    %426 = vector.extract_strided_slice %376 {offsets = [0, 0], sizes = [16, 2], strides = [1, 1]} : vector<16x256xbf16> to vector<16x2xbf16>
    %427 = tpu.concatenate %425, %426 in 1 : vector<16x254xbf16>, vector<16x2xbf16> -> vector<16x256xbf16>
    %c14_237 = arith.constant 14 : index
    %c0_238 = arith.constant 0 : index
    %428 = vector.load %arg2[%c14_237, %c0_238] : memref<27x256xbf16, #tpu.memory_space<vmem>>, vector<1x256xbf16>
    %429 = vector.broadcast %428 : vector<1x256xbf16> to vector<16x256xbf16>
    %430 = arith.mulf %427, %429 : vector<16x256xbf16>
    %c5_239 = arith.constant 5 : index
    %c0_240 = arith.constant 0 : index
    %c0_241 = arith.constant 0 : index
    %431 = vector.load %arg11[%c5_239, %c0_240, %c0_241] : memref<9x8x16xbf16, #tpu.memory_space<vmem>>, vector<1x8x16xbf16>
    %432 = vector.shape_cast %431 : vector<1x8x16xbf16> to vector<8x16xbf16>
    %cst_242 = arith.constant dense<0.000000e+00> : vector<8x256xf32>
    %433 = tpu.matmul %432, %430, %cst_242 {dimension_numbers = #tpu.dot_dimension_numbers<[1], [0], [0], [1], [0, 0, 1, 1], [], []>} : vector<8x16xbf16>, vector<16x256xbf16>, vector<8x256xf32> -> vector<8x256xf32>
    %434 = arith.addf %424, %433 : vector<8x256xf32>
    %435 = vector.extract_strided_slice %376 {offsets = [0, 30], sizes = [16, 226], strides = [1, 1]} : vector<16x256xbf16> to vector<16x226xbf16>
    %436 = vector.extract_strided_slice %376 {offsets = [0, 0], sizes = [16, 30], strides = [1, 1]} : vector<16x256xbf16> to vector<16x30xbf16>
    %437 = tpu.concatenate %435, %436 in 1 : vector<16x226xbf16>, vector<16x30xbf16> -> vector<16x256xbf16>
    %c15_243 = arith.constant 15 : index
    %c0_244 = arith.constant 0 : index
    %438 = vector.load %arg2[%c15_243, %c0_244] : memref<27x256xbf16, #tpu.memory_space<vmem>>, vector<1x256xbf16>
    %439 = vector.broadcast %438 : vector<1x256xbf16> to vector<16x256xbf16>
    %440 = arith.mulf %437, %439 : vector<16x256xbf16>
    %c6_245 = arith.constant 6 : index
    %c0_246 = arith.constant 0 : index
    %c0_247 = arith.constant 0 : index
    %441 = vector.load %arg11[%c6_245, %c0_246, %c0_247] : memref<9x8x16xbf16, #tpu.memory_space<vmem>>, vector<1x8x16xbf16>
    %442 = vector.shape_cast %441 : vector<1x8x16xbf16> to vector<8x16xbf16>
    %cst_248 = arith.constant dense<0.000000e+00> : vector<8x256xf32>
    %443 = tpu.matmul %442, %440, %cst_248 {dimension_numbers = #tpu.dot_dimension_numbers<[1], [0], [0], [1], [0, 0, 1, 1], [], []>} : vector<8x16xbf16>, vector<16x256xbf16>, vector<8x256xf32> -> vector<8x256xf32>
    %444 = arith.addf %434, %443 : vector<8x256xf32>
    %445 = vector.extract_strided_slice %376 {offsets = [0, 32], sizes = [16, 224], strides = [1, 1]} : vector<16x256xbf16> to vector<16x224xbf16>
    %446 = vector.extract_strided_slice %376 {offsets = [0, 0], sizes = [16, 32], strides = [1, 1]} : vector<16x256xbf16> to vector<16x32xbf16>
    %447 = tpu.concatenate %445, %446 in 1 : vector<16x224xbf16>, vector<16x32xbf16> -> vector<16x256xbf16>
    %c16_249 = arith.constant 16 : index
    %c0_250 = arith.constant 0 : index
    %448 = vector.load %arg2[%c16_249, %c0_250] : memref<27x256xbf16, #tpu.memory_space<vmem>>, vector<1x256xbf16>
    %449 = vector.broadcast %448 : vector<1x256xbf16> to vector<16x256xbf16>
    %450 = arith.mulf %447, %449 : vector<16x256xbf16>
    %c7_251 = arith.constant 7 : index
    %c0_252 = arith.constant 0 : index
    %c0_253 = arith.constant 0 : index
    %451 = vector.load %arg11[%c7_251, %c0_252, %c0_253] : memref<9x8x16xbf16, #tpu.memory_space<vmem>>, vector<1x8x16xbf16>
    %452 = vector.shape_cast %451 : vector<1x8x16xbf16> to vector<8x16xbf16>
    %cst_254 = arith.constant dense<0.000000e+00> : vector<8x256xf32>
    %453 = tpu.matmul %452, %450, %cst_254 {dimension_numbers = #tpu.dot_dimension_numbers<[1], [0], [0], [1], [0, 0, 1, 1], [], []>} : vector<8x16xbf16>, vector<16x256xbf16>, vector<8x256xf32> -> vector<8x256xf32>
    %454 = arith.addf %444, %453 : vector<8x256xf32>
    %455 = vector.extract_strided_slice %376 {offsets = [0, 34], sizes = [16, 222], strides = [1, 1]} : vector<16x256xbf16> to vector<16x222xbf16>
    %456 = vector.extract_strided_slice %376 {offsets = [0, 0], sizes = [16, 34], strides = [1, 1]} : vector<16x256xbf16> to vector<16x34xbf16>
    %457 = tpu.concatenate %455, %456 in 1 : vector<16x222xbf16>, vector<16x34xbf16> -> vector<16x256xbf16>
    %c17_255 = arith.constant 17 : index
    %c0_256 = arith.constant 0 : index
    %458 = vector.load %arg2[%c17_255, %c0_256] : memref<27x256xbf16, #tpu.memory_space<vmem>>, vector<1x256xbf16>
    %459 = vector.broadcast %458 : vector<1x256xbf16> to vector<16x256xbf16>
    %460 = arith.mulf %457, %459 : vector<16x256xbf16>
    %c8_257 = arith.constant 8 : index
    %c0_258 = arith.constant 0 : index
    %c0_259 = arith.constant 0 : index
    %461 = vector.load %arg11[%c8_257, %c0_258, %c0_259] : memref<9x8x16xbf16, #tpu.memory_space<vmem>>, vector<1x8x16xbf16>
    %462 = vector.shape_cast %461 : vector<1x8x16xbf16> to vector<8x16xbf16>
    %cst_260 = arith.constant dense<0.000000e+00> : vector<8x256xf32>
    %463 = tpu.matmul %462, %460, %cst_260 {dimension_numbers = #tpu.dot_dimension_numbers<[1], [0], [0], [1], [0, 0, 1, 1], [], []>} : vector<8x16xbf16>, vector<16x256xbf16>, vector<8x256xf32> -> vector<8x256xf32>
    %464 = arith.addf %454, %463 : vector<8x256xf32>
    %c0_261 = arith.constant 0 : index
    %c0_262 = arith.constant 0 : index
    %465 = vector.load %arg12[%c0_261, %c0_262] : memref<8x1xf32, #tpu.memory_space<vmem>>, vector<8x1xf32>
    %466 = vector.broadcast %465 : vector<8x1xf32> to vector<8x256xf32>
    %467 = arith.addf %464, %466 : vector<8x256xf32>
    %cst_263 = arith.constant 0.000000e+00 : f32
    %468 = vector.broadcast %cst_263 : f32 to vector<8x256xf32>
    %469 = arith.maximumf %467, %468 : vector<8x256xf32>
    %470 = arith.truncf %469 : vector<8x256xf32> to vector<8x256xbf16>
    %cst_264 = arith.constant 0.000000e+00 : f32
    %471 = vector.broadcast %cst_264 : f32 to vector<4x256xf32>
    %472 = vector.extract_strided_slice %470 {offsets = [0, 239], sizes = [8, 17], strides = [1, 1]} : vector<8x256xbf16> to vector<8x17xbf16>
    %473 = vector.extract_strided_slice %470 {offsets = [0, 0], sizes = [8, 239], strides = [1, 1]} : vector<8x256xbf16> to vector<8x239xbf16>
    %474 = tpu.concatenate %472, %473 in 1 : vector<8x17xbf16>, vector<8x239xbf16> -> vector<8x256xbf16>
    %c0_265 = arith.constant 0 : index
    %c0_266 = arith.constant 0 : index
    %475 = vector.load %arg2[%c0_265, %c0_266] : memref<27x256xbf16, #tpu.memory_space<vmem>>, vector<1x256xbf16>
    %476 = vector.broadcast %475 : vector<1x256xbf16> to vector<8x256xbf16>
    %477 = arith.mulf %474, %476 : vector<8x256xbf16>
    %c0_267 = arith.constant 0 : index
    %c0_268 = arith.constant 0 : index
    %c0_269 = arith.constant 0 : index
    %478 = vector.load %arg13[%c0_267, %c0_268, %c0_269] : memref<9x4x8xbf16, #tpu.memory_space<vmem>>, vector<1x4x8xbf16>
    %479 = vector.shape_cast %478 : vector<1x4x8xbf16> to vector<4x8xbf16>
    %cst_270 = arith.constant dense<0.000000e+00> : vector<4x256xf32>
    %480 = tpu.matmul %479, %477, %cst_270 {dimension_numbers = #tpu.dot_dimension_numbers<[1], [0], [0], [1], [0, 0, 1, 1], [], []>} : vector<4x8xbf16>, vector<8x256xbf16>, vector<4x256xf32> -> vector<4x256xf32>
    %481 = arith.addf %471, %480 : vector<4x256xf32>
    %482 = vector.extract_strided_slice %470 {offsets = [0, 240], sizes = [8, 16], strides = [1, 1]} : vector<8x256xbf16> to vector<8x16xbf16>
    %483 = vector.extract_strided_slice %470 {offsets = [0, 0], sizes = [8, 240], strides = [1, 1]} : vector<8x256xbf16> to vector<8x240xbf16>
    %484 = tpu.concatenate %482, %483 in 1 : vector<8x16xbf16>, vector<8x240xbf16> -> vector<8x256xbf16>
    %c1_271 = arith.constant 1 : index
    %c0_272 = arith.constant 0 : index
    %485 = vector.load %arg2[%c1_271, %c0_272] : memref<27x256xbf16, #tpu.memory_space<vmem>>, vector<1x256xbf16>
    %486 = vector.broadcast %485 : vector<1x256xbf16> to vector<8x256xbf16>
    %487 = arith.mulf %484, %486 : vector<8x256xbf16>
    %c1_273 = arith.constant 1 : index
    %c0_274 = arith.constant 0 : index
    %c0_275 = arith.constant 0 : index
    %488 = vector.load %arg13[%c1_273, %c0_274, %c0_275] : memref<9x4x8xbf16, #tpu.memory_space<vmem>>, vector<1x4x8xbf16>
    %489 = vector.shape_cast %488 : vector<1x4x8xbf16> to vector<4x8xbf16>
    %cst_276 = arith.constant dense<0.000000e+00> : vector<4x256xf32>
    %490 = tpu.matmul %489, %487, %cst_276 {dimension_numbers = #tpu.dot_dimension_numbers<[1], [0], [0], [1], [0, 0, 1, 1], [], []>} : vector<4x8xbf16>, vector<8x256xbf16>, vector<4x256xf32> -> vector<4x256xf32>
    %491 = arith.addf %481, %490 : vector<4x256xf32>
    %492 = vector.extract_strided_slice %470 {offsets = [0, 241], sizes = [8, 15], strides = [1, 1]} : vector<8x256xbf16> to vector<8x15xbf16>
    %493 = vector.extract_strided_slice %470 {offsets = [0, 0], sizes = [8, 241], strides = [1, 1]} : vector<8x256xbf16> to vector<8x241xbf16>
    %494 = tpu.concatenate %492, %493 in 1 : vector<8x15xbf16>, vector<8x241xbf16> -> vector<8x256xbf16>
    %c2_277 = arith.constant 2 : index
    %c0_278 = arith.constant 0 : index
    %495 = vector.load %arg2[%c2_277, %c0_278] : memref<27x256xbf16, #tpu.memory_space<vmem>>, vector<1x256xbf16>
    %496 = vector.broadcast %495 : vector<1x256xbf16> to vector<8x256xbf16>
    %497 = arith.mulf %494, %496 : vector<8x256xbf16>
    %c2_279 = arith.constant 2 : index
    %c0_280 = arith.constant 0 : index
    %c0_281 = arith.constant 0 : index
    %498 = vector.load %arg13[%c2_279, %c0_280, %c0_281] : memref<9x4x8xbf16, #tpu.memory_space<vmem>>, vector<1x4x8xbf16>
    %499 = vector.shape_cast %498 : vector<1x4x8xbf16> to vector<4x8xbf16>
    %cst_282 = arith.constant dense<0.000000e+00> : vector<4x256xf32>
    %500 = tpu.matmul %499, %497, %cst_282 {dimension_numbers = #tpu.dot_dimension_numbers<[1], [0], [0], [1], [0, 0, 1, 1], [], []>} : vector<4x8xbf16>, vector<8x256xbf16>, vector<4x256xf32> -> vector<4x256xf32>
    %501 = arith.addf %491, %500 : vector<4x256xf32>
    %502 = vector.extract_strided_slice %470 {offsets = [0, 255], sizes = [8, 1], strides = [1, 1]} : vector<8x256xbf16> to vector<8x1xbf16>
    %503 = vector.extract_strided_slice %470 {offsets = [0, 0], sizes = [8, 255], strides = [1, 1]} : vector<8x256xbf16> to vector<8x255xbf16>
    %504 = tpu.concatenate %502, %503 in 1 : vector<8x1xbf16>, vector<8x255xbf16> -> vector<8x256xbf16>
    %c3_283 = arith.constant 3 : index
    %c0_284 = arith.constant 0 : index
    %505 = vector.load %arg2[%c3_283, %c0_284] : memref<27x256xbf16, #tpu.memory_space<vmem>>, vector<1x256xbf16>
    %506 = vector.broadcast %505 : vector<1x256xbf16> to vector<8x256xbf16>
    %507 = arith.mulf %504, %506 : vector<8x256xbf16>
    %c3_285 = arith.constant 3 : index
    %c0_286 = arith.constant 0 : index
    %c0_287 = arith.constant 0 : index
    %508 = vector.load %arg13[%c3_285, %c0_286, %c0_287] : memref<9x4x8xbf16, #tpu.memory_space<vmem>>, vector<1x4x8xbf16>
    %509 = vector.shape_cast %508 : vector<1x4x8xbf16> to vector<4x8xbf16>
    %cst_288 = arith.constant dense<0.000000e+00> : vector<4x256xf32>
    %510 = tpu.matmul %509, %507, %cst_288 {dimension_numbers = #tpu.dot_dimension_numbers<[1], [0], [0], [1], [0, 0, 1, 1], [], []>} : vector<4x8xbf16>, vector<8x256xbf16>, vector<4x256xf32> -> vector<4x256xf32>
    %511 = arith.addf %501, %510 : vector<4x256xf32>
    %c4_289 = arith.constant 4 : index
    %c0_290 = arith.constant 0 : index
    %512 = vector.load %arg2[%c4_289, %c0_290] : memref<27x256xbf16, #tpu.memory_space<vmem>>, vector<1x256xbf16>
    %513 = vector.broadcast %512 : vector<1x256xbf16> to vector<8x256xbf16>
    %514 = arith.mulf %470, %513 : vector<8x256xbf16>
    %c4_291 = arith.constant 4 : index
    %c0_292 = arith.constant 0 : index
    %c0_293 = arith.constant 0 : index
    %515 = vector.load %arg13[%c4_291, %c0_292, %c0_293] : memref<9x4x8xbf16, #tpu.memory_space<vmem>>, vector<1x4x8xbf16>
    %516 = vector.shape_cast %515 : vector<1x4x8xbf16> to vector<4x8xbf16>
    %cst_294 = arith.constant dense<0.000000e+00> : vector<4x256xf32>
    %517 = tpu.matmul %516, %514, %cst_294 {dimension_numbers = #tpu.dot_dimension_numbers<[1], [0], [0], [1], [0, 0, 1, 1], [], []>} : vector<4x8xbf16>, vector<8x256xbf16>, vector<4x256xf32> -> vector<4x256xf32>
    %518 = arith.addf %511, %517 : vector<4x256xf32>
    %519 = vector.extract_strided_slice %470 {offsets = [0, 1], sizes = [8, 255], strides = [1, 1]} : vector<8x256xbf16> to vector<8x255xbf16>
    %520 = vector.extract_strided_slice %470 {offsets = [0, 0], sizes = [8, 1], strides = [1, 1]} : vector<8x256xbf16> to vector<8x1xbf16>
    %521 = tpu.concatenate %519, %520 in 1 : vector<8x255xbf16>, vector<8x1xbf16> -> vector<8x256xbf16>
    %c5_295 = arith.constant 5 : index
    %c0_296 = arith.constant 0 : index
    %522 = vector.load %arg2[%c5_295, %c0_296] : memref<27x256xbf16, #tpu.memory_space<vmem>>, vector<1x256xbf16>
    %523 = vector.broadcast %522 : vector<1x256xbf16> to vector<8x256xbf16>
    %524 = arith.mulf %521, %523 : vector<8x256xbf16>
    %c5_297 = arith.constant 5 : index
    %c0_298 = arith.constant 0 : index
    %c0_299 = arith.constant 0 : index
    %525 = vector.load %arg13[%c5_297, %c0_298, %c0_299] : memref<9x4x8xbf16, #tpu.memory_space<vmem>>, vector<1x4x8xbf16>
    %526 = vector.shape_cast %525 : vector<1x4x8xbf16> to vector<4x8xbf16>
    %cst_300 = arith.constant dense<0.000000e+00> : vector<4x256xf32>
    %527 = tpu.matmul %526, %524, %cst_300 {dimension_numbers = #tpu.dot_dimension_numbers<[1], [0], [0], [1], [0, 0, 1, 1], [], []>} : vector<4x8xbf16>, vector<8x256xbf16>, vector<4x256xf32> -> vector<4x256xf32>
    %528 = arith.addf %518, %527 : vector<4x256xf32>
    %529 = vector.extract_strided_slice %470 {offsets = [0, 15], sizes = [8, 241], strides = [1, 1]} : vector<8x256xbf16> to vector<8x241xbf16>
    %530 = vector.extract_strided_slice %470 {offsets = [0, 0], sizes = [8, 15], strides = [1, 1]} : vector<8x256xbf16> to vector<8x15xbf16>
    %531 = tpu.concatenate %529, %530 in 1 : vector<8x241xbf16>, vector<8x15xbf16> -> vector<8x256xbf16>
    %c6_301 = arith.constant 6 : index
    %c0_302 = arith.constant 0 : index
    %532 = vector.load %arg2[%c6_301, %c0_302] : memref<27x256xbf16, #tpu.memory_space<vmem>>, vector<1x256xbf16>
    %533 = vector.broadcast %532 : vector<1x256xbf16> to vector<8x256xbf16>
    %534 = arith.mulf %531, %533 : vector<8x256xbf16>
    %c6_303 = arith.constant 6 : index
    %c0_304 = arith.constant 0 : index
    %c0_305 = arith.constant 0 : index
    %535 = vector.load %arg13[%c6_303, %c0_304, %c0_305] : memref<9x4x8xbf16, #tpu.memory_space<vmem>>, vector<1x4x8xbf16>
    %536 = vector.shape_cast %535 : vector<1x4x8xbf16> to vector<4x8xbf16>
    %cst_306 = arith.constant dense<0.000000e+00> : vector<4x256xf32>
    %537 = tpu.matmul %536, %534, %cst_306 {dimension_numbers = #tpu.dot_dimension_numbers<[1], [0], [0], [1], [0, 0, 1, 1], [], []>} : vector<4x8xbf16>, vector<8x256xbf16>, vector<4x256xf32> -> vector<4x256xf32>
    %538 = arith.addf %528, %537 : vector<4x256xf32>
    %539 = vector.extract_strided_slice %470 {offsets = [0, 16], sizes = [8, 240], strides = [1, 1]} : vector<8x256xbf16> to vector<8x240xbf16>
    %540 = vector.extract_strided_slice %470 {offsets = [0, 0], sizes = [8, 16], strides = [1, 1]} : vector<8x256xbf16> to vector<8x16xbf16>
    %541 = tpu.concatenate %539, %540 in 1 : vector<8x240xbf16>, vector<8x16xbf16> -> vector<8x256xbf16>
    %c7_307 = arith.constant 7 : index
    %c0_308 = arith.constant 0 : index
    %542 = vector.load %arg2[%c7_307, %c0_308] : memref<27x256xbf16, #tpu.memory_space<vmem>>, vector<1x256xbf16>
    %543 = vector.broadcast %542 : vector<1x256xbf16> to vector<8x256xbf16>
    %544 = arith.mulf %541, %543 : vector<8x256xbf16>
    %c7_309 = arith.constant 7 : index
    %c0_310 = arith.constant 0 : index
    %c0_311 = arith.constant 0 : index
    %545 = vector.load %arg13[%c7_309, %c0_310, %c0_311] : memref<9x4x8xbf16, #tpu.memory_space<vmem>>, vector<1x4x8xbf16>
    %546 = vector.shape_cast %545 : vector<1x4x8xbf16> to vector<4x8xbf16>
    %cst_312 = arith.constant dense<0.000000e+00> : vector<4x256xf32>
    %547 = tpu.matmul %546, %544, %cst_312 {dimension_numbers = #tpu.dot_dimension_numbers<[1], [0], [0], [1], [0, 0, 1, 1], [], []>} : vector<4x8xbf16>, vector<8x256xbf16>, vector<4x256xf32> -> vector<4x256xf32>
    %548 = arith.addf %538, %547 : vector<4x256xf32>
    %549 = vector.extract_strided_slice %470 {offsets = [0, 17], sizes = [8, 239], strides = [1, 1]} : vector<8x256xbf16> to vector<8x239xbf16>
    %550 = vector.extract_strided_slice %470 {offsets = [0, 0], sizes = [8, 17], strides = [1, 1]} : vector<8x256xbf16> to vector<8x17xbf16>
    %551 = tpu.concatenate %549, %550 in 1 : vector<8x239xbf16>, vector<8x17xbf16> -> vector<8x256xbf16>
    %c8_313 = arith.constant 8 : index
    %c0_314 = arith.constant 0 : index
    %552 = vector.load %arg2[%c8_313, %c0_314] : memref<27x256xbf16, #tpu.memory_space<vmem>>, vector<1x256xbf16>
    %553 = vector.broadcast %552 : vector<1x256xbf16> to vector<8x256xbf16>
    %554 = arith.mulf %551, %553 : vector<8x256xbf16>
    %c8_315 = arith.constant 8 : index
    %c0_316 = arith.constant 0 : index
    %c0_317 = arith.constant 0 : index
    %555 = vector.load %arg13[%c8_315, %c0_316, %c0_317] : memref<9x4x8xbf16, #tpu.memory_space<vmem>>, vector<1x4x8xbf16>
    %556 = vector.shape_cast %555 : vector<1x4x8xbf16> to vector<4x8xbf16>
    %cst_318 = arith.constant dense<0.000000e+00> : vector<4x256xf32>
    %557 = tpu.matmul %556, %554, %cst_318 {dimension_numbers = #tpu.dot_dimension_numbers<[1], [0], [0], [1], [0, 0, 1, 1], [], []>} : vector<4x8xbf16>, vector<8x256xbf16>, vector<4x256xf32> -> vector<4x256xf32>
    %558 = arith.addf %548, %557 : vector<4x256xf32>
    %c0_319 = arith.constant 0 : index
    %c0_320 = arith.constant 0 : index
    %559 = vector.load %arg14[%c0_319, %c0_320] : memref<4x1xf32, #tpu.memory_space<vmem>>, vector<4x1xf32>
    %560 = vector.broadcast %559 : vector<4x1xf32> to vector<4x256xf32>
    %561 = arith.addf %558, %560 : vector<4x256xf32>
    %cst_321 = arith.constant 0.000000e+00 : f32
    %562 = vector.broadcast %cst_321 : f32 to vector<4x256xf32>
    %563 = arith.maximumf %561, %562 : vector<4x256xf32>
    %c0_322 = arith.constant 0 : index
    %c0_323 = arith.constant 0 : index
    %564 = vector.load %arg15[%c0_322, %c0_323] : memref<4x1xf32, #tpu.memory_space<vmem>>, vector<4x1xf32>
    %565 = vector.broadcast %564 : vector<4x1xf32> to vector<4x256xf32>
    %566 = arith.mulf %565, %563 : vector<4x256xf32>
    %cst_324 = arith.constant dense<0.000000e+00> : vector<256xf32>
    %567 = vector.multi_reduction <add>, %566, %cst_324 [0] : vector<4x256xf32> to vector<256xf32>
    %568 = vector.shape_cast %567 : vector<256xf32> to vector<1x256xf32>
    %c0_325 = arith.constant 0 : index
    %c0_326 = arith.constant 0 : index
    %569 = vector.load %arg16[%c0_325, %c0_326] : memref<1x1xf32, #tpu.memory_space<vmem>>, vector<1x1xf32>
    %570 = vector.broadcast %569 : vector<1x1xf32> to vector<1x256xf32>
    %571 = arith.addf %568, %570 : vector<1x256xf32>
    %c0_327 = arith.constant 0 : index
    %c0_328 = arith.constant 0 : index
    %572 = vector.load %arg17[%c0_327, %c0_328] : memref<1x256xf32, #tpu.memory_space<vmem>>, vector<1x256xf32>
    tpu.vector_store %arg17[%c0_327, %c0_328], %571 {strides = array<i32>} : memref<1x256xf32, #tpu.memory_space<vmem>>, vector<1x256xf32>,
    return
  }
  func.func @transform_0(%arg0: i32) -> (i32, i32) {
    %c0_i32 = arith.constant 0 : i32
    %c0_i32_0 = arith.constant 0 : i32
    return %c0_i32, %arg0 : i32, i32
  }
  func.func @transform_1(%arg0: i32) -> (i32, i32) {
    %c0_i32 = arith.constant 0 : i32
    %c0_i32_0 = arith.constant 0 : i32
    %c0_i32_1 = arith.constant 0 : i32
    return %c0_i32, %c0_i32_0 : i32, i32
  }
  func.func @transform_2(%arg0: i32) -> (i32, i32, i32) {
    %c0_i32 = arith.constant 0 : i32
    %c0_i32_0 = arith.constant 0 : i32
    %c0_i32_1 = arith.constant 0 : i32
    %c0_i32_2 = arith.constant 0 : i32
    return %c0_i32, %c0_i32_0, %c0_i32_1 : i32, i32, i32
  }
  func.func @transform_3(%arg0: i32) -> (i32, i32) {
    %c0_i32 = arith.constant 0 : i32
    %c0_i32_0 = arith.constant 0 : i32
    %c0_i32_1 = arith.constant 0 : i32
    return %c0_i32, %c0_i32_0 : i32, i32
  }
  func.func @transform_4(%arg0: i32) -> (i32, i32, i32) {
    %c0_i32 = arith.constant 0 : i32
    %c0_i32_0 = arith.constant 0 : i32
    %c0_i32_1 = arith.constant 0 : i32
    %c0_i32_2 = arith.constant 0 : i32
    return %c0_i32, %c0_i32_0, %c0_i32_1 : i32, i32, i32
  }
  func.func @transform_5(%arg0: i32) -> (i32, i32) {
    %c0_i32 = arith.constant 0 : i32
    %c0_i32_0 = arith.constant 0 : i32
    %c0_i32_1 = arith.constant 0 : i32
    return %c0_i32, %c0_i32_0 : i32, i32
  }
  func.func @transform_6(%arg0: i32) -> (i32, i32, i32) {
    %c0_i32 = arith.constant 0 : i32
    %c0_i32_0 = arith.constant 0 : i32
    %c0_i32_1 = arith.constant 0 : i32
    %c0_i32_2 = arith.constant 0 : i32
    return %c0_i32, %c0_i32_0, %c0_i32_1 : i32, i32, i32
  }
  func.func @transform_7(%arg0: i32) -> (i32, i32) {
    %c0_i32 = arith.constant 0 : i32
    %c0_i32_0 = arith.constant 0 : i32
    %c0_i32_1 = arith.constant 0 : i32
    return %c0_i32, %c0_i32_0 : i32, i32
  }
  func.func @transform_8(%arg0: i32) -> (i32, i32, i32) {
    %c0_i32 = arith.constant 0 : i32
    %c0_i32_0 = arith.constant 0 : i32
    %c0_i32_1 = arith.constant 0 : i32
    %c0_i32_2 = arith.constant 0 : i32
    return %c0_i32, %c0_i32_0, %c0_i32_1 : i32, i32, i32
  }
  func.func @transform_9(%arg0: i32) -> (i32, i32) {
    %c0_i32 = arith.constant 0 : i32
    %c0_i32_0 = arith.constant 0 : i32
    %c0_i32_1 = arith.constant 0 : i32
    return %c0_i32, %c0_i32_0 : i32, i32
  }
  func.func @transform_10(%arg0: i32) -> (i32, i32, i32) {
    %c0_i32 = arith.constant 0 : i32
    %c0_i32_0 = arith.constant 0 : i32
    %c0_i32_1 = arith.constant 0 : i32
    %c0_i32_2 = arith.constant 0 : i32
    return %c0_i32, %c0_i32_0, %c0_i32_1 : i32, i32, i32
  }
  func.func @transform_11(%arg0: i32) -> (i32, i32) {
    %c0_i32 = arith.constant 0 : i32
    %c0_i32_0 = arith.constant 0 : i32
    %c0_i32_1 = arith.constant 0 : i32
    return %c0_i32, %c0_i32_0 : i32, i32
  }
  func.func @transform_12(%arg0: i32) -> (i32, i32, i32) {
    %c0_i32 = arith.constant 0 : i32
    %c0_i32_0 = arith.constant 0 : i32
    %c0_i32_1 = arith.constant 0 : i32
    %c0_i32_2 = arith.constant 0 : i32
    return %c0_i32, %c0_i32_0, %c0_i32_1 : i32, i32, i32
  }
  func.func @transform_13(%arg0: i32) -> (i32, i32) {
    %c0_i32 = arith.constant 0 : i32
    %c0_i32_0 = arith.constant 0 : i32
    %c0_i32_1 = arith.constant 0 : i32
    return %c0_i32, %c0_i32_0 : i32, i32
  }
  func.func @transform_14(%arg0: i32) -> (i32, i32) {
    %c0_i32 = arith.constant 0 : i32
    %c0_i32_0 = arith.constant 0 : i32
    %c0_i32_1 = arith.constant 0 : i32
    return %c0_i32, %c0_i32_0 : i32, i32
  }
  func.func @transform_15(%arg0: i32) -> (i32, i32) {
    %c0_i32 = arith.constant 0 : i32
    %c0_i32_0 = arith.constant 0 : i32
    %c0_i32_1 = arith.constant 0 : i32
    return %c0_i32, %c0_i32_0 : i32, i32
  }
  func.func @transform_16(%arg0: i32) -> (i32, i32) {
    %c0_i32 = arith.constant 0 : i32
    %c0_i32_0 = arith.constant 0 : i32
    return %c0_i32, %arg0 : i32, i32
  }
}

</mosaic_0001>

<bundles_post_ra>
// kernel: diendec_forward.1
= control target key start
LH: loop header
LB: loop body
LE: loop exit
PB: predicated region body
PF: predicated region fallthrough
CT: control target
= control target key end

     0   :  { %s5595_s23 = smov 0   ;;  %s6814_s0 = inlined_call_operand.vmem [shape: bf16[4,512], index: 0, kind: input, shape index: {}]   ;;  %s6815_s1 = inlined_call_operand.vmem [shape: bf16[27,256], index: 1, kind: input, shape index: {}]   ;;  %s6816_s2 = inlined_call_operand.vmem [shape: bf16[9,8,4], index: 2, kind: input, shape index: {}]   ;;  %s6817_s3 = inlined_call_operand.vmem [shape: f32[8,1], index: 3, kind: input, shape index: {}]   ;;  %s6818_s4 = inlined_call_operand.vmem [shape: bf16[9,16,8], index: 4, kind: input, shape index: {}]   ;;  %s6819_s5 = inlined_call_operand.vmem [shape: f32[16,1], index: 5, kind: input, shape index: {}]   ;;  %s6820_s6 = inlined_call_operand.vmem [shape: bf16[9,32,16], index: 6, kind: input, shape index: {}]   ;;  %s6821_s7 = inlined_call_operand.vmem [shape: f32[32,1], index: 7, kind: input, shape index: {}]   ;;  %s6822_s8 = inlined_call_operand.vmem [shape: bf16[9,16,32], index: 8, kind: input, shape index: {}]   ;;  %s6823_s9 = inlined_call_operand.vmem [shape: f32[16,1], index: 9, kind: input, shape index: {}]   ;;  %s6824_s10 = inlined_call_operand.vmem [shape: bf16[9,8,16], index: 10, kind: input, shape index: {}]   ;;  %s6825_s11 = inlined_call_operand.vmem [shape: f32[8,1], index: 11, kind: input, shape index: {}]   ;;  %s6826_s12 = inlined_call_operand.vmem [shape: bf16[9,4,8], index: 12, kind: input, shape index: {}]   ;;  %s6827_s13 = inlined_call_operand.vmem [shape: f32[4,1], index: 13, kind: input, shape index: {}]   ;;  %s6828_s14 = inlined_call_operand.vmem [shape: f32[4,1], index: 14, kind: input, shape index: {}]   ;;  %s6829_s15 = inlined_call_operand.<no memory space> [shape: f32[1,1], index: 15, kind: input, shape index: {}]   ;;  %s6830_s16 = inlined_call_operand.vmem [shape: f32[1,512], index: 16, kind: output, shape index: {}]  }
   0x1   :  { %6946 = sst [smem:[#allocation66_spill]] %s6814_s0  ;;  %v21_v0 = vstv %s6829_s15 }
   0x2   :  { %22 = vst [vmem:[#allocation2] sm:$0x1] %v21_v0 }
   0x3 LB: > { %s5113_s24 = sadd.s32 4294967295, %s5481_s23   ;;  %p5117_p0 = scmp.ge.s32.totalorder %s5481_s23, 1  ;;  %s5481_s23 = sphi %s5595_s23, %s28_s23  }
   0x4   : > { %p465_p1 = scmp.lt.s32.totalorder %s5481_s23, 3 }
   0x6   : > { %p466_p2 = pnand %p5117_p0, %p465_p1 }
   0x8   : > { %469 = sbr.rel (%p466_p2) target bundleno = 2254 (0x8ce), region = 84 }
   0xd   : > { %s5118_s25 = sshll.u32 %s5113_s24, 1  ;;  %v6850_v1 = vlaneseq  ;;  %v5483_v2 = vmov 1983009808   ;;  %s6948_s28 = sld [smem:[#allocation66_spill]]  ;;  %v881_v9 = vld [vmem:[%s6815_s1] sm:$0x44] }
   0xe   : > { %p515_p3 = scmp.lt.s32.totalorder %s5118_s25, 3  ;;  %v529_v3 = vunpack.c.l.s4 %v5483_v2  ;;  %v6851_v10 = vmov 0   ;;  %s6843_s17 = smov 17   ;;  %v5138_v13 = vcombine.low %v881_v9, %v881_v9  ;;  %v5139_v14 = vcombine.high %v881_v9, %v881_v9  ;;  %v1332_v23 = vld [vmem:[%s6817_s3] sm:$0xff] }
   0xf   : > { %v5604_v4 = vshrl.u32 %v6850_v1, 7  ;;  %644 = vmatprep.mubr.bf16.mxu0 %v6851_v10  ;;  %694 = vmatprep.mubr.bf16.mxu1 %v6851_v10  ;;  %s6845_s18 = smov 16   ;;  %s6841_s19 = smov 15   ;;  %v548_v24 = vld [vmem:[%s6815_s1] sm:$0x11]  ;;  %vm540_vm0 = vcmask 138240  }
  0x10   : > { %s7113_s25 = smov (!%p515_p3, %s5118_s25), 3  ;;  %v530_v5 = vunpack.c.0.s8 %v529_v3  ;;  %5403 = vset.pattern.permute.xlu0 %v6851_v10  ;;  %5404 = vset.pattern.permute.xlu1 %v6851_v10  ;;  %v888_v15 = vpack.i.b16 %v5138_v13, %v5138_v13  ;;  %v895_v16 = vpack.i.b16 %v5139_v14, %v5139_v14  ;;  %s6839_s20 = smov 1   ;;  %v5122_v25 = vcombine.high %v548_v24, %v548_v24  ;;  %v803_v27 = vld [vmem:[%s6815_s1] sm:$0x22]  ;;  %v988_v41 = vld [vmem:[%s6815_s1] sm:$0x44] }
  0x11   : > { %6947 = vst [vmem:[#allocation3_spill] sm:$0xff] %v5604_v4  ;;  %s5119_s15 = sshll.u32 %s7113_s25, 1  ;;  %v5621_v12 = vsub.s32 2, %v5604_v4  ;;  %s6837_s21 = smov 127   ;;  %v5121_v26 = vcombine.low %v548_v24, %v548_v24  ;;  %v715_v28 = vld [vmem:[%s6815_s1] sm:$0x22]  ;;  %v5133_v31 = vcombine.low %v803_v27, %v803_v27  ;;  %v5134_v32 = vcombine.high %v803_v27, %v803_v27 }
  0x12   : > { %v533_v6 = vsub.s32 %v530_v5, %v5604_v4  ;;  %s6833_s22 = smov 113   ;;  %s6831_s24 = smov 112   ;;  %v590_v29 = vshrl.u32 %v5122_v25, 16  ;;  %v5662_v33 = vsub.s32 0, %v5604_v4  ;;  %v562_v34 = vpack.i.b16 %v5122_v25, %v5122_v25  ;;  %v1078_v5 = vld [vmem:[%s6815_s1] sm:$0x88] }
  0x13   : > { %s518_s29 = scalar_lea.vmem %s6948_s28, %s5119_s15  ;;  %v5627_v17 = vrot.slane %v888_v15, %v5621_v12  ;;  %v5630_v18 = vrot.slane %v895_v16, %v5621_v12  ;;  %s6835_s15 = smov 111   ;;  %v583_v30 = vshrl.u32 %v5121_v26, 16  ;;  %v5128_v35 = vcombine.low %v715_v28, %v715_v28  ;;  %v570_v14 = vld [vmem:[%s6816_s2] sm:$0xf]  ;;  %v5123_v27 = vld [vmem:[%s6816_s2 + $0x4] sm:$0xf] }
  0x14   : > { %v526_v7 = vld [vmem:[%s518_s29] sm:$0xf]  ;;  %6951 = vst [vmem:[#allocation6_spill] sm:$0xff] %v5662_v33  ;;  %v555_v36 = vpack.i.b16 %v5121_v26, %v5121_v26  ;;  %v5129_v37 = vcombine.high %v715_v28, %v715_v28  ;;  %v591_v39 = vpack.i.b16 %v590_v29, %v590_v29  ;;  %v810_v42 = vshrl.u32 %v5133_v31, 16  ;;  %s6879_s28 = smov 30   ;;  %s6877_s29 = smov 2  }
  0x15   : > { %v534_v8 = vrot.slane %v526_v7, %v533_v6  ;;  %6949 = vst [vmem:[#allocation4_spill] sm:$0xff] %v5627_v17  ;;  %6950 = vst [vmem:[#allocation5_spill] sm:$0xff] %v5630_v18  ;;  %v903_v19 = vcombine.low %v5627_v17, %v5630_v18  ;;  %v584_v40 = vpack.i.b16 %v583_v30, %v583_v30  ;;  %v818_v43 = vshrl.u32 %v5134_v32, 16  ;;  %s6875_s30 = smov 126   ;;  %s6873_s0 = smov 98  }
  0x16   : > { %v5668_v44 = vsub.s32 1, %v5604_v4  ;;  %v5671_v46 = vrot.slane %v562_v34, %v5662_v33  ;;  %v722_v47 = vpack.i.b16 %v5128_v35, %v5128_v35  ;;  %v5674_v48 = vrot.slane %v555_v36, %v5662_v33  ;;  %s6871_s26 = smov 96   ;;  %s6869_s27 = smov 94  }
  0x17   : > { %538 = vrot.lane.b32.xlu1 %v534_v8, %s6843_s17  ;;  %v535_v11 = vcombine.high %v534_v8, %v534_v8  ;;  %v910_v20 = vrot.slane %v903_v19, %v533_v6  ;;  %vm605_vm1 = vcmask 1041408   ;;  %v729_v49 = vpack.i.b16 %v5129_v37, %v5129_v37 }
  0x18   : > { %6952 = vst [vmem:[#allocation7_spill] sm:$0xff] %v5671_v46  ;;  %6953 = vst [vmem:[#allocation8_spill] sm:$0xff] %v5674_v48  ;;  %v5143_v50 = vcombine.low %v988_v41, %v988_v41  ;;  %vm575_vm2 = vcmask 130048   ;;  %v5677_v52 = vrot.slane %v591_v39, %v5662_v33  ;;  %v5680_v53 = vrot.slane %v584_v40, %v5662_v33 }
  0x19   : > { %571 = vrot.lane.b32.xlu0 %v535_v11, %s6845_s18  ;;  %v912_v21 = vmul.bf16 %v910_v20, %v526_v7  ;;  %v5144_v54 = vcombine.high %v988_v41, %v988_v41  ;;  %v811_v57 = vpack.i.b16 %v810_v42, %v810_v42  ;;  %v819_v58 = vpack.i.b16 %v818_v43, %v818_v43 }
  0x1a   : > { %6954 = vst [vmem:[#allocation9_spill] sm:$0xff] %v5677_v52  ;;  %6955 = vst [vmem:[#allocation10_spill] sm:$0xff] %v5680_v53  ;;  %vm6885_vm3 = vcmask 121856   ;;  %v5686_v61 = vrot.slane %v722_v47, %v5668_v44  ;;  %v5691_v0 = vrot.slane %v729_v49, %v5668_v44  ;;  %v995_v3 = vshrl.u32 %v5143_v50, 16 }
  0x1b   : > { %536 = vrot.lane.b32.xlu1 %v535_v11, %s6843_s17  ;;  %v5638_v22 = vrot.slane %v912_v21, %v533_v6  ;;  %v1166_v6 = vld [vmem:[%s6815_s1] sm:$0x88]  ;;  %v1003_v13 = vshrl.u32 %v5144_v54, 16  ;;  %vm601_vm4 = vcmask 31744   ;;  %vm6884_vm5 = vcmask 7168   ;;  %s5503_s17 = smov 60  }
  0x1c   : > { %6956 = vst [vmem:[#allocation11_spill] sm:$0xff] %v5686_v61  ;;  %6957 = vst [vmem:[#allocation12_spill] sm:$0xff] %v5691_v0  ;;  %v5708_v15 = vrot.slane %v811_v57, %v5668_v44  ;;  %v5711_v16 = vrot.slane %v819_v58, %v5668_v44  ;;  %v5148_v21 = vcombine.low %v1078_v5, %v1078_v5  ;;  %v5727_v36 = vsub.s32 3, %v5604_v4 }
  0x1d   : > { %573 = vrot.lane.b32.xlu0 %v534_v8, %s6845_s18  ;;  %v5154_v24 = vcombine.high %v1166_v6, %v1166_v6  ;;  %v996_v28 = vpack.i.b16 %v995_v3, %v995_v3  ;;  %v5149_v29 = vcombine.high %v1078_v5, %v1078_v5  ;;  %v1004_v34 = vpack.i.b16 %v1003_v13, %v1003_v13  ;;  %s5504_s18 = smov 4  }
  0x1e   : > { %6958 = vst [vmem:[#allocation13_spill] sm:$0xff] %v5708_v15  ;;  %6959 = vst [vmem:[#allocation14_spill] sm:$0xff] %v5711_v16  ;;  %v923_v35 = vcombine.high %v5638_v22, %v5638_v22  ;;  %v1085_v39 = vpack.i.b16 %v5148_v21, %v5148_v21  ;;  %vm6883_vm6 = vcmask 1039360   ;;  %vm6849_vm7 = vcmask 924672  }
  0x1f   : > { %705 = vrot.lane.b32.xlu1 %v534_v8, %s6841_s19  ;;  %v1181_v41 = vshrl.u32 %v5154_v24, 16  ;;  %v5741_v54 = vrot.slane %v1004_v34, %v5621_v12  ;;  %vm6848_vm8 = vcmask 916480   ;;  %vm6847_vm9 = vcmask 908288  }
  0x20   : > { %v5750_v58 = vrot.slane %v1085_v39, %v5727_v36  ;;  %vm1380_vm10 = vcmask 261120   ;;  %vm1350_vm11 = vcmask 277504   ;;  %vm1422_vm12 = vcmask 1043456  }
  0x21   : > { %703 = vrot.lane.b32.xlu0 %v535_v11, %s6841_s19  ;;  %6961 = vst [vmem:[#allocation16_spill] sm:$0xff] %v5741_v54  ;;  %vm6886_vm13 = vcmask 64512   ;;  %vm1533_vm14 = vcmask 244736   ;;  %vm1625_vm15 = vcmask 15360   ;;  %s5505_s19 = smov 124  }
  0x22   : > { %6962 = vst [vmem:[#allocation17_spill] sm:$0xff] %v5750_v58 }
  0x23   : > { %793 = vrot.lane.b32.xlu1 %v534_v8, %s6839_s20 }
  0x25   : > { %791 = vrot.lane.b32.xlu0 %v535_v11, %s6839_s20  ;;  %s7063_s20 = smov 16  }
  0x27   : > { %978 = vrot.lane.b32.xlu1 %v535_v11, %s6837_s21 }
  0x29   : > { %976 = vrot.lane.b32.xlu0 %v534_v8, %s6837_s21  ;;  %s5501_s21 = smov 64  }
  0x2b   : > { %1068 = vrot.lane.b32.xlu1 %v535_v11, %s6833_s22 }
  0x2d   : > { %1066 = vrot.lane.b32.xlu0 %v534_v8, %s6833_s22  ;;  %s5493_s22 = smov 32  }
  0x2f   : > { %1156 = vrot.lane.b32.xlu1 %v535_v11, %s6831_s24 }
  0x31   : > { %1154 = vrot.lane.b32.xlu0 %v534_v8, %s6831_s24  ;;  %s6881_s24 = smov 34  }
  0x33   : > { %1246 = vrot.lane.b32.xlu1 %v535_v11, %s6835_s15 }
  0x35   : > { %1244 = vrot.lane.b32.xlu0 %v534_v8, %s6835_s15  ;;  %s5502_s15 = smov 68  }
  0x39   : > { %1335 = vperm.xlu0 %5403, %v1332_v23   ;;  %v5153_v23 = vcombine.low %v1166_v6, %v1166_v6 }
  0x3b   : > { %v1173_v40 = vshrl.u32 %v5153_v23, 16 }
  0x89   : > { %v539_v38 = vpop.permute.xlu1 %538 }
  0x8b   : > { %v572_v45 = vpop.permute.xlu0 %571 }
  0x8d   : > { %v537_v51 = vpop.permute.xlu1 %536 }
  0x8e   : > { %v541_v55 = vsel %vm540_vm0, %v539_v38, %v537_v51  ;;  %v546_v56 = vsel %vm540_vm0, %v537_v51, %v539_v38  ;;  %v5738_v51 = vrot.slane %v996_v28, %v5621_v12 }
  0x8f   : > { %v574_v59 = vpop.permute.xlu0 %573  ;;  %v569_v60 = vmul.bf16 %v5671_v46, %v541_v55  ;;  %v568_v62 = vmul.bf16 %v5674_v48, %v546_v56  ;;  %v1256_v55 = vld [vmem:[%s6815_s1 + $0x8] sm:$0x11] }
  0x90   : > { %v576_v63 = vsel %vm575_vm2, %v574_v59, %v572_v45  ;;  %v581_v2 = vsel %vm575_vm2, %v572_v45, %v574_v59  ;;  %v1092_v45 = vpack.i.b16 %v5149_v29, %v5149_v29  ;;  %6960 = vst [vmem:[#allocation15_spill] sm:$0xff] %v5738_v51  ;;  %v1174_v59 = vpack.i.b16 %v1173_v40, %v1173_v40 }
  0x91   : > { %5126 = vmatprep.subr.msk.bf16.mxu1 %vm605_vm1, %v569_v60  ;;  %v706_v7 = vpop.permute.xlu1 %705  ;;  %v598_v8 = vmul.bf16 %v5677_v52, %v576_v63  ;;  %v597_v9 = vmul.bf16 %v5680_v53, %v581_v2  ;;  %v657_v11 = vsel %vm605_vm1, %v568_v62, 0  ;;  %v1182_v60 = vpack.i.b16 %v1181_v41, %v1181_v41  ;;  %v5130_v62 = vld [vmem:[%s6816_s2 + $0x8] sm:$0xf]  ;;  %v5135_v63 = vld [vmem:[%s6816_s2 + $0xc] sm:$0xf] }
  0x92   : > { %677 = vmatpush1.bf16.msra.mxu1 %v657_v11  ;;  %v5761_v5 = vrot.slane %v1092_v45, %v5727_v36  ;;  %v5763_v6 = vcombine.low %v1256_v55, %v1256_v55  ;;  %v928_v11 = vsel %vm605_vm1, %v5638_v22, 0  ;;  %v5769_v13 = vcombine.high %v1256_v55, %v1256_v55  ;;  %v5150_v55 = vld [vmem:[%s6816_s2 + $0x18] sm:$0xf] }
  0x93   : > { %5124 = vmatprep.subr.msk.bf16.mxu0 %vm605_vm1, %v598_v8  ;;  %v704_v19 = vpop.permute.xlu0 %703  ;;  %v607_v20 = vsel %vm605_vm1, %v597_v9, 0  ;;  %v5778_v21 = vrot.slane %v1182_v60, %v5727_v36 }
  0x94   : > { %v708_v25 = vsel %vm6885_vm3, %v706_v7, %v704_v19  ;;  %v713_v26 = vsel %vm6885_vm3, %v704_v19, %v706_v7  ;;  %627 = vmatpush1.bf16.msra.mxu0 %v607_v20  ;;  %6963 = vst [vmem:[#allocation18_spill] sm:$0xff] %v5761_v5  ;;  %v5775_v20 = vrot.slane %v1174_v59, %v5727_v36  ;;  %v5160_v59 = vld [vmem:[%s6816_s2 + $0x20] sm:$0xf]  ;;  %vm2416_vm3 = vcmask 490496  }
  0x95   : > { %v735_v30 = vmul.bf16 %v5686_v61, %v713_v26  ;;  %v736_v31 = vmul.bf16 %v5691_v0, %v708_v25  ;;  %5127 = vmatmul.mubr.msk.bf16.vlgmr.msra.gmra.mxu1 %vm601_vm4, %v570_v14  ;;  %v794_v32 = vpop.permute.xlu1 %793  ;;  %6965 = vst [vmem:[#allocation20_spill] sm:$0xff] %v5778_v21  ;;  %v1263_v24 = vpack.i.b16 %v5763_v6, %v5763_v6 }
  0x96   : > { %870 = vmatprep.mubr.bf16.mxu1 %v6851_v10  ;;  %6964 = vst [vmem:[#allocation19_spill] sm:$0xff] %v5775_v20  ;;  %v1270_v28 = vpack.i.b16 %v5769_v13, %v5769_v13 }
  0x97   : > { %5125 = vmatmul.mubr.msk.bf16.vlgmr.msra.gmra.mxu0 %vm601_vm4, %v5123_v27  ;;  %v792_v37 = vpop.permute.xlu0 %791  ;;  %5131 = vmatprep.subr.msk.bf16.mxu0 %vm605_vm1, %v736_v31  ;;  %v743_v38 = vsel %vm605_vm1, %v735_v30, 0  ;;  %v5140_v30 = vld [vmem:[%s6816_s2 + $0x10] sm:$0xf]  ;;  %v5145_v31 = vld [vmem:[%s6816_s2 + $0x14] sm:$0xf] }
  0x98   : > { %v796_v42 = vsel %vm6884_vm5, %v794_v32, %v792_v37  ;;  %v801_v43 = vsel %vm6884_vm5, %v792_v37, %v794_v32  ;;  %763 = vmatpush1.bf16.msra.mxu0 %v743_v38  ;;  %780 = vmatprep.mubr.bf16.mxu0 %v6851_v10  ;;  %v5807_v41 = vrot.slane %v1270_v28, %v5662_v33  ;;  %vm2207_vm5 = vcmask 556032  }
  0x99   : > { %v825_v47 = vmul.bf16 %v5708_v15, %v801_v43  ;;  %v826_v49 = vmul.bf16 %v5711_v16, %v796_v42  ;;  %v979_v50 = vpop.permute.xlu1 %978  ;;  %5141 = vmatprep.subr.msk.bf16.mxu0 %vm605_vm1, %v923_v35  ;;  %v5801_v35 = vrot.slane %v1263_v24, %v5662_v33 }
  0x9a   : > { %6967 = vst [vmem:[#allocation22_spill] sm:$0xff] %v5807_v41 }
  0x9b   : > { %5136 = vmatprep.subr.msk.bf16.mxu1 %vm605_vm1, %v826_v49  ;;  %v833_v56 = vsel %vm605_vm1, %v825_v47, 0  ;;  %v977_v57 = vpop.permute.xlu0 %976  ;;  %6966 = vst [vmem:[#allocation21_spill] sm:$0xff] %v5801_v35 }
  0x9c   : > { %853 = vmatpush1.bf16.msra.mxu1 %v833_v56  ;;  %v981_v2 = vsel %vm6883_vm6, %v977_v57, %v979_v50  ;;  %v986_v3 = vsel %vm6883_vm6, %v979_v50, %v977_v57  ;;  %v5155_v56 = vld [vmem:[%s6816_s2 + $0x1c] sm:$0xf]  ;;  %vm2245_vm6 = vcmask 523264  }
  0x9d   : > { %v1010_v7 = vmul.bf16 %v5738_v51, %v981_v2  ;;  %v1011_v8 = vmul.bf16 %v5741_v54, %v986_v3  ;;  %v1069_v9 = vpop.permute.xlu1 %1068 }
  0x9f   : > { %5132 = vmatmul.mubr.msk.bf16.vlgmr.msra.gmra.mxu0 %vm601_vm4, %v5130_v62  ;;  %5137 = vmatmul.mubr.msk.bf16.vlgmr.msra.gmra.mxu1 %vm601_vm4, %v5135_v63  ;;  %v1067_v14 = vpop.permute.xlu0 %1066  ;;  %v1018_v19 = vsel %vm605_vm1, %v1010_v7, 0 }
  0xa0   : > { %5146 = vmatprep.subr.msk.bf16.mxu1 %vm605_vm1, %v1011_v8  ;;  %v1071_v23 = vsel %vm6849_vm7, %v1067_v14, %v1069_v9  ;;  %v1076_v22 = vsel %vm6849_vm7, %v1069_v9, %v1067_v14  ;;  %948 = vmatpush1.bf16.msra.mxu0 %v928_v11  ;;  %vm2091_vm7 = vcmask 769024  }
  0xa1   : > { %v1098_v25 = vmul.bf16 %v5750_v58, %v1071_v23  ;;  %v1099_v26 = vmul.bf16 %v5761_v5, %v1076_v22  ;;  %1038 = vmatpush1.bf16.msra.mxu1 %v1018_v19  ;;  %965 = vmatprep.mubr.bf16.mxu0 %v6851_v10  ;;  %v1157_v27 = vpop.permute.xlu1 %1156 }
  0xa2   : > { %1055 = vmatprep.mubr.bf16.mxu1 %v6851_v10 }
  0xa3   : > { %v1155_v29 = vpop.permute.xlu0 %1154  ;;  %5151 = vmatprep.subr.msk.bf16.mxu0 %vm605_vm1, %v1099_v26  ;;  %v1106_v39 = vsel %vm605_vm1, %v1098_v25, 0 }
  0xa4   : > { %v1159_v32 = vsel %vm6848_vm8, %v1155_v29, %v1157_v27  ;;  %v1164_v34 = vsel %vm6848_vm8, %v1157_v27, %v1155_v29  ;;  %vm1993_vm8 = vcmask 785408  }
  0xa5   : > { %v1188_v37 = vmul.bf16 %v5775_v20, %v1159_v32  ;;  %v1189_v38 = vmul.bf16 %v5778_v21, %v1164_v34  ;;  %v1247_v40 = vpop.permute.xlu1 %1246 }
  0xa7   : > { %5142 = vmatmul.mubr.msk.bf16.vlgmr.msra.gmra.mxu0 %vm601_vm4, %v5140_v30  ;;  %5147 = vmatmul.mubr.msk.bf16.vlgmr.msra.gmra.mxu1 %vm601_vm4, %v5145_v31  ;;  %v1196_v42 = vsel %vm605_vm1, %v1188_v37, 0  ;;  %v1245_v43 = vpop.permute.xlu0 %1244 }
  0xa8   : > { %5156 = vmatprep.subr.msk.bf16.mxu1 %vm605_vm1, %v1189_v38  ;;  %1126 = vmatpush1.bf16.msra.mxu0 %v1106_v39  ;;  %v1249_v45 = vsel %vm6847_vm9, %v1245_v43, %v1247_v40  ;;  %v1254_v47 = vsel %vm6847_vm9, %v1247_v40, %v1245_v43  ;;  %vm1901_vm9 = vcmask 801792  }
  0xa9   : > { %1216 = vmatpush1.bf16.msra.mxu1 %v1196_v42  ;;  %1143 = vmatprep.mubr.bf16.mxu0 %v6851_v10  ;;  %v1276_v49 = vmul.bf16 %v5801_v35, %v1249_v45  ;;  %v1277_v50 = vmul.bf16 %v5807_v41, %v1254_v47 }
  0xaa   : > { %1233 = vmatprep.mubr.bf16.mxu1 %v6851_v10 }
  0xab   : > { %5161 = vmatprep.subr.msk.bf16.mxu0 %vm605_vm1, %v1277_v50  ;;  %v1284_v57 = vsel %vm605_vm1, %v1276_v49, 0  ;;  %vm1803_vm1 = vcmask 1031168  }
  0xaf   : > { %5152 = vmatmul.mubr.msk.bf16.vlgmr.msra.gmra.mxu0 %vm601_vm4, %v5150_v55  ;;  %5157 = vmatmul.mubr.msk.bf16.vlgmr.msra.gmra.mxu1 %vm601_vm4, %v5155_v56 }
  0xb0   : > { %1304 = vmatpush1.bf16.msra.mxu0 %v1284_v57  ;;  %1321 = vmatprep.mubr.bf16.mxu0 %v6851_v10 }
  0xb1   : > { %1461 = vmatprep.mubr.bf16.mxu1 %v6851_v10 }
  0xb7   : > { %5162 = vmatmul.mubr.msk.bf16.vlgmr.msra.gmra.mxu0 %vm601_vm4, %v5160_v59 }
  0xb8   : > { %1518 = vmatprep.mubr.bf16.mxu0 %v6851_v10 }
 0x155   : > { %v696_v60 = vpop.f32.mrf.mxu1 }
 0x157   : > { %v646_v62 = vpop.f32.mrf.mxu0  ;;  %v698_v63 = vpop.f32.mrf.mxu1 }
 0x158   : > { %v697_v25 = vadd.f32 %v696_v60, %v646_v62 }
 0x159   : > { %v648_v2 = vpop.f32.mrf.mxu0  ;;  %v700_v3 = vpop.f32.mrf.mxu1 }
 0x15a   : > { %v699_v28 = vadd.f32 %v698_v63, %v648_v2 }
 0x15b   : > { %v650_v7 = vpop.f32.mrf.mxu0  ;;  %v701_v8 = vpop.f32.mrf.mxu1 }
 0x15d   : > { %v651_v9 = vpop.f32.mrf.mxu0 }
 0x15f   : > { %v782_v11 = vpop.f32.mrf.mxu0  ;;  %v872_v14 = vpop.f32.mrf.mxu1 }
 0x160   : > { %v789_v29 = vadd.f32 %v782_v11, %v697_v25 }
 0x161   : > { %v784_v19 = vpop.f32.mrf.mxu0  ;;  %v874_v23 = vpop.f32.mrf.mxu1 }
 0x162   : > { %v790_v32 = vadd.f32 %v784_v19, %v699_v28  ;;  %v879_v38 = vadd.f32 %v872_v14, %v789_v29  ;;  %v1336_v14 = vpop.permute.xlu0 %1335 }
 0x163   : > { %v786_v22 = vpop.f32.mrf.mxu0  ;;  %v876_v24 = vpop.f32.mrf.mxu1 }
 0x164   : > { %v880_v42 = vadd.f32 %v874_v23, %v790_v32 }
 0x165   : > { %v787_v26 = vpop.f32.mrf.mxu0  ;;  %v877_v27 = vpop.f32.mrf.mxu1 }
 0x167   : > { %v967_v30 = vpop.f32.mrf.mxu0  ;;  %v1057_v31 = vpop.f32.mrf.mxu1 }
 0x168   : > { %v974_v43 = vadd.f32 %v967_v30, %v879_v38  ;;  %v1388_v38 = vld [vmem:[%s6815_s1 + $0x8] sm:$0x22] }
 0x169   : > { %v969_v34 = vpop.f32.mrf.mxu0  ;;  %v1059_v37 = vpop.f32.mrf.mxu1 }
 0x16a   : > { %v975_v49 = vadd.f32 %v969_v34, %v880_v42  ;;  %v1064_v56 = vadd.f32 %v1057_v31, %v974_v43  ;;  %v2179_v34 = vld [vmem:[%s6819_s5] sm:$0xff]  ;;  %v1633_v42 = vld [vmem:[%s6815_s1 + $0x8] sm:$0x44] }
 0x16b   : > { %v971_v39 = vpop.f32.mrf.mxu0  ;;  %v1061_v40 = vpop.f32.mrf.mxu1 }
 0x16c   : > { %v1065_v60 = vadd.f32 %v1059_v37, %v975_v49  ;;  %v2180_v37 = vld [vmem:[%s6819_s5 + $0x8] sm:$0xff]  ;;  %v5163_v39 = vcombine.low %v1388_v38, %v1388_v38  ;;  %v5164_v40 = vcombine.high %v1388_v38, %v1388_v38  ;;  %v1365_v49 = vshrl.u32 %v5769_v13, 16 }
 0x16d   : > { %v972_v45 = vpop.f32.mrf.mxu0  ;;  %v1062_v47 = vpop.f32.mrf.mxu1 }
 0x16e   : > { %v1395_v43 = vpack.i.b16 %v5163_v39, %v5163_v39  ;;  %v1402_v45 = vpack.i.b16 %v5164_v40, %v5164_v40  ;;  %v1358_v47 = vshrl.u32 %v5763_v6, 16 }
 0x16f   : > { %v1145_v50 = vpop.f32.mrf.mxu0  ;;  %v1235_v55 = vpop.f32.mrf.mxu1 }
 0x170   : > { %v1152_v62 = vadd.f32 %v1145_v50, %v1064_v56  ;;  %v5178_v50 = vcombine.low %v1633_v42, %v1633_v42 }
 0x171   : > { %v1147_v57 = vpop.f32.mrf.mxu0  ;;  %v1237_v59 = vpop.f32.mrf.mxu1 }
 0x172   : > { %v1153_v3 = vadd.f32 %v1147_v57, %v1065_v60  ;;  %v1242_v9 = vadd.f32 %v1235_v55, %v1152_v62  ;;  %v5179_v55 = vcombine.high %v1633_v42, %v1633_v42  ;;  %v1541_v57 = vshrl.u32 %v5163_v39, 16 }
 0x173   : > { %v1149_v63 = vpop.f32.mrf.mxu0  ;;  %v1239_v2 = vpop.f32.mrf.mxu1  ;;  %v5887_v62 = vrot.slane %v1395_v43, %v5668_v44  ;;  %v1640_v38 = vpack.i.b16 %v5178_v50, %v5178_v50 }
 0x174   : > { %v1243_v19 = vadd.f32 %v1237_v59, %v1153_v3  ;;  %v1548_v59 = vshrl.u32 %v5164_v40, 16  ;;  %v5890_v63 = vrot.slane %v1402_v45, %v5668_v44  ;;  %v1359_v2 = vpack.i.b16 %v1358_v47, %v1358_v47 }
 0x175   : > { %v1150_v7 = vpop.f32.mrf.mxu0  ;;  %v1240_v8 = vpop.f32.mrf.mxu1  ;;  %6968 = vst [vmem:[#allocation23_spill] sm:$0xff] %v5887_v62  ;;  %v1366_v3 = vpack.i.b16 %v1365_v49, %v1365_v49  ;;  %v1647_v43 = vpack.i.b16 %v5179_v55, %v5179_v55 }
 0x176   : > { %6969 = vst [vmem:[#allocation24_spill] sm:$0xff] %v5890_v63  ;;  %v1726_v7 = vshrl.u32 %v5179_v55, 16  ;;  %v1719_v8 = vshrl.u32 %v5178_v50, 16 }
 0x177   : > { %v1323_v11 = vpop.f32.mrf.mxu0 }
 0x178   : > { %v1330_v23 = vadd.f32 %v1323_v11, %v1242_v9  ;;  %v1542_v9 = vpack.i.b16 %v1541_v57, %v1541_v57 }
 0x179   : > { %v1325_v22 = vpop.f32.mrf.mxu0 }
 0x17a   : > { %v1331_v24 = vadd.f32 %v1325_v22, %v1243_v19  ;;  %v1338_v25 = vadd.f32 %v1336_v14, %v1330_v23 }
 0x17b   : > { %v1327_v26 = vpop.f32.mrf.mxu0 }
 0x17c   : > { %v1339_v27 = vadd.f32 %v1336_v14, %v1331_v24  ;;  %v1340_v28 = vmax.f32 %v1338_v25, 0.0  ;;  %v1549_v14 = vpack.i.b16 %v1548_v59, %v1548_v59  ;;  %v5897_v24 = vrot.slane %v1359_v2, %v5662_v33  ;;  %v5424_v2 = vld [vmem:[%s6818_s4] sm:$0xff]  }
 0x17d   : > { %v1328_v29 = vpop.f32.mrf.mxu0  ;;  %v5900_v25 = vrot.slane %v1366_v3, %v5662_v33  ;;  %v1727_v26 = vpack.i.b16 %v1726_v7, %v1726_v7  ;;  %v5933_v3 = vrot.slane %v1640_v38, %v5621_v12 }
 0x17e   : > { %v1341_v30 = vmax.f32 %v1339_v27, 0.0  ;;  %v5836_v31 = vpack.c.bf16 %v1340_v28, %v1340_v28  ;;  %6970 = vst [vmem:[#allocation25_spill] sm:$0xff] %v5897_v24  ;;  %v1811_v27 = vld [vmem:[%s6815_s1 + $0x8] sm:$0x88]  ;;  %v1720_v28 = vpack.i.b16 %v1719_v8, %v1719_v8  ;;  %v5916_v42 = vrot.slane %v1549_v14, %v5668_v44 }
 0x17f   : > { %6971 = vst [vmem:[#allocation26_spill] sm:$0xff] %v5900_v25  ;;  %v5191_v57 = vcombine.high %v1811_v27, %v1811_v27  ;;  %v5921_v59 = vrot.slane %v1727_v26, %v5621_v12  ;;  %6976 = vst [vmem:[#allocation31_spill] sm:$0xff] %v5933_v3 }
 0x180   : > { %v5838_v32 = vpack.c.bf16 %v1341_v30, %v1341_v30  ;;  %1378 = vrot.lane.b32.xlu1 %v5836_v31, %s5493_s22  ;;  %6973 = vst [vmem:[#allocation28_spill] sm:$0xff] %v5916_v42  ;;  %v5924_v50 = vrot.slane %v1720_v28, %v5621_v12 }
 0x181   : > { %6974 = vst [vmem:[#allocation29_spill] sm:$0xff] %v5921_v59  ;;  %v1916_v8 = vshrl.u32 %v5191_v57, 16 }
 0x182   : > { %1345 = vrot.lane.b32.xlu0 %v5838_v32, %s6881_s24  ;;  %6975 = vst [vmem:[#allocation30_spill] sm:$0xff] %v5924_v50  ;;  %v1733_v28 = vmul.bf16 %v5924_v50, %v5836_v31 }
 0x184   : > { %1376 = vrot.lane.b32.xlu1 %v5838_v32, %s5493_s22 }
 0x186   : > { %1529 = vrot.lane.b32.xlu0 %v5838_v32, %s6879_s28 }
 0x188   : > { %1348 = vrot.lane.b32.xlu1 %v5836_v31, %s6881_s24  ;;  %s7040_s24 = smov 2  }
 0x18a   : > { %1621 = vrot.lane.b32.xlu0 %v5838_v32, %s6877_s29 }
 0x18c   : > { %1531 = vrot.lane.b32.xlu1 %v5836_v31, %s6879_s28  ;;  %s7041_s28 = smov 126  }
 0x18e   : > { %1799 = vrot.lane.b32.xlu0 %v5836_v31, %s6875_s30 }
 0x190   : > { %1623 = vrot.lane.b32.xlu1 %v5836_v31, %s6877_s29 }
 0x192   : > { %1897 = vrot.lane.b32.xlu0 %v5836_v31, %s6873_s0 }
 0x194   : > { %1801 = vrot.lane.b32.xlu1 %v5838_v32, %s6875_s30 }
 0x196   : > { %1989 = vrot.lane.b32.xlu0 %v5836_v31, %s6871_s26 }
 0x198   : > { %1899 = vrot.lane.b32.xlu1 %v5838_v32, %s6873_s0  ;;  %s7038_s0 = smov 34  }
 0x19a   : > { %2087 = vrot.lane.b32.xlu0 %v5836_v31, %s6869_s27 }
 0x19c   : > { %1991 = vrot.lane.b32.xlu1 %v5838_v32, %s6871_s26  ;;  %s7039_s26 = smov 30  }
 0x19e   : > { %2183 = vperm.xlu0 %5403, %v2179_v34   ;;  %v5423_v34 = vld [vmem:[%s6818_s4 + $0x8] sm:$0xff]  }
 0x1a0   : > { %2089 = vrot.lane.b32.xlu1 %v5838_v32, %s6869_s27 }
 0x1a4   : > { %2188 = vperm.xlu1 %5404, %v2180_v37   ;;  %v5911_v37 = vrot.slane %v1542_v9, %v5668_v44 }
 0x1a6   : > { %6972 = vst [vmem:[#allocation27_spill] sm:$0xff] %v5911_v37 }
 0x1f2   : > { %v1379_v56 = vpop.permute.xlu1 %1378 }
 0x1f4   : > { %v1346_v60 = vpop.permute.xlu0 %1345 }
 0x1f6   : > { %v1377_v6 = vpop.permute.xlu1 %1376 }
 0x1f7   : > { %v1381_v13 = vsel %vm1380_vm10, %v1379_v56, %v1377_v6  ;;  %v1386_v11 = vsel %vm1380_vm10, %v1377_v6, %v1379_v56  ;;  %v5190_v56 = vcombine.low %v1811_v27, %v1811_v27  ;;  %v1825_v27 = vpack.i.b16 %v5191_v57, %v5191_v57 }
 0x1f8   : > { %v1408_v19 = vmul.bf16 %v5887_v62, %v1386_v11  ;;  %v1409_v23 = vmul.bf16 %v5890_v63, %v1381_v13  ;;  %v1530_v22 = vpop.permute.xlu0 %1529  ;;  %v5938_v13 = vrot.slane %v1647_v43, %v5621_v12  ;;  %v2001_v11 = vld [vmem:[%s6815_s1 + $0x10] sm:$0x11] }
 0x1f9   : > { %v1909_v7 = vshrl.u32 %v5190_v56, 16  ;;  %v1818_v26 = vpack.i.b16 %v5190_v56, %v5190_v56  ;;  %v5203_v31 = vcombine.high %v2001_v11, %v2001_v11  ;;  %v5966_v57 = vrot.slane %v1825_v27, %v5727_v36 }
 0x1fa   : > { %5168 = vmatprep.subr.msk.bf16.mxu1 %vm1422_vm12, %v1409_v23  ;;  %v1349_v29 = vpop.permute.xlu1 %1348  ;;  %v1424_v30 = vsel %vm1422_vm12, %v1408_v19, 0  ;;  %6977 = vst [vmem:[#allocation32_spill] sm:$0xff] %v5938_v13 }
 0x1fb   : > { %v1351_v39 = vsel %vm1350_vm11, %v1349_v29, %v1346_v60  ;;  %v1356_v40 = vsel %vm1350_vm11, %v1346_v60, %v1349_v29  ;;  %1444 = vmatpush1.bf16.msra.mxu1 %v1424_v30  ;;  %v1910_v38 = vpack.i.b16 %v1909_v7, %v1909_v7  ;;  %v5963_v56 = vrot.slane %v1818_v26, %v5727_v36  ;;  %v5430_v7 = vld [vmem:[%s6818_s4 + $0x18] sm:$0xff]  }
 0x1fc   : > { %v1372_v45 = vmul.bf16 %v5897_v24, %v1356_v40  ;;  %v1373_v47 = vmul.bf16 %v5900_v25, %v1351_v39  ;;  %v1622_v49 = vpop.permute.xlu0 %1621  ;;  %v1917_v39 = vpack.i.b16 %v1916_v8, %v1916_v8  ;;  %v5202_v40 = vcombine.low %v2001_v11, %v2001_v11  ;;  %6979 = vst [vmem:[#allocation34_spill] sm:$0xff] %v5966_v57 }
 0x1fd   : > { %6978 = vst [vmem:[#allocation33_spill] sm:$0xff] %v5963_v56  ;;  %v5976_v8 = vrot.slane %v1910_v38, %v5727_v36 }
 0x1fe   : > { %5169 = vmatmul.mubr.msk.bf16.vlgmr.msra.gmra.mxu1 %vm6886_vm13, %v5423_v34  ;;  %5171 = vmatprep.subr.msk.bf16.mxu0 %vm1422_vm12, %v1373_v47  ;;  %v1532_v60 = vpop.permute.xlu1 %1531  ;;  %v1481_v55 = vsel %vm1422_vm12, %v1372_v45, 0  ;;  %v5427_v34 = vld [vmem:[%s6818_s4 + $0x10] sm:$0xff]  }
 0x1ff   : > { %v1534_v6 = vsel %vm1533_vm14, %v1532_v60, %v1530_v22  ;;  %v1539_v9 = vsel %vm1533_vm14, %v1530_v22, %v1532_v60  ;;  %1501 = vmatpush1.bf16.msra.mxu0 %v1481_v55  ;;  %1606 = vmatprep.mubr.bf16.mxu1 %v6851_v10  ;;  %v1734_v22 = vmul.bf16 %v5921_v59, %v5838_v32  ;;  %v1747_v60 = vsel %vm1422_vm12, %v1733_v28, 0 }
 0x200   : > { %v1555_v14 = vmul.bf16 %v5911_v37, %v1539_v9  ;;  %v1556_v19 = vmul.bf16 %v5916_v42, %v1534_v6  ;;  %v1800_v23 = vpop.permute.xlu0 %1799  ;;  %6980 = vst [vmem:[#allocation35_spill] sm:$0xff] %v5976_v8  ;;  %v5979_v6 = vrot.slane %v1917_v39, %v5727_v36  ;;  %v2008_v9 = vpack.i.b16 %v5202_v40, %v5202_v40 }
 0x201   : > { %v2106_v28 = vshrl.u32 %v5203_v31, 16 }
 0x202   : > { %5172 = vmatmul.mubr.msk.bf16.vlgmr.msra.gmra.mxu0 %vm6886_vm13, %v5424_v2  ;;  %5176 = vmatprep.subr.msk.bf16.mxu1 %vm1422_vm12, %v1556_v19  ;;  %v1624_v29 = vpop.permute.xlu1 %1623  ;;  %v1569_v30 = vsel %vm1422_vm12, %v1555_v14, 0  ;;  %6981 = vst [vmem:[#allocation36_spill] sm:$0xff] %v5979_v6  ;;  %v2015_v19 = vpack.i.b16 %v5203_v31, %v5203_v31 }
 0x203   : > { %v1626_v43 = vsel %vm1625_vm15, %v1624_v29, %v1622_v49  ;;  %v1631_v32 = vsel %vm1625_vm15, %v1622_v49, %v1624_v29  ;;  %1589 = vmatpush1.bf16.msra.mxu1 %v1569_v30  ;;  %1704 = vmatprep.mubr.bf16.mxu0 %v6851_v10 }
 0x204   : > { %v1653_v45 = vmul.bf16 %v5933_v3, %v1631_v32  ;;  %v1654_v47 = vmul.bf16 %v5938_v13, %v1626_v43  ;;  %5188 = vmatprep.subr.msk.bf16.mxu1 %vm1422_vm12, %v1734_v22  ;;  %v1898_v49 = vpop.permute.xlu0 %1897  ;;  %v2099_v22 = vshrl.u32 %v5202_v40, 16  ;;  %v5998_v40 = vrot.slane %v2015_v19, %v5662_v33 }
 0x206   : > { %5177 = vmatmul.mubr.msk.bf16.vlgmr.msra.gmra.mxu1 %vm6886_vm13, %v5427_v34  ;;  %5183 = vmatprep.subr.msk.bf16.mxu0 %vm1422_vm12, %v1654_v47  ;;  %v1802_v55 = vpop.permute.xlu1 %1801  ;;  %v1667_v2 = vsel %vm1422_vm12, %v1653_v45, 0  ;;  %v5433_v34 = vld [vmem:[%s6818_s4 + $0x20] sm:$0xff]   ;;  %6983 = vst [vmem:[#allocation38_spill] sm:$0xff] %v5998_v40  ;;  %v2100_v45 = vpack.i.b16 %v2099_v22, %v2099_v22  ;;  %v2107_v47 = vpack.i.b16 %v2106_v28, %v2106_v28  ;;  %v5435_v28 = vld [vmem:[%s6818_s4 + $0x30] sm:$0xff]  }
 0x207   : > { %v1804_v11 = vsel %vm1803_vm1, %v1800_v23, %v1802_v55  ;;  %v1809_v14 = vsel %vm1803_vm1, %v1802_v55, %v1800_v23  ;;  %1687 = vmatpush1.bf16.msra.mxu0 %v1667_v2  ;;  %1767 = vmatpush1.bf16.msra.mxu1 %v1747_v60  ;;  %v5990_v23 = vrot.slane %v2008_v9, %v5662_v33  ;;  %v5434_v55 = vld [vmem:[%s6818_s4 + $0x28] sm:$0xff]  }
 0x208   : > { %v1831_v26 = vmul.bf16 %v5963_v56, %v1804_v11  ;;  %v1832_v27 = vmul.bf16 %v5966_v57, %v1809_v14  ;;  %1784 = vmatprep.mubr.bf16.mxu1 %v6851_v10  ;;  %v1990_v43 = vpop.permute.xlu0 %1989  ;;  %v6015_v14 = vrot.slane %v2100_v45, %v5662_v33  ;;  %v6018_v19 = vrot.slane %v2107_v47, %v5662_v33 }
 0x209   : > { %6982 = vst [vmem:[#allocation37_spill] sm:$0xff] %v5990_v23 }
 0x20a   : > { %5184 = vmatmul.mubr.msk.bf16.vlgmr.msra.gmra.mxu0 %vm6886_vm13, %v5430_v7  ;;  %5195 = vmatprep.subr.msk.bf16.mxu0 %vm1422_vm12, %v1832_v27  ;;  %v1900_v29 = vpop.permute.xlu1 %1899  ;;  %v1845_v30 = vsel %vm1422_vm12, %v1831_v26, 0  ;;  %6984 = vst [vmem:[#allocation39_spill] sm:$0xff] %v6015_v14  ;;  %6985 = vst [vmem:[#allocation40_spill] sm:$0xff] %v6018_v19 }
 0x20b   : > { %v1902_v38 = vsel %vm1901_vm9, %v1898_v49, %v1900_v29  ;;  %v1907_v39 = vsel %vm1901_vm9, %v1900_v29, %v1898_v49  ;;  %1865 = vmatpush1.bf16.msra.mxu0 %v1845_v30  ;;  %1882 = vmatprep.mubr.bf16.mxu0 %v6851_v10 }
 0x20c   : > { %v1923_v32 = vmul.bf16 %v5976_v8, %v1902_v38  ;;  %v1924_v31 = vmul.bf16 %v5979_v6, %v1907_v39  ;;  %v2088_v26 = vpop.permute.xlu0 %2087 }
 0x20e   : > { %v1992_v60 = vpop.permute.xlu1 %1991  ;;  %5189 = vmatmul.mubr.msk.bf16.vlgmr.msra.gmra.mxu1 %vm6886_vm13, %v5433_v34  ;;  %5200 = vmatprep.subr.msk.bf16.mxu1 %vm1422_vm12, %v1924_v31  ;;  %v1937_v49 = vsel %vm1422_vm12, %v1923_v32, 0  ;;  %v5437_v32 = vld [vmem:[%s6818_s4 + $0x40] sm:$0xff]  }
 0x20f   : > { %v1994_v2 = vsel %vm1993_vm8, %v1990_v43, %v1992_v60  ;;  %v1999_v7 = vsel %vm1993_vm8, %v1992_v60, %v1990_v43  ;;  %1957 = vmatpush1.bf16.msra.mxu1 %v1937_v49  ;;  %1974 = vmatprep.mubr.bf16.mxu1 %v6851_v10  ;;  %v5436_v43 = vld [vmem:[%s6818_s4 + $0x38] sm:$0xff]  }
 0x210   : > { %v2021_v9 = vmul.bf16 %v5990_v23, %v1994_v2  ;;  %v2022_v11 = vmul.bf16 %v5998_v40, %v1999_v7 }
 0x212   : > { %5196 = vmatmul.mubr.msk.bf16.vlgmr.msra.gmra.mxu0 %vm6886_vm13, %v5434_v55  ;;  %5207 = vmatprep.subr.msk.bf16.mxu0 %vm1422_vm12, %v2022_v11  ;;  %v2090_v27 = vpop.permute.xlu1 %2089  ;;  %v2035_v22 = vsel %vm1422_vm12, %v2021_v9, 0 }
 0x213   : > { %v2092_v29 = vsel %vm2091_vm7, %v2088_v26, %v2090_v27  ;;  %v2097_v30 = vsel %vm2091_vm7, %v2090_v27, %v2088_v26  ;;  %2055 = vmatpush1.bf16.msra.mxu0 %v2035_v22  ;;  %2072 = vmatprep.mubr.bf16.mxu0 %v6851_v10 }
 0x214   : > { %v2113_v34 = vmul.bf16 %v6015_v14, %v2092_v29  ;;  %v2114_v38 = vmul.bf16 %v6018_v19, %v2097_v30 }
 0x216   : > { %5201 = vmatmul.mubr.msk.bf16.vlgmr.msra.gmra.mxu1 %vm6886_vm13, %v5435_v28  ;;  %5212 = vmatprep.subr.msk.bf16.mxu1 %vm1422_vm12, %v2114_v38  ;;  %v2127_v39 = vsel %vm1422_vm12, %v2113_v34, 0 }
 0x217   : > { %2147 = vmatpush1.bf16.msra.mxu1 %v2127_v39  ;;  %2164 = vmatprep.mubr.bf16.mxu1 %v6851_v10 }
 0x21a   : > { %5208 = vmatmul.mubr.msk.bf16.vlgmr.msra.gmra.mxu0 %vm6886_vm13, %v5436_v43 }
 0x21b   : > { %2322 = vmatprep.mubr.bf16.mxu0 %v6851_v10 }
 0x21e   : > { %5213 = vmatmul.mubr.msk.bf16.vlgmr.msra.gmra.mxu1 %vm6886_vm13, %v5437_v32  ;;  %vm2745_vm13 = vcmask 1014784  }
 0x21f   : > { %2391 = vmatprep.mubr.bf16.mxu1 %v6851_v10 }
 0x2be   : > { %v1463_v31 = vpop.f32.mrf.mxu1 }
 0x2c0   : > { %v1465_v45 = vpop.f32.mrf.mxu1 }
 0x2c2   : > { %v1467_v47 = vpop.f32.mrf.mxu1  ;;  %v1520_v60 = vpop.f32.mrf.mxu0 }
 0x2c3   : > { %v1521_v39 = vadd.f32 %v1520_v60, %v1463_v31 }
 0x2c4   : > { %v1469_v49 = vpop.f32.mrf.mxu1  ;;  %v1522_v55 = vpop.f32.mrf.mxu0 }
 0x2c5   : > { %v1523_v1 = vadd.f32 %v1522_v55, %v1465_v45 }
 0x2c6   : > { %v1524_v2 = vpop.f32.mrf.mxu0  ;;  %v1608_v7 = vpop.f32.mrf.mxu1 }
 0x2c7   : > { %v1617_v10 = vadd.f32 %v1608_v7, %v1521_v39  ;;  %v1525_v35 = vadd.f32 %v1524_v2, %v1467_v47 }
 0x2c8   : > { %v1526_v9 = vpop.f32.mrf.mxu0  ;;  %v1610_v11 = vpop.f32.mrf.mxu1 }
 0x2c9   : > { %v1618_v21 = vadd.f32 %v1610_v11, %v1523_v1  ;;  %v1527_v54 = vadd.f32 %v1526_v9, %v1469_v49 }
 0x2ca   : > { %v1612_v26 = vpop.f32.mrf.mxu1  ;;  %v1706_v27 = vpop.f32.mrf.mxu0 }
 0x2cb   : > { %v1715_v20 = vadd.f32 %v1706_v27, %v1617_v10  ;;  %v1619_v51 = vadd.f32 %v1612_v26, %v1525_v35  ;;  %v2184_v27 = vpop.permute.xlu0 %2183 }
 0x2cc   : > { %v1614_v22 = vpop.f32.mrf.mxu1  ;;  %v1708_v28 = vpop.f32.mrf.mxu0 }
 0x2cd   : > { %v1716_v16 = vadd.f32 %v1708_v28, %v1618_v21  ;;  %v1620_v0 = vadd.f32 %v1614_v22, %v1527_v54 }
 0x2ce   : > { %v1710_v29 = vpop.f32.mrf.mxu0  ;;  %v1786_v30 = vpop.f32.mrf.mxu1 }
 0x2cf   : > { %v1795_v15 = vadd.f32 %v1786_v30, %v1715_v20  ;;  %v1717_v61 = vadd.f32 %v1710_v29, %v1619_v51 }
 0x2d0   : > { %v1712_v34 = vpop.f32.mrf.mxu0  ;;  %v1788_v38 = vpop.f32.mrf.mxu1 }
 0x2d1   : > { %v1796_v31 = vadd.f32 %v1788_v38, %v1716_v16  ;;  %v1718_v55 = vadd.f32 %v1712_v34, %v1620_v0 }
 0x2d2   : > { %v1790_v43 = vpop.f32.mrf.mxu1  ;;  %v1884_v32 = vpop.f32.mrf.mxu0 }
 0x2d3   : > { %v1893_v60 = vadd.f32 %v1884_v32, %v1795_v15  ;;  %v1797_v7 = vadd.f32 %v1790_v43, %v1717_v61 }
 0x2d4   : > { %v1792_v4 = vpop.f32.mrf.mxu1  ;;  %v1886_v41 = vpop.f32.mrf.mxu0 }
 0x2d5   : > { %v1894_v39 = vadd.f32 %v1886_v41, %v1796_v31  ;;  %v1798_v2 = vadd.f32 %v1792_v4, %v1718_v55  ;;  %v3159_v55 = vld [vmem:[%s6821_s7 + $0x10] sm:$0xff] }
 0x2d6   : > { %v1888_v5 = vpop.f32.mrf.mxu0  ;;  %v1976_v58 = vpop.f32.mrf.mxu1 }
 0x2d7   : > { %v1985_v47 = vadd.f32 %v1976_v58, %v1893_v60  ;;  %v1895_v11 = vadd.f32 %v1888_v5, %v1797_v7  ;;  %v2189_v58 = vpop.permute.xlu1 %2188  ;;  %v3158_v7 = vld [vmem:[%s6821_s7 + $0x8] sm:$0xff] }
 0x2d8   : > { %v1890_v17 = vpop.f32.mrf.mxu0  ;;  %v1978_v18 = vpop.f32.mrf.mxu1 }
 0x2d9   : > { %v1986_v49 = vadd.f32 %v1978_v18, %v1894_v39  ;;  %v1896_v9 = vadd.f32 %v1890_v17, %v1798_v2  ;;  %v3157_v39 = vld [vmem:[%s6821_s7] sm:$0xff] }
 0x2da   : > { %v1980_v46 = vpop.f32.mrf.mxu1  ;;  %v2074_v45 = vpop.f32.mrf.mxu0 }
 0x2db   : > { %v2083_v35 = vadd.f32 %v2074_v45, %v1985_v47  ;;  %v1987_v26 = vadd.f32 %v1980_v46, %v1895_v11  ;;  %v3160_v45 = vld [vmem:[%s6821_s7 + $0x18] sm:$0xff]  ;;  %v2215_v47 = vld [vmem:[%s6815_s1 + $0x10] sm:$0x22] }
 0x2dc   : > { %v1982_v1 = vpop.f32.mrf.mxu1  ;;  %v2076_v10 = vpop.f32.mrf.mxu0 }
 0x2dd   : > { %v2084_v54 = vadd.f32 %v2076_v10, %v1986_v49  ;;  %v1988_v22 = vadd.f32 %v1982_v1, %v1896_v9  ;;  %v5214_v1 = vcombine.low %v2215_v47, %v2215_v47  ;;  %v5215_v10 = vcombine.high %v2215_v47, %v2215_v47  ;;  %v2424_v49 = vld [vmem:[%s6815_s1 + $0x10] sm:$0x44] }
 0x2de   : > { %v2078_v21 = vpop.f32.mrf.mxu0  ;;  %v2166_v20 = vpop.f32.mrf.mxu1  ;;  %v5228_v9 = vcombine.low %v2424_v49, %v2424_v49 }
 0x2df   : > { %v2175_v51 = vadd.f32 %v2166_v20, %v2083_v35  ;;  %v2085_v0 = vadd.f32 %v2078_v21, %v1987_v26  ;;  %v2253_v2 = vshrl.u32 %v5214_v1, 16  ;;  %v2260_v11 = vshrl.u32 %v5215_v10, 16 }
 0x2e0   : > { %v2080_v16 = vpop.f32.mrf.mxu0  ;;  %v2168_v15 = vpop.f32.mrf.mxu1  ;;  %v2222_v20 = vpack.i.b16 %v5214_v1, %v5214_v1  ;;  %v5229_v26 = vcombine.high %v2424_v49, %v2424_v49 }
 0x2e1   : > { %v2176_v61 = vadd.f32 %v2168_v15, %v2084_v54  ;;  %v2191_v28 = vadd.f32 %v2184_v27, %v2175_v51  ;;  %v2086_v29 = vadd.f32 %v2080_v16, %v1988_v22  ;;  %v2254_v35 = vpack.i.b16 %v2253_v2, %v2253_v2 }
 0x2e2   : > { %v2170_v41 = vpop.f32.mrf.mxu1  ;;  %v2261_v21 = vpack.i.b16 %v2260_v11, %v2260_v11  ;;  %v2229_v15 = vpack.i.b16 %v5215_v10, %v5215_v10 }
 0x2e3   : > { %v2177_v4 = vadd.f32 %v2170_v41, %v2085_v0  ;;  %v2192_v18 = vadd.f32 %v2184_v27, %v2176_v61  ;;  %v2195_v38 = vmax.f32 %v2191_v28, 0.0  ;;  %v6088_v51 = vrot.slane %v2254_v35, %v5668_v44  ;;  %v2637_v27 = vld [vmem:[%s6815_s1 + $0x10] sm:$0x88]  ;;  %v5447_v35 = vld [vmem:[%s6820_s6] sm:$0xff]  }
 0x2e4   : > { %v2172_v5 = vpop.f32.mrf.mxu1  ;;  %v6091_v16 = vrot.slane %v2261_v21, %v5668_v44  ;;  %v6097_v0 = vrot.slane %v2222_v20, %v5668_v44  ;;  %v2431_v61 = vpack.i.b16 %v5228_v9, %v5228_v9  ;;  %v5247_v41 = vcombine.high %v2637_v27, %v2637_v27  ;;  %v2851_v20 = vld [vmem:[%s6815_s1 + $0x18] sm:$0x11] }
 0x2e5   : > { %v2193_v30 = vadd.f32 %v2189_v58, %v2177_v4  ;;  %v2178_v34 = vadd.f32 %v2172_v5, %v2086_v29  ;;  %v2196_v43 = vmax.f32 %v2192_v18, 0.0  ;;  %6986 = vst [vmem:[#allocation41_spill] sm:$0xff] %v6088_v51  ;;  %v2438_v29 = vpack.i.b16 %v5229_v26, %v5229_v26 }
 0x2e6   : > { %6987 = vst [vmem:[#allocation42_spill] sm:$0xff] %v6091_v16  ;;  %6988 = vst [vmem:[#allocation43_spill] sm:$0xff] %v6097_v0  ;;  %v2539_v4 = vshrl.u32 %v5228_v9, 16  ;;  %v2760_v11 = vshrl.u32 %v5247_v41, 16 }
 0x2e7   : > { %v2197_v17 = vmax.f32 %v2193_v30, 0.0  ;;  %v2194_v46 = vadd.f32 %v2189_v58, %v2178_v34  ;;  %v6110_v34 = vrot.slane %v2229_v15, %v5668_v44  ;;  %v6994_v15 = vmov 0  }
 0x2e9   : > { %v6045_v32 = vpack.c.bf16 %v2197_v17, %v2195_v38  ;;  %v2198_v31 = vmax.f32 %v2194_v46, 0.0  ;;  %6989 = vst [vmem:[#allocation44_spill] sm:$0xff] %v6110_v34  ;;  %v2546_v38 = vshrl.u32 %v5229_v26, 16  ;;  %v5442_v46 = vld [vmem:[%s6820_s6 + $0x10] sm:$0xff]  }
 0x2eb   : > { %v6047_v60 = vpack.c.bf16 %v2198_v31, %v2196_v43  ;;  %2243 = vrot.lane.b32.xlu1 %v6045_v32, %s5501_s21  ;;  %v6116_v43 = vrot.slane %v2431_v61, %v5621_v12  ;;  %v2651_v31 = vpack.i.b16 %v5247_v41, %v5247_v41  ;;  %v2547_v2 = vpack.i.b16 %v2546_v38, %v2546_v38 }
 0x2ed   : > { %2241 = vrot.lane.b32.xlu0 %v6047_v60, %s5501_s21  ;;  %6990 = vst [vmem:[#allocation45_spill] sm:$0xff] %v6116_v43  ;;  %v6136_v21 = vrot.slane %v2651_v31, %v5727_v36 }
 0x2ef   : > { %2205 = vrot.lane.b32.xlu1 %v6045_v32, %s5502_s15  ;;  %6992 = vst [vmem:[#allocation47_spill] sm:$0xff] %v6136_v21  ;;  %v2658_v38 = vmul.bf16 %v6136_v21, %v6047_v60 }
 0x2f1   : > { %2202 = vrot.lane.b32.xlu0 %v6047_v60, %s5502_s15 }
 0x2f3   : > { %2414 = vrot.lane.b32.xlu1 %v6045_v32, %s5503_s17 }
 0x2f5   : > { %2412 = vrot.lane.b32.xlu0 %v6047_v60, %s5503_s17 }
 0x2f7   : > { %2530 = vrot.lane.b32.xlu1 %v6045_v32, %s5504_s18 }
 0x2f9   : > { %2528 = vrot.lane.b32.xlu0 %v6047_v60, %s5504_s18 }
 0x2fb   : > { %2743 = vrot.lane.b32.xlu1 %v6047_v60, %s5505_s19 }
 0x2fd   : > { %2741 = vrot.lane.b32.xlu0 %v6045_v32, %s5505_s19 }
 0x2ff   : > { %3178 = vperm.xlu1 %5404, %v3160_v45  }
 0x301   : > { %3173 = vperm.xlu0 %5403, %v3159_v55  }
 0x303   : > { %3168 = vperm.xlu1 %5404, %v3158_v7   ;;  %v6125_v7 = vrot.slane %v2438_v29, %v5621_v12  ;;  %v6156_v29 = vrot.slane %v2547_v2, %v5621_v12 }
 0x305   : > { %3163 = vperm.xlu0 %5403, %v3157_v39   ;;  %6991 = vst [vmem:[#allocation46_spill] sm:$0xff] %v6125_v7  ;;  %v2540_v39 = vpack.i.b16 %v2539_v4, %v2539_v4  ;;  %6995 = vst [vmem:[#allocation49_spill] sm:$0xff] %v6156_v29  ;;  %v2761_v4 = vpack.i.b16 %v2760_v11, %v2760_v11 }
 0x35d   : > { %v2244_v54 = vpop.permute.xlu1 %2243 }
 0x35f   : > { %v2242_v22 = vpop.permute.xlu0 %2241 }
 0x360   : > { %v6100_v58 = vsel %vm2245_vm6, %v2244_v54, %v2242_v22  ;;  %v6103_v28 = vsel %vm2245_vm6, %v2242_v22, %v2244_v54  ;;  %v6148_v54 = vrot.slane %v2540_v39, %v5621_v12  ;;  %v6170_v39 = vrot.slane %v2761_v4, %v5727_v36 }
 0x361   : > { %v2267_v5 = vmul.bf16 %v6088_v51, %v6103_v28  ;;  %v2268_v18 = vmul.bf16 %v6091_v16, %v6100_v58  ;;  %v2206_v30 = vpop.permute.xlu1 %2205 }
 0x362   : > { %6993 = vst [vmem:[#allocation48_spill] sm:$0xff] %v6148_v54  ;;  %6996 = vst [vmem:[#allocation50_spill] sm:$0xff] %v6170_v39 }
 0x363   : > { %2304 = vmatprep.subr.bf16.mxu0 %v2268_v18  ;;  %v2203_v17 = vpop.permute.xlu0 %2202  ;;  %v5265_v18 = vcombine.high %v2851_v20, %v2851_v20 }
 0x364   : > { %v6119_v45 = vsel %vm2207_vm5, %v2206_v30, %v2203_v17  ;;  %v6122_v55 = vsel %vm2207_vm5, %v2203_v17, %v2206_v30  ;;  %2305 = vmatpush1.bf16.msra.mxu0 %v2267_v5  ;;  %v5246_v5 = vcombine.low %v2637_v27, %v2637_v27  ;;  %v5449_v17 = vld [vmem:[%s6820_s6 + $0x18] sm:$0xff]  }
 0x365   : > { %v2235_v47 = vmul.bf16 %v6097_v0, %v6122_v55  ;;  %v2236_v1 = vmul.bf16 %v6110_v34, %v6119_v45  ;;  %v2415_v10 = vpop.permute.xlu1 %2414 }
 0x366   : > { %v2644_v60 = vpack.i.b16 %v5246_v5, %v5246_v5 }
 0x367   : > { %5222 = vmatmul.mubr.msk.bf16.vlgmr.msra.gmra.mxu0 %vm575_vm2, %v5442_v46  ;;  %2373 = vmatprep.subr.bf16.mxu1 %v2236_v1  ;;  %v2413_v49 = vpop.permute.xlu0 %2412  ;;  %v2962_v1 = vshrl.u32 %v5265_v18, 16 }
 0x368   : > { %v6142_v9 = vsel %vm2416_vm3, %v2415_v10, %v2413_v49  ;;  %v6145_v26 = vsel %vm2416_vm3, %v2413_v49, %v2415_v10  ;;  %2374 = vmatpush1.bf16.msra.mxu1 %v2235_v47  ;;  %2332 = vmatprep.mubr.bf16.mxu0 %v6994_v15  ;;  %v2753_v47 = vshrl.u32 %v5246_v5, 16  ;;  %v2865_v10 = vpack.i.b16 %v5265_v18, %v5265_v18  ;;  %v5451_v49 = vld [vmem:[%s6820_s6 + $0x8] sm:$0xff]   ;;  %v5452_v18 = vld [vmem:[%s6820_s6 + $0x20] sm:$0xff]  }
 0x369   : > { %v2444_v22 = vmul.bf16 %v6116_v43, %v6145_v26  ;;  %v2445_v61 = vmul.bf16 %v6125_v7, %v6142_v9  ;;  %v2531_v41 = vpop.permute.xlu1 %2530  ;;  %v2963_v4 = vpack.i.b16 %v2962_v1, %v2962_v1 }
 0x36a   : > { %v6183_v5 = vrot.slane %v2865_v10, %v5662_v33 }
 0x36b   : > { %5226 = vmatmul.mubr.msk.bf16.vlgmr.msra.gmra.mxu1 %vm575_vm2, %v5447_v35  ;;  %2481 = vmatprep.subr.bf16.mxu0 %v2445_v61  ;;  %v2529_v30 = vpop.permute.xlu0 %2528  ;;  %v2754_v61 = vpack.i.b16 %v2753_v47, %v2753_v47  ;;  %v5454_v47 = vld [vmem:[%s6820_s6 + $0x28] sm:$0xff]  }
 0x36c   : > { %v2533_v46 = vsel %vm601_vm4, %v2531_v41, %v2529_v30  ;;  %v2537_v31 = vsel %vm601_vm4, %v2529_v30, %v2531_v41  ;;  %2482 = vmatpush1.bf16.msra.mxu0 %v2444_v22  ;;  %2401 = vmatprep.mubr.bf16.mxu1 %v6994_v15  ;;  %v6180_v41 = vrot.slane %v2644_v60, %v5727_v36 }
 0x36d   : > { %v2553_v12 = vmul.bf16 %v6148_v54, %v2537_v31  ;;  %v2554_v27 = vmul.bf16 %v6156_v29, %v2533_v46  ;;  %2694 = vmatprep.subr.bf16.mxu0 %v2658_v38  ;;  %v2744_v2 = vpop.permute.xlu1 %2743  ;;  %6998 = vst [vmem:[#allocation52_spill] sm:$0xff] %v6183_v5  ;;  %v6191_v30 = vrot.slane %v2754_v61, %v5727_v36  ;;  %v3053_v36 = vld [vmem:[%s6815_s1 + $0x18] sm:$0x22] }
 0x36e   : > { %6997 = vst [vmem:[#allocation51_spill] sm:$0xff] %v6180_v41  ;;  %v2657_v38 = vmul.bf16 %v6180_v41, %v6045_v32  ;;  %v2872_v46 = vmul.bf16 %v6183_v5, %v6122_v55  ;;  %v5264_v32 = vcombine.low %v2851_v20, %v2851_v20  ;;  %v5283_v60 = vcombine.high %v3053_v36, %v3053_v36 }
 0x36f   : > { %5223 = vmatmul.mubr.msk.bf16.gmra.mxu0 %vm575_vm2, %v5449_v17  ;;  %2590 = vmatprep.subr.bf16.mxu1 %v2554_v27  ;;  %v2742_v11 = vpop.permute.xlu0 %2741  ;;  %6999 = vst [vmem:[#allocation53_spill] sm:$0xff] %v6191_v30  ;;  %v6196_v17 = vrot.slane %v2963_v4, %v5662_v33 }
 0x370   : > { %v2751_v35 = vsel %vm2745_vm13, %v2744_v2, %v2742_v11  ;;  %2591 = vmatpush1.bf16.msra.mxu1 %v2553_v12  ;;  %2499 = vmatprep.mubr.bf16.mxu0 %v6994_v15  ;;  %v2746_v31 = vsel %vm2745_vm13, %v2742_v11, %v2744_v2  ;;  %v5453_v12 = vld [vmem:[%s6820_s6 + $0x30] sm:$0xff]   ;;  %v2955_v1 = vshrl.u32 %v5264_v32, 16  ;;  %v2858_v10 = vpack.i.b16 %v5264_v32, %v5264_v32 }
 0x371   : > { %v2768_v22 = vmul.bf16 %v6170_v39, %v2751_v35  ;;  %7000 = vst [vmem:[#allocation54_spill] sm:$0xff] %v6196_v17  ;;  %v2767_v27 = vmul.bf16 %v6191_v30, %v2746_v31  ;;  %v2970_v55 = vmul.bf16 %v6196_v17, %v6103_v28  ;;  %v3067_v2 = vpack.i.b16 %v5283_v60, %v5283_v60  ;;  %v5455_v28 = vld [vmem:[%s6820_s6 + $0x38] sm:$0xff]   ;;  %v5456_v35 = vld [vmem:[%s6820_s6 + $0x40] sm:$0xff]   ;;  %v5461_v32 = vld [vmem:[%s6820_s6 + $0x70] sm:$0xff]  }
 0x372   : > { %v2956_v20 = vpack.i.b16 %v2955_v1, %v2955_v1  ;;  %v6223_v11 = vrot.slane %v2858_v10, %v5662_v33  ;;  %v5459_v31 = vld [vmem:[%s6820_s6 + $0x58] sm:$0xff]  }
 0x373   : > { %5227 = vmatmul.mubr.msk.bf16.gmra.mxu1 %vm575_vm2, %v5451_v49  ;;  %2804 = vmatprep.subr.bf16.mxu1 %v2768_v22  ;;  %v6226_v49 = vrot.slane %v3067_v2, %v5668_v44 }
 0x374   : > { %2608 = vmatprep.mubr.bf16.mxu1 %v6994_v15  ;;  %7001 = vst [vmem:[#allocation55_spill] sm:$0xff] %v6223_v11  ;;  %v6234_v22 = vrot.slane %v2956_v20, %v5662_v33  ;;  %v2871_v61 = vmul.bf16 %v6223_v11, %v6119_v45  ;;  %v5458_v45 = vld [vmem:[%s6820_s6 + $0x48] sm:$0xff]  }
 0x375   : > { %7002 = vst [vmem:[#allocation56_spill] sm:$0xff] %v6226_v49  ;;  %v3074_v4 = vmul.bf16 %v6226_v49, %v6145_v26 }
 0x376   : > { %7003 = vst [vmem:[#allocation57_spill] sm:$0xff] %v6234_v22 }
 0x377   : > { %5236 = vmatmul.mubr.msk.bf16.vlgmr.msra.gmra.mxu0 %vm575_vm2, %v5452_v18  ;;  %v5457_v18 = vld [vmem:[%s6820_s6 + $0x50] sm:$0xff]  }
 0x378   : > { %2695 = vmatpush1.bf16.msra.mxu0 %v2657_v38  ;;  %2509 = vmatprep.mubr.bf16.mxu0 %v6994_v15  ;;  %v2969_v38 = vmul.bf16 %v6234_v22, %v6100_v58 }
 0x379   : > { %2908 = vmatprep.subr.bf16.mxu0 %v2872_v46  ;;  %v5282_v46 = vcombine.low %v3053_v36, %v3053_v36 }
 0x37b   : > { %5244 = vmatmul.mubr.msk.bf16.vlgmr.msra.gmra.mxu1 %vm575_vm2, %v5453_v12  ;;  %v3060_v26 = vpack.i.b16 %v5282_v46, %v5282_v46  ;;  %v5460_v12 = vld [vmem:[%s6820_s6 + $0x60] sm:$0xff]  }
 0x37c   : > { %2805 = vmatpush1.bf16.msra.mxu1 %v2767_v27  ;;  %2618 = vmatprep.mubr.bf16.mxu1 %v6994_v15  ;;  %v5464_v27 = vld [vmem:[%s6820_s6 + $0x80] sm:$0xff]  }
 0x37d   : > { %3006 = vmatprep.subr.bf16.mxu1 %v2970_v55  ;;  %v6258_v58 = vrot.slane %v3060_v26, %v5668_v44  ;;  %v5462_v44 = vld [vmem:[%s6820_s6 + $0x68] sm:$0xff]  }
 0x37e   : > { %v5465_v55 = vld [vmem:[%s6820_s6 + $0x88] sm:$0xff]  }
 0x37f   : > { %5237 = vmatmul.mubr.msk.bf16.gmra.mxu0 %vm575_vm2, %v5454_v47  ;;  %7004 = vst [vmem:[#allocation58_spill] sm:$0xff] %v6258_v58  ;;  %v3073_v36 = vmul.bf16 %v6258_v58, %v6142_v9  ;;  %v5463_v9 = vld [vmem:[%s6820_s6 + $0x78] sm:$0xff]  }
 0x380   : > { %2712 = vmatprep.mubr.bf16.mxu0 %v6994_v15 }
 0x383   : > { %5245 = vmatmul.mubr.msk.bf16.gmra.mxu1 %vm575_vm2, %v5455_v28 }
 0x384   : > { %2822 = vmatprep.mubr.bf16.mxu1 %v6994_v15 }
 0x387   : > { %5254 = vmatmul.mubr.msk.bf16.vlgmr.msra.gmra.mxu0 %vm575_vm2, %v5456_v35 }
 0x388   : > { %2909 = vmatpush1.bf16.msra.mxu0 %v2871_v61  ;;  %2722 = vmatprep.mubr.bf16.mxu0 %v6994_v15 }
 0x389   : > { %3110 = vmatprep.subr.bf16.mxu0 %v3074_v4 }
 0x38b   : > { %5262 = vmatmul.mubr.msk.bf16.vlgmr.msra.gmra.mxu1 %vm575_vm2, %v5457_v18 }
 0x38c   : > { %3007 = vmatpush1.bf16.msra.mxu1 %v2969_v38  ;;  %2832 = vmatprep.mubr.bf16.mxu1 %v6994_v15 }
 0x38f   : > { %5255 = vmatmul.mubr.msk.bf16.gmra.mxu0 %vm575_vm2, %v5458_v45 }
 0x390   : > { %2926 = vmatprep.mubr.bf16.mxu0 %v6994_v15 }
 0x393   : > { %5263 = vmatmul.mubr.msk.bf16.gmra.mxu1 %vm575_vm2, %v5459_v31 }
 0x394   : > { %3024 = vmatprep.mubr.bf16.mxu1 %v6994_v15 }
 0x397   : > { %5272 = vmatmul.mubr.msk.bf16.vlgmr.msra.gmra.mxu0 %vm575_vm2, %v5460_v12 }
 0x398   : > { %3111 = vmatpush1.bf16.msra.mxu0 %v3073_v36  ;;  %2936 = vmatprep.mubr.bf16.mxu0 %v6994_v15 }
 0x39b   : > { %5280 = vmatmul.mubr.msk.bf16.vlgmr.msra.gmra.mxu1 %vm575_vm2, %v5461_v32 }
 0x39c   : > { %3034 = vmatprep.mubr.bf16.mxu1 %v6994_v15 }
 0x39f   : > { %5273 = vmatmul.mubr.msk.bf16.gmra.mxu0 %vm575_vm2, %v5462_v44 }
 0x3a0   : > { %3128 = vmatprep.mubr.bf16.mxu0 %v6994_v15 }
 0x3a3   : > { %5281 = vmatmul.mubr.msk.bf16.gmra.mxu1 %vm575_vm2, %v5463_v9 }
 0x3a4   : > { %3298 = vmatprep.mubr.bf16.mxu1 %v6994_v15 }
 0x3a7   : > { %5290 = vmatmul.mubr.msk.bf16.vlgmr.msra.gmra.mxu0 %vm575_vm2, %v5464_v27 }
 0x3a8   : > { %3138 = vmatprep.mubr.bf16.mxu0 %v6994_v15 }
 0x3af   : > { %5291 = vmatmul.mubr.msk.bf16.gmra.mxu0 %vm575_vm2, %v5465_v55 }
 0x3b0   : > { %3427 = vmatprep.mubr.bf16.mxu0 %v6994_v15 }
 0x427   : > { %v2324_v60 = vpop.f32.mrf.mxu0 }
 0x429   : > { %v2326_v47 = vpop.f32.mrf.mxu0 }
 0x42b   : > { %v2328_v1 = vpop.f32.mrf.mxu0  ;;  %v2393_v10 = vpop.f32.mrf.mxu1 }
 0x42c   : > { %v2394_v39 = vadd.f32 %v2393_v10, %v2324_v60 }
 0x42d   : > { %v2330_v2 = vpop.f32.mrf.mxu0  ;;  %v2395_v28 = vpop.f32.mrf.mxu1 }
 0x42e   : > { %v2396_v41 = vadd.f32 %v2395_v28, %v2326_v47 }
 0x42f   : > { %v2334_v20 = vpop.f32.mrf.mxu0  ;;  %v2397_v35 = vpop.f32.mrf.mxu1 }
 0x430   : > { %v2398_v15 = vadd.f32 %v2397_v35, %v2328_v1  ;;  %v6325_v1 = vpop.permute.xlu0 %3173 }
 0x431   : > { %v6294_v61 = vpop.f32.mrf.mxu0  ;;  %v2399_v4 = vpop.f32.mrf.mxu1 }
 0x432   : > { %v2400_v16 = vadd.f32 %v2399_v4, %v2330_v2 }
 0x433   : > { %v6296_v18 = vpop.f32.mrf.mxu0  ;;  %v2403_v38 = vpop.f32.mrf.mxu1 }
 0x435   : > { %v6298_v46 = vpop.f32.mrf.mxu0  ;;  %v2405_v45 = vpop.f32.mrf.mxu1 }
 0x437   : > { %v6300_v26 = vpop.f32.mrf.mxu1  ;;  %v2501_v31 = vpop.f32.mrf.mxu0 }
 0x438   : > { %v2520_v29 = vadd.f32 %v2501_v31, %v2394_v39  ;;  %v2406_v39 = vadd.f32 %v2405_v45, %v6294_v61 }
 0x439   : > { %v6302_v12 = vpop.f32.mrf.mxu1  ;;  %v2503_v36 = vpop.f32.mrf.mxu0 }
 0x43a   : > { %v2521_v0 = vadd.f32 %v2503_v36, %v2396_v41 }
 0x43b   : > { %v2505_v32 = vpop.f32.mrf.mxu0  ;;  %v2610_v44 = vpop.f32.mrf.mxu1 }
 0x43c   : > { %v2629_v7 = vadd.f32 %v2610_v44, %v2520_v29  ;;  %v2522_v51 = vadd.f32 %v2505_v32, %v2398_v15 }
 0x43d   : > { %v2507_v9 = vpop.f32.mrf.mxu0  ;;  %v2612_v27 = vpop.f32.mrf.mxu1 }
 0x43f   : > { %v2511_v55 = vpop.f32.mrf.mxu0  ;;  %v2614_v33 = vpop.f32.mrf.mxu1 }
 0x440   : > { %v2631_v60 = vadd.f32 %v2614_v33, %v2522_v51  ;;  %v6329_v33 = vpop.permute.xlu1 %3178 }
 0x441   : > { %v2513_v48 = vpop.f32.mrf.mxu0  ;;  %v2616_v52 = vpop.f32.mrf.mxu1 }
 0x443   : > { %v6304_v53 = vpop.f32.mrf.mxu0  ;;  %v2620_v19 = vpop.f32.mrf.mxu1 }
 0x445   : > { %v6306_v14 = vpop.f32.mrf.mxu0  ;;  %v6308_v40 = vpop.f32.mrf.mxu1 }
 0x447   : > { %v6310_v23 = vpop.f32.mrf.mxu1  ;;  %v2714_v6 = vpop.f32.mrf.mxu0 }
 0x448   : > { %7005 = vst [vmem:[#allocation59_spill] sm:$0xff] %v6310_v23 }
 0x449   : > { %v6312_v8 = vpop.f32.mrf.mxu1  ;;  %v2716_v57 = vpop.f32.mrf.mxu0 }
 0x44a   : > { %7006 = vst [vmem:[#allocation60_spill] sm:$0xff] %v6312_v8  ;;  %v2523_v8 = vadd.f32 %v2507_v9, %v2400_v16 }
 0x44b   : > { %v2718_v56 = vpop.f32.mrf.mxu0  ;;  %v2824_v50 = vpop.f32.mrf.mxu1 }
 0x44c   : > { %v2632_v29 = vadd.f32 %v2616_v52, %v2523_v8  ;;  %v2735_v41 = vadd.f32 %v2718_v56, %v2631_v60 }
 0x44d   : > { %v2720_v13 = vpop.f32.mrf.mxu0  ;;  %v2826_v3 = vpop.f32.mrf.mxu1 }
 0x44f   : > { %v2724_v59 = vpop.f32.mrf.mxu0  ;;  %v2828_v42 = vpop.f32.mrf.mxu1 }
 0x451   : > { %v2726_v37 = vpop.f32.mrf.mxu0  ;;  %v2830_v25 = vpop.f32.mrf.mxu1 }
 0x453   : > { %v6314_v24 = vpop.f32.mrf.mxu0  ;;  %v2834_v63 = vpop.f32.mrf.mxu1 }
 0x454   : > { %7007 = vst [vmem:[#allocation61_spill] sm:$0xff] %v6314_v24 }
 0x455   : > { %v6316_v62 = vpop.f32.mrf.mxu0  ;;  %v6318_v22 = vpop.f32.mrf.mxu1 }
 0x456   : > { %7008 = vst [vmem:[#allocation62_spill] sm:$0xff] %v6316_v62  ;;  %7009 = vst [vmem:[#allocation63_spill] sm:$0xff] %v6318_v22  ;;  %v2630_v62 = vadd.f32 %v2612_v27, %v2521_v0  ;;  %v2404_v22 = vadd.f32 %v2403_v38, %v2334_v20  ;;  %v2525_v0 = vadd.f32 %v2513_v48, %v2406_v39  ;;  %v7012_v20 = vld [vmem:[#allocation59_spill] sm:$0xff] }
 0x457   : > { %v6320_v58 = vpop.f32.mrf.mxu1  ;;  %v2928_v17 = vpop.f32.mrf.mxu0 }
 0x458   : > { %7010 = vst [vmem:[#allocation64_spill] sm:$0xff] %v6320_v58  ;;  %v2733_v58 = vadd.f32 %v2714_v6, %v2629_v7  ;;  %v2734_v10 = vadd.f32 %v2716_v57, %v2630_v62  ;;  %v2524_v47 = vadd.f32 %v2511_v55, %v2404_v22  ;;  %v2408_v6 = vadd.f32 %v6300_v26, %v6296_v18  ;;  %v3169_v26 = vpop.permute.xlu1 %3168 }
 0x459   : > { %v6322_v49 = vpop.f32.mrf.mxu1  ;;  %v2930_v11 = vpop.f32.mrf.mxu0  ;;  %v2736_v62 = vadd.f32 %v2720_v13, %v2632_v29  ;;  %v2410_v22 = vadd.f32 %v6302_v12, %v6298_v46  ;;  %v7013_v46 = vld [vmem:[#allocation60_spill] sm:$0xff] }
 0x45a   : > { %7011 = vst [vmem:[#allocation65_spill] sm:$0xff] %v6322_v49  ;;  %v2843_v23 = vadd.f32 %v2824_v50, %v2733_v58  ;;  %v2844_v35 = vadd.f32 %v2826_v3, %v2734_v10  ;;  %v2633_v7 = vadd.f32 %v2620_v19, %v2524_v47  ;;  %v2845_v50 = vadd.f32 %v2828_v42, %v2735_v41 }
 0x45b   : > { %v2932_v30 = vpop.f32.mrf.mxu0  ;;  %v3026_v5 = vpop.f32.mrf.mxu1  ;;  %v2526_v52 = vadd.f32 %v6304_v53, %v2408_v6  ;;  %v2634_v3 = vadd.f32 %v6308_v40, %v2525_v0  ;;  %v2527_v58 = vadd.f32 %v6306_v14, %v2410_v22 }
 0x45c   : > { %v2947_v2 = vadd.f32 %v2928_v17, %v2843_v23  ;;  %v2948_v57 = vadd.f32 %v2930_v11, %v2844_v35  ;;  %v2737_v56 = vadd.f32 %v2724_v59, %v2633_v7  ;;  %v2846_v23 = vadd.f32 %v2830_v25, %v2736_v62  ;;  %v3164_v53 = vpop.permute.xlu0 %3163  ;;  %v7014_v59 = vld [vmem:[#allocation61_spill] sm:$0xff] }
 0x45d   : > { %v2934_v54 = vpop.f32.mrf.mxu0  ;;  %v3028_v21 = vpop.f32.mrf.mxu1  ;;  %v2949_v48 = vadd.f32 %v2932_v30, %v2845_v50  ;;  %v2635_v13 = vadd.f32 %v7012_v20, %v2526_v52  ;;  %v2738_v42 = vadd.f32 %v2726_v37, %v2634_v3  ;;  %v2636_v40 = vadd.f32 %v7013_v46, %v2527_v58  ;;  %v7015_v25 = vld [vmem:[#allocation63_spill] sm:$0xff]  ;;  %v7016_v37 = vld [vmem:[#allocation62_spill] sm:$0xff] }
 0x45e   : > { %v3045_v51 = vadd.f32 %v3026_v5, %v2947_v2  ;;  %v3046_v19 = vadd.f32 %v3028_v21, %v2948_v57  ;;  %v2847_v61 = vadd.f32 %v2834_v63, %v2737_v56  ;;  %v2950_v4 = vadd.f32 %v2934_v54, %v2846_v23 }
 0x45f   : > { %v2938_v43 = vpop.f32.mrf.mxu0  ;;  %v3030_v34 = vpop.f32.mrf.mxu1  ;;  %v2739_v45 = vadd.f32 %v7014_v59, %v2635_v13  ;;  %v2848_v30 = vadd.f32 %v7015_v25, %v2738_v42  ;;  %v2740_v32 = vadd.f32 %v7016_v37, %v2636_v40  ;;  %v7017_v44 = vld [vmem:[#allocation64_spill] sm:$0xff] }
 0x460   : > { %v3047_v18 = vadd.f32 %v3030_v34, %v2949_v48  ;;  %v2951_v31 = vadd.f32 %v2938_v43, %v2847_v61 }
 0x461   : > { %v2940_v24 = vpop.f32.mrf.mxu0  ;;  %v3032_v49 = vpop.f32.mrf.mxu1  ;;  %v2849_v63 = vadd.f32 %v7017_v44, %v2739_v45  ;;  %v7018_v39 = vld [vmem:[#allocation65_spill] sm:$0xff] }
 0x462   : > { %v3048_v14 = vadd.f32 %v3032_v49, %v2950_v4  ;;  %v2952_v54 = vadd.f32 %v2940_v24, %v2848_v30  ;;  %v2850_v47 = vadd.f32 %v7018_v39, %v2740_v32  ;;  %v7019_v45 = vld [vmem:[#allocation41_spill] sm:$0xff]  ;;  %v7020_v30 = vld [vmem:[#allocation42_spill] sm:$0xff] }
 0x463   : > { %v2942_v28 = vpop.f32.mrf.mxu0  ;;  %v3036_v15 = vpop.f32.mrf.mxu1 }
 0x464   : > { %v3049_v27 = vadd.f32 %v3036_v15, %v2951_v31  ;;  %v2953_v29 = vadd.f32 %v2942_v28, %v2849_v63  ;;  %v7021_v63 = vld [vmem:[#allocation44_spill] sm:$0xff] }
 0x465   : > { %v2944_v16 = vpop.f32.mrf.mxu0  ;;  %v3038_v11 = vpop.f32.mrf.mxu1 }
 0x466   : > { %v3050_v41 = vadd.f32 %v3038_v11, %v2952_v54  ;;  %v2954_v0 = vadd.f32 %v2944_v16, %v2850_v47  ;;  %v3854_v11 = vld [vmem:[%s6823_s9] sm:$0xff] }
 0x467   : > { %v3130_v8 = vpop.f32.mrf.mxu0  ;;  %v3040_v34 = vpop.f32.mrf.mxu1  ;;  %v7023_v47 = vld [vmem:[#allocation46_spill] sm:$0xff] }
 0x468   : > { %v3149_v17 = vadd.f32 %v3130_v8, %v3045_v51  ;;  %v3051_v7 = vadd.f32 %v3040_v34, %v2953_v29 }
 0x469   : > { %v3132_v5 = vpop.f32.mrf.mxu0  ;;  %v3042_v62 = vpop.f32.mrf.mxu1 }
 0x46a   : > { %v3150_v38 = vadd.f32 %v3132_v5, %v3046_v19  ;;  %v3181_v12 = vadd.f32 %v3164_v53, %v3149_v17  ;;  %v3052_v52 = vadd.f32 %v3042_v62, %v2954_v0 }
 0x46b   : > { %v3134_v21 = vpop.f32.mrf.mxu0 }
 0x46c   : > { %v3151_v36 = vadd.f32 %v3134_v21, %v3047_v18  ;;  %v3182_v55 = vadd.f32 %v3164_v53, %v3150_v38  ;;  %v3189_v43 = vmax.f32 %v3181_v12, 0.0 }
 0x46d   : > { %v3136_v9 = vpop.f32.mrf.mxu0 }
 0x46e   : > { %v3183_v60 = vadd.f32 %v3169_v26, %v3151_v36  ;;  %v3152_v10 = vadd.f32 %v3136_v9, %v3048_v14  ;;  %v3190_v24 = vmax.f32 %v3182_v55, 0.0  ;;  %v5466_v9 = vld [vmem:[%s6822_s8 + $0x8] sm:$0xff]  }
 0x46f   : > { %v3140_v35 = vpop.f32.mrf.mxu0 }
 0x470   : > { %v3191_v49 = vmax.f32 %v3183_v60, 0.0  ;;  %v3184_v2 = vadd.f32 %v3169_v26, %v3152_v10  ;;  %v3153_v6 = vadd.f32 %v3140_v35, %v3049_v27  ;;  %v7022_v10 = vld [vmem:[#allocation45_spill] sm:$0xff]  ;;  %v7024_v35 = vld [vmem:[#allocation43_spill] sm:$0xff] }
 0x471   : > { %v3142_v50 = vpop.f32.mrf.mxu0 }
 0x472   : > { %v6343_v57 = vpack.c.bf16 %v3191_v49, %v3189_v43  ;;  %v3192_v15 = vmax.f32 %v3184_v2, 0.0  ;;  %v3154_v51 = vadd.f32 %v3142_v50, %v3050_v41  ;;  %v3185_v28 = vadd.f32 %v6325_v1, %v3153_v6 }
 0x473   : > { %v3144_v22 = vpop.f32.mrf.mxu0 }
 0x474   : > { %v6345_v3 = vpack.c.bf16 %v3192_v15, %v3190_v24  ;;  %v3155_v56 = vadd.f32 %v3144_v22, %v3051_v7  ;;  %3235 = vrot.lane.b32.xlu1 %v6343_v57, %s5501_s21  ;;  %v3186_v16 = vadd.f32 %v6325_v1, %v3154_v51  ;;  %v3193_v19 = vmax.f32 %v3185_v28, 0.0 }
 0x475   : > { %v3146_v8 = vpop.f32.mrf.mxu0  ;;  %v7025_v51 = vmov 0  }
 0x476   : > { %v3187_v23 = vadd.f32 %v6329_v33, %v3155_v56  ;;  %v3156_v48 = vadd.f32 %v3146_v8, %v3052_v52  ;;  %3231 = vrot.lane.b32.xlu0 %v6345_v3, %s5501_s21  ;;  %v3194_v20 = vmax.f32 %v3186_v16, 0.0  ;;  %v7026_v52 = vld [vmem:[#allocation47_spill] sm:$0xff]  ;;  %v5468_v8 = vld [vmem:[%s6822_s8 + $0x10] sm:$0xff]  }
 0x477   : > { %v5467_v56 = vld [vmem:[%s6822_s8] sm:$0xff]  }
 0x478   : > { %v3195_v17 = vmax.f32 %v3187_v23, 0.0  ;;  %v3188_v58 = vadd.f32 %v6329_v33, %v3156_v48  ;;  %3209 = vrot.lane.b32.xlu1 %v6343_v57, %s5502_s15  ;;  %v3855_v33 = vld [vmem:[%s6823_s9 + $0x8] sm:$0xff] }
 0x479   : > { %v7027_v48 = vld [vmem:[#allocation48_spill] sm:$0xff] }
 0x47a   : > { %v6357_v13 = vpack.c.bf16 %v3195_v17, %v3193_v19  ;;  %v3196_v42 = vmax.f32 %v3188_v58, 0.0  ;;  %3203 = vrot.lane.b32.xlu0 %v6345_v3, %s5502_s15  ;;  %v7028_v17 = vld [vmem:[#allocation49_spill] sm:$0xff] }
 0x47c   : > { %v6361_v1 = vpack.c.bf16 %v3196_v42, %v3194_v20  ;;  %3237 = vrot.lane.b32.xlu1 %v6357_v13, %s5501_s21  ;;  %v7029_v42 = vld [vmem:[#allocation51_spill] sm:$0xff] }
 0x47e   : > { %3233 = vrot.lane.b32.xlu0 %v6361_v1, %s5501_s21  ;;  %v3527_v28 = vmul.bf16 %v6361_v1, %v7026_v52  ;;  %s7043_s21 = smov 96  }
 0x480   : > { %3211 = vrot.lane.b32.xlu1 %v6357_v13, %s5502_s15 }
 0x482   : > { %3205 = vrot.lane.b32.xlu0 %v6361_v1, %s5502_s15  ;;  %s7044_s15 = smov 94  }
 0x484   : > { %3366 = vrot.lane.b32.xlu1 %v6357_v13, %s5503_s17 }
 0x486   : > { %3362 = vrot.lane.b32.xlu0 %v6361_v1, %s5503_s17 }
 0x488   : > { %3364 = vrot.lane.b32.xlu1 %v6343_v57, %s5503_s17 }
 0x48a   : > { %3360 = vrot.lane.b32.xlu0 %v6345_v3, %s5503_s17 }
 0x48c   : > { %3448 = vrot.lane.b32.xlu1 %v6357_v13, %s5504_s18 }
 0x48e   : > { %3444 = vrot.lane.b32.xlu0 %v6361_v1, %s5504_s18 }
 0x490   : > { %3446 = vrot.lane.b32.xlu1 %v6343_v57, %s5504_s18 }
 0x492   : > { %3442 = vrot.lane.b32.xlu0 %v6345_v3, %s5504_s18 }
 0x494   : > { %3592 = vrot.lane.b32.xlu1 %v6361_v1, %s5505_s19  ;;  %v3526_v1 = vmul.bf16 %v6357_v13, %v7029_v42 }
 0x496   : > { %3590 = vrot.lane.b32.xlu0 %v6357_v13, %s5505_s19 }
 0x498   : > { %3588 = vrot.lane.b32.xlu1 %v6345_v3, %s5505_s19 }
 0x49a   : > { %3586 = vrot.lane.b32.xlu0 %v6343_v57, %s5505_s19 }
 0x49c   : > { %3863 = vperm.xlu1 %5404, %v3855_v33  }
 0x49e   : > { %3858 = vperm.xlu0 %5403, %v3854_v11   ;;  %v3525_v11 = vmul.bf16 %v6345_v3, %v7026_v52  ;;  %v7030_v3 = vld [vmem:[#allocation52_spill] sm:$0xff] }
 0x4e6   : > { %v3236_v5 = vpop.permute.xlu1 %3235 }
 0x4e8   : > { %v3232_v61 = vpop.permute.xlu0 %3231 }
 0x4e9   : > { %v6402_v46 = vsel %vm2245_vm6, %v3236_v5, %v3232_v61  ;;  %v6415_v31 = vsel %vm2245_vm6, %v3232_v61, %v3236_v5 }
 0x4ea   : > { %v3210_v4 = vpop.permute.xlu1 %3209  ;;  %v3252_v14 = vmul.bf16 %v6402_v46, %v7020_v30  ;;  %v3251_v32 = vmul.bf16 %v6415_v31, %v7019_v45 }
 0x4ec   : > { %v3204_v18 = vpop.permute.xlu0 %3203 }
 0x4ed   : > { %v6433_v27 = vsel %vm2207_vm5, %v3210_v4, %v3204_v18  ;;  %v6448_v49 = vsel %vm2207_vm5, %v3204_v18, %v3210_v4 }
 0x4ee   : > { %v3238_v38 = vpop.permute.xlu1 %3237  ;;  %v3226_v2 = vmul.bf16 %v6433_v27, %v7021_v63  ;;  %v3225_v15 = vmul.bf16 %v6448_v49, %v7024_v35 }
 0x4f0   : > { %v3234_v53 = vpop.permute.xlu0 %3233 }
 0x4f1   : > { %v6405_v40 = vsel %vm2245_vm6, %v3238_v38, %v3234_v53  ;;  %v6408_v59 = vsel %vm2245_vm6, %v3234_v53, %v3238_v38  ;;  %v3524_v38 = vmul.bf16 %v6343_v57, %v7029_v42  ;;  %v5469_v57 = vld [vmem:[%s6822_s8 + $0x18] sm:$0xff]  }
 0x4f2   : > { %v3253_v25 = vmul.bf16 %v6408_v59, %v7019_v45  ;;  %v3254_v21 = vmul.bf16 %v6405_v40, %v7020_v30  ;;  %v3212_v26 = vpop.permute.xlu1 %3211 }
 0x4f4   : > { %3278 = vmatprep.subr.bf16.mxu1 %v3254_v21  ;;  %v3206_v12 = vpop.permute.xlu0 %3205 }
 0x4f5   : > { %v6420_v36 = vsel %vm2207_vm5, %v3212_v26, %v3206_v12  ;;  %3279 = vmatpush1.bf16.msra.mxu1 %v3253_v25  ;;  %v6425_v44 = vsel %vm2207_vm5, %v3206_v12, %v3212_v26  ;;  %v5470_v25 = vld [vmem:[%s6822_s8 + $0x20] sm:$0xff]   ;;  %v7031_v26 = vld [vmem:[#allocation53_spill] sm:$0xff]  ;;  %vm7083_vm5 = vcmask 7168  }
 0x4f6   : > { %v3367_v37 = vpop.permute.xlu1 %3366  ;;  %3280 = vmatprep.subr.bf16.mxu1 %v3252_v14  ;;  %v3228_v54 = vmul.bf16 %v6420_v36, %v7021_v63  ;;  %v3227_v43 = vmul.bf16 %v6425_v44, %v7024_v35  ;;  %v3671_v53 = vmul.bf16 %v6425_v44, %v7030_v3  ;;  %v7032_v12 = vld [vmem:[#allocation50_spill] sm:$0xff]  ;;  %v3669_v63 = vmul.bf16 %v6448_v49, %v7030_v3  ;;  %v5472_v35 = vld [vmem:[%s6822_s8 + $0x30] sm:$0xff]   ;;  %vm7084_vm6 = vmmov %vm7083_vm5 }
 0x4f8   : > { %v3363_v34 = vpop.permute.xlu0 %3362 }
 0x4f9   : > { %v6436_v55 = vsel %vm2416_vm3, %v3367_v37, %v3363_v34  ;;  %v6439_v60 = vsel %vm2416_vm3, %v3363_v34, %v3367_v37  ;;  %3281 = vmatpush1.bf16.msra.mxu1 %v3251_v32  ;;  %v7033_v32 = vld [vmem:[#allocation55_spill] sm:$0xff] }
 0x4fa   : > { %v3382_v39 = vmul.bf16 %v6439_v60, %v7022_v10  ;;  %v3383_v29 = vmul.bf16 %v6436_v55, %v7023_v47  ;;  %v3365_v41 = vpop.permute.xlu1 %3364  ;;  %3329 = vmatprep.subr.bf16.mxu1 %v3228_v54  ;;  %v3670_v44 = vmul.bf16 %v6420_v36, %v7033_v32  ;;  %v3668_v36 = vmul.bf16 %v6433_v27, %v7033_v32  ;;  %v5471_v27 = vld [vmem:[%s6822_s8 + $0x28] sm:$0xff]  }
 0x4fc   : > { %5295 = vmatmul.mubr.msk.bf16.vlgmr.msra.gmra.mxu1 %vm1380_vm10, %v5466_v9  ;;  %3407 = vmatprep.subr.bf16.mxu0 %v3383_v29  ;;  %v3361_v6 = vpop.permute.xlu0 %3360  ;;  %v7034_v29 = vld [vmem:[#allocation56_spill] sm:$0xff] }
 0x4fd   : > { %v6454_v0 = vsel %vm2416_vm3, %v3365_v41, %v3361_v6  ;;  %v6457_v7 = vsel %vm2416_vm3, %v3361_v6, %v3365_v41  ;;  %3330 = vmatpush1.bf16.msra.mxu1 %v3227_v43  ;;  %3408 = vmatpush1.bf16.msra.mxu0 %v3382_v39  ;;  %v3795_v41 = vmul.bf16 %v6439_v60, %v7034_v29  ;;  %v7035_v43 = vld [vmem:[#allocation54_spill] sm:$0xff]  ;;  %v7037_v60 = vld [vmem:[#allocation57_spill] sm:$0xff]  ;;  %vm7076_vm3 = vcmask 121856  }
 0x4fe   : > { %v3380_v62 = vmul.bf16 %v6457_v7, %v7022_v10  ;;  %v3381_v50 = vmul.bf16 %v6454_v0, %v7023_v47  ;;  %v3449_v24 = vpop.permute.xlu1 %3448  ;;  %3331 = vmatprep.subr.bf16.mxu1 %v3226_v2  ;;  %3349 = vmatprep.mubr.bf16.mxu1 %v7025_v51  ;;  %v3733_v49 = vmul.bf16 %v6408_v59, %v7035_v43  ;;  %v7036_v2 = vld [vmem:[#allocation58_spill] sm:$0xff] }
 0x4ff   : > { %v3794_v6 = vmul.bf16 %v6436_v55, %v7036_v2  ;;  %v3731_v59 = vmul.bf16 %v6415_v31, %v7035_v43  ;;  %v3792_v55 = vmul.bf16 %v6454_v0, %v7036_v2  ;;  %v5474_v31 = vld [vmem:[%s6822_s8 + $0x40] sm:$0xff]  }
 0x500   : > { %3409 = vmatprep.subr.bf16.mxu0 %v3381_v50  ;;  %v3445_v22 = vpop.permute.xlu0 %3444  ;;  %v3793_v50 = vmul.bf16 %v6457_v7, %v7034_v29  ;;  %v5473_v7 = vld [vmem:[%s6822_s8 + $0x38] sm:$0xff]  }
 0x501   : > { %v3451_v16 = vsel %vm601_vm4, %v3449_v24, %v3445_v22  ;;  %v3460_v23 = vsel %vm601_vm4, %v3445_v22, %v3449_v24  ;;  %3332 = vmatpush1.bf16.msra.mxu1 %v3225_v15  ;;  %3410 = vmatpush1.bf16.msra.mxu0 %v3380_v62  ;;  %v3732_v62 = vmul.bf16 %v6405_v40, %v7037_v60 }
 0x502   : > { %v3464_v19 = vmul.bf16 %v3460_v23, %v7027_v48  ;;  %v3465_v58 = vmul.bf16 %v3451_v16, %v7028_v17  ;;  %v3447_v20 = vpop.permute.xlu1 %3446  ;;  %3551 = vmatprep.subr.bf16.mxu0 %v3527_v28  ;;  %v3730_v40 = vmul.bf16 %v6402_v46, %v7037_v60 }
 0x504   : > { %5297 = vmatmul.mubr.msk.bf16.vlgmr.msra.gmra.mxu1 %vm1380_vm10, %v5467_v56  ;;  %5301 = vmatmul.mubr.msk.bf16.vlgmr.msra.gmra.mxu0 %vm1380_vm10, %v5468_v8  ;;  %v3443_v33 = vpop.permute.xlu0 %3442 }
 0x505   : > { %3489 = vmatprep.subr.bf16.mxu1 %v3465_v58  ;;  %v3450_v5 = vsel %vm601_vm4, %v3447_v20, %v3443_v33  ;;  %v3456_v61 = vsel %vm601_vm4, %v3443_v33, %v3447_v20  ;;  %3552 = vmatpush1.bf16.msra.mxu0 %v3526_v1 }
 0x506   : > { %v3462_v4 = vmul.bf16 %v3456_v61, %v7027_v48  ;;  %v3463_v18 = vmul.bf16 %v3450_v5, %v7028_v17  ;;  %3490 = vmatpush1.bf16.msra.mxu1 %v3464_v19  ;;  %v3593_v13 = vpop.permute.xlu1 %3592  ;;  %3553 = vmatprep.subr.bf16.mxu0 %v3525_v11 }
 0x507   : > { %3509 = vmatprep.mubr.bf16.mxu1 %v7025_v51  ;;  %3571 = vmatprep.mubr.bf16.mxu0 %v7025_v51 }
 0x508   : > { %3491 = vmatprep.subr.bf16.mxu1 %v3463_v18  ;;  %v3591_v45 = vpop.permute.xlu0 %3590 }
 0x509   : > { %v3595_v30 = vsel %vm2745_vm13, %v3591_v45, %v3593_v13  ;;  %v3604_v21 = vsel %vm2745_vm13, %v3593_v13, %v3591_v45  ;;  %3554 = vmatpush1.bf16.msra.mxu0 %v3524_v38 }
 0x50a   : > { %v3608_v14 = vmul.bf16 %v3595_v30, %v7031_v26  ;;  %v3609_v37 = vmul.bf16 %v3604_v21, %v7032_v12  ;;  %3492 = vmatpush1.bf16.msra.mxu1 %v3462_v4  ;;  %3695 = vmatprep.subr.bf16.mxu0 %v3671_v53  ;;  %v3589_v54 = vpop.permute.xlu1 %3588 }
 0x50c   : > { %3633 = vmatprep.subr.bf16.mxu1 %v3609_v37  ;;  %v3587_v34 = vpop.permute.xlu0 %3586  ;;  %5309 = vmatmul.mubr.msk.bf16.vlgmr.msra.gmra.mxu0 %vm1380_vm10, %v5470_v25 }
 0x50d   : > { %5305 = vmatmul.mubr.msk.bf16.vlgmr.msra.gmra.mxu1 %vm1380_vm10, %v5469_v57  ;;  %v3594_v9 = vsel %vm2745_vm13, %v3587_v34, %v3589_v54  ;;  %v3600_v10 = vsel %vm2745_vm13, %v3589_v54, %v3587_v34  ;;  %3696 = vmatpush1.bf16.msra.mxu0 %v3670_v44 }
 0x50e   : > { %v3606_v39 = vmul.bf16 %v3594_v9, %v7031_v26  ;;  %v3607_v47 = vmul.bf16 %v3600_v10, %v7032_v12  ;;  %3634 = vmatpush1.bf16.msra.mxu1 %v3608_v14  ;;  %3697 = vmatprep.subr.bf16.mxu0 %v3669_v63 }
 0x50f   : > { %3653 = vmatprep.mubr.bf16.mxu1 %v7025_v51  ;;  %3715 = vmatprep.mubr.bf16.mxu0 %v7025_v51 }
 0x510   : > { %3635 = vmatprep.subr.bf16.mxu1 %v3607_v47 }
 0x511   : > { %3698 = vmatpush1.bf16.msra.mxu0 %v3668_v36 }
 0x512   : > { %3636 = vmatpush1.bf16.msra.mxu1 %v3606_v39  ;;  %3819 = vmatprep.subr.bf16.mxu0 %v3795_v41 }
 0x513   : > { %3757 = vmatprep.subr.bf16.mxu1 %v3733_v49 }
 0x514   : > { %5317 = vmatmul.mubr.msk.bf16.vlgmr.msra.gmra.mxu0 %vm1380_vm10, %v5472_v35 }
 0x515   : > { %5313 = vmatmul.mubr.msk.bf16.vlgmr.msra.gmra.mxu1 %vm1380_vm10, %v5471_v27  ;;  %3820 = vmatpush1.bf16.msra.mxu0 %v3794_v6 }
 0x516   : > { %3758 = vmatpush1.bf16.msra.mxu1 %v3732_v62  ;;  %3821 = vmatprep.subr.bf16.mxu0 %v3793_v50 }
 0x517   : > { %3759 = vmatprep.subr.bf16.mxu1 %v3731_v59  ;;  %3777 = vmatprep.mubr.bf16.mxu1 %v7025_v51 }
 0x518   : > { %3839 = vmatprep.mubr.bf16.mxu0 %v7025_v51 }
 0x519   : > { %3822 = vmatpush1.bf16.msra.mxu0 %v3792_v55 }
 0x51a   : > { %3760 = vmatpush1.bf16.msra.mxu1 %v3730_v40 }
 0x51c   : > { %5325 = vmatmul.mubr.msk.bf16.vlgmr.msra.gmra.mxu0 %vm1380_vm10, %v5474_v31 }
 0x51d   : > { %5321 = vmatmul.mubr.msk.bf16.vlgmr.msra.gmra.mxu1 %vm1380_vm10, %v5473_v7  ;;  %3984 = vmatprep.mubr.bf16.mxu0 %v7025_v51 }
 0x51e   : > { %3940 = vmatprep.mubr.bf16.mxu1 %v7025_v51 }
 0x5bc   : > { %v3300_v46 = vpop.f32.mrf.mxu1 }
 0x5be   : > { %v3302_v0 = vpop.f32.mrf.mxu1 }
 0x5c0   : > { %v3304_v24 = vpop.f32.mrf.mxu1 }
 0x5c2   : > { %v3306_v15 = vpop.f32.mrf.mxu1 }
 0x5c4   : > { %v3351_v22 = vpop.f32.mrf.mxu1  ;;  %v3429_v52 = vpop.f32.mrf.mxu0 }
 0x5c5   : > { %v3352_v19 = vadd.f32 %v3351_v22, %v3300_v46  ;;  %v3859_v46 = vpop.permute.xlu0 %3858 }
 0x5c6   : > { %v3353_v28 = vpop.f32.mrf.mxu1  ;;  %v3431_v56 = vpop.f32.mrf.mxu0 }
 0x5c7   : > { %v3354_v20 = vadd.f32 %v3353_v28, %v3302_v0  ;;  %v3438_v33 = vadd.f32 %v3429_v52, %v3352_v19  ;;  %v3864_v52 = vpop.permute.xlu1 %3863 }
 0x5c8   : > { %v3355_v8 = vpop.f32.mrf.mxu1  ;;  %v3433_v16 = vpop.f32.mrf.mxu0 }
 0x5c9   : > { %v3356_v11 = vadd.f32 %v3355_v8, %v3304_v24  ;;  %v3439_v4 = vadd.f32 %v3431_v56, %v3354_v20 }
 0x5ca   : > { %v3357_v23 = vpop.f32.mrf.mxu1  ;;  %v3435_v48 = vpop.f32.mrf.mxu0 }
 0x5cb   : > { %v3358_v18 = vadd.f32 %v3357_v23, %v3306_v15  ;;  %v3440_v53 = vadd.f32 %v3433_v16, %v3356_v11 }
 0x5cc   : > { %v3573_v17 = vpop.f32.mrf.mxu0 }
 0x5cd   : > { %v3511_v58 = vpop.f32.mrf.mxu1  ;;  %v3441_v21 = vadd.f32 %v3435_v48, %v3358_v18 }
 0x5ce   : > { %v3575_v42 = vpop.f32.mrf.mxu0  ;;  %v3520_v13 = vadd.f32 %v3511_v58, %v3438_v33 }
 0x5cf   : > { %v3513_v1 = vpop.f32.mrf.mxu1 }
 0x5d0   : > { %v3577_v5 = vpop.f32.mrf.mxu0  ;;  %v3521_v45 = vadd.f32 %v3513_v1, %v3439_v4  ;;  %v3582_v57 = vadd.f32 %v3573_v17, %v3520_v13  ;;  %v4403_v1 = vld [vmem:[%s6825_s11] sm:$0xff]  ;;  %v7046_v13 = vld [vmem:[#allocation24_spill] sm:$0xff] }
 0x5d1   : > { %v3515_v61 = vpop.f32.mrf.mxu1  ;;  %v7045_v4 = vld [vmem:[#allocation23_spill] sm:$0xff] }
 0x5d2   : > { %v3579_v38 = vpop.f32.mrf.mxu0  ;;  %v3522_v26 = vadd.f32 %v3515_v61, %v3440_v53  ;;  %v3583_v37 = vadd.f32 %v3575_v42, %v3521_v45 }
 0x5d3   : > { %v3517_v3 = vpop.f32.mrf.mxu1 }
 0x5d4   : > { %v3717_v25 = vpop.f32.mrf.mxu0  ;;  %v3523_v32 = vadd.f32 %v3517_v3, %v3441_v21  ;;  %v3584_v34 = vadd.f32 %v3577_v5, %v3522_v26  ;;  %v7047_v21 = vld [vmem:[#allocation25_spill] sm:$0xff]  ;;  %v7048_v26 = vld [vmem:[#allocation26_spill] sm:$0xff] }
 0x5d5   : > { %v3655_v30 = vpop.f32.mrf.mxu1 }
 0x5d6   : > { %v3719_v14 = vpop.f32.mrf.mxu0  ;;  %v3664_v44 = vadd.f32 %v3655_v30, %v3582_v57  ;;  %v3585_v47 = vadd.f32 %v3579_v38, %v3523_v32  ;;  %v5326_v30 = vld [vmem:[%s6824_s10 + $0x4] sm:$0xf] }
 0x5d7   : > { %v3657_v12 = vpop.f32.mrf.mxu1 }
 0x5d8   : > { %v3721_v63 = vpop.f32.mrf.mxu0  ;;  %v3665_v9 = vadd.f32 %v3657_v12, %v3583_v37  ;;  %v3726_v36 = vadd.f32 %v3717_v25, %v3664_v44 }
 0x5d9   : > { %v3659_v54 = vpop.f32.mrf.mxu1 }
 0x5da   : > { %v3723_v10 = vpop.f32.mrf.mxu0  ;;  %v3666_v29 = vadd.f32 %v3659_v54, %v3584_v34  ;;  %v3727_v43 = vadd.f32 %v3719_v14, %v3665_v9  ;;  %v7049_v54 = vld [vmem:[#allocation27_spill] sm:$0xff]  ;;  %v7050_v9 = vld [vmem:[#allocation28_spill] sm:$0xff] }
 0x5db   : > { %v3661_v39 = vpop.f32.mrf.mxu1 }
 0x5dc   : > { %v3841_v41 = vpop.f32.mrf.mxu0  ;;  %v3667_v49 = vadd.f32 %v3661_v39, %v3585_v47  ;;  %v3728_v60 = vadd.f32 %v3721_v63, %v3666_v29  ;;  %v3890_v63 = vld [vmem:[%s6824_s10] sm:$0xf] }
 0x5dd   : > { %v3779_v35 = vpop.f32.mrf.mxu1 }
 0x5de   : > { %v3788_v27 = vadd.f32 %v3779_v35, %v3726_v36  ;;  %v3843_v2 = vpop.f32.mrf.mxu0  ;;  %v3729_v40 = vadd.f32 %v3723_v10, %v3667_v49  ;;  %v7051_v36 = vld [vmem:[#allocation29_spill] sm:$0xff]  ;;  %v7052_v49 = vld [vmem:[#allocation31_spill] sm:$0xff] }
 0x5df   : > { %v3781_v6 = vpop.f32.mrf.mxu1 }
 0x5e0   : > { %v3850_v62 = vadd.f32 %v3841_v41, %v3788_v27  ;;  %v3789_v50 = vadd.f32 %v3781_v6, %v3727_v43  ;;  %v3845_v55 = vpop.f32.mrf.mxu0  ;;  %v5329_v43 = vld [vmem:[%s6824_s10 + $0x8] sm:$0xf] }
 0x5e1   : > { %v3783_v59 = vpop.f32.mrf.mxu1 }
 0x5e2   : > { %v3851_v31 = vadd.f32 %v3843_v2, %v3789_v50  ;;  %v3790_v7 = vadd.f32 %v3783_v59, %v3728_v60  ;;  %v3866_v24 = vadd.f32 %v3859_v46, %v3850_v62  ;;  %v3847_v28 = vpop.f32.mrf.mxu0  ;;  %v7053_v2 = vld [vmem:[#allocation32_spill] sm:$0xff]  ;;  %v7054_v62 = vld [vmem:[#allocation30_spill] sm:$0xff] }
 0x5e3   : > { %v3785_v0 = vpop.f32.mrf.mxu1 }
 0x5e4   : > { %v3852_v15 = vadd.f32 %v3845_v55, %v3790_v7  ;;  %v3791_v22 = vadd.f32 %v3785_v0, %v3729_v40  ;;  %v3867_v56 = vadd.f32 %v3859_v46, %v3851_v31  ;;  %v3870_v23 = vmax.f32 %v3866_v24, 0.0  ;;  %v5331_v31 = vld [vmem:[%s6824_s10 + $0xc] sm:$0xf]  ;;  %v7055_v7 = vld [vmem:[#allocation33_spill] sm:$0xff]  ;;  %v7056_v0 = vld [vmem:[#allocation34_spill] sm:$0xff] }
 0x5e6   : > { %v3868_v8 = vadd.f32 %v3864_v52, %v3852_v15  ;;  %v3853_v16 = vadd.f32 %v3847_v28, %v3791_v22  ;;  %v3871_v17 = vmax.f32 %v3867_v56, 0.0  ;;  %v5333_v56 = vld [vmem:[%s6824_s10 + $0x10] sm:$0xf] }
 0x5e8   : > { %v3872_v48 = vmax.f32 %v3868_v8, 0.0  ;;  %v3869_v19 = vadd.f32 %v3864_v52, %v3853_v16  ;;  %v7057_v8 = vld [vmem:[#allocation35_spill] sm:$0xff] }
 0x5ea   : > { %v6554_v58 = vpack.c.bf16 %v3872_v48, %v3870_v23  ;;  %v3873_v20 = vmax.f32 %v3869_v19, 0.0  ;;  %v7058_v23 = vld [vmem:[#allocation36_spill] sm:$0xff] }
 0x5ec   : > { %v3875_v42 = vpack.c.bf16 %v3873_v20, %v3871_v17  ;;  %3893 = vrot.lane.b32.xlu1 %v6554_v58, %s5493_s22  ;;  %v4113_v50 = vmul.bf16 %v6554_v58, %v7054_v62 }
 0x5ee   : > { %3891 = vrot.lane.b32.xlu0 %v3875_v42, %s5493_s22  ;;  %s7042_s22 = smov 98   ;;  %v4114_v29 = vmul.bf16 %v3875_v42, %v7051_v36 }
 0x5f0   : > { %3880 = vrot.lane.b32.xlu1 %v6554_v58, %s7038_s0 }
 0x5f2   : > { %3877 = vrot.lane.b32.xlu0 %v3875_v42, %s7038_s0  ;;  %s7064_s0 = smov 17  }
 0x5f4   : > { %3995 = vrot.lane.b32.xlu1 %v6554_v58, %s7039_s26 }
 0x5f6   : > { %3993 = vrot.lane.b32.xlu0 %v3875_v42, %s7039_s26  ;;  %s7065_s26 = smov 15  }
 0x5f8   : > { %4055 = vrot.lane.b32.xlu1 %v6554_v58, %s7040_s24 }
 0x5fa   : > { %4053 = vrot.lane.b32.xlu0 %v3875_v42, %s7040_s24  ;;  %s7066_s24 = smov 1  }
 0x5fc   : > { %4165 = vrot.lane.b32.xlu1 %v3875_v42, %s7041_s28 }
 0x5fe   : > { %4163 = vrot.lane.b32.xlu0 %v6554_v58, %s7041_s28  ;;  %s7067_s28 = smov 127  }
 0x600   : > { %4225 = vrot.lane.b32.xlu1 %v3875_v42, %s7042_s22 }
 0x602   : > { %4223 = vrot.lane.b32.xlu0 %v6554_v58, %s7042_s22  ;;  %s7068_s22 = smov 113  }
 0x604   : > { %4285 = vrot.lane.b32.xlu1 %v3875_v42, %s7043_s21 }
 0x606   : > { %4283 = vrot.lane.b32.xlu0 %v6554_v58, %s7043_s21  ;;  %s7069_s21 = smov 112  }
 0x608   : > { %4345 = vrot.lane.b32.xlu1 %v3875_v42, %s7044_s15  ;;  %v5335_v42 = vld [vmem:[%s6824_s10 + $0x14] sm:$0xf] }
 0x60a   : > { %4343 = vrot.lane.b32.xlu0 %v6554_v58, %s7044_s15  ;;  %s7070_s15 = smov 111  }
 0x60e   : > { %4406 = vperm.xlu0 %5403, %v4403_v1   ;;  %v7059_v1 = vld [vmem:[#allocation37_spill] sm:$0xff] }
 0x65e   : > { %v3894_v33 = vpop.permute.xlu1 %3893 }
 0x660   : > { %v3892_v11 = vpop.permute.xlu0 %3891 }
 0x661   : > { %v3895_v5 = vsel %vm1380_vm10, %v3894_v33, %v3892_v11  ;;  %v3899_v61 = vsel %vm1380_vm10, %v3892_v11, %v3894_v33  ;;  %v7060_v11 = vld [vmem:[#allocation38_spill] sm:$0xff] }
 0x662   : > { %v3901_v18 = vmul.bf16 %v3899_v61, %v7045_v4  ;;  %v3902_v38 = vmul.bf16 %v3895_v5, %v7046_v13  ;;  %v3881_v3 = vpop.permute.xlu1 %3880 }
 0x664   : > { %3922 = vmatprep.subr.bf16.mxu1 %v3902_v38  ;;  %v3878_v53 = vpop.permute.xlu0 %3877  ;;  %v5337_v38 = vld [vmem:[%s6824_s10 + $0x18] sm:$0xf] }
 0x665   : > { %v3882_v45 = vsel %vm1350_vm11, %v3881_v3, %v3878_v53  ;;  %v3886_v25 = vsel %vm1350_vm11, %v3878_v53, %v3881_v3  ;;  %3923 = vmatpush1.bf16.msra.mxu1 %v3901_v18  ;;  %v7061_v3 = vld [vmem:[#allocation39_spill] sm:$0xff]  ;;  %vm7093_vm11 = vcmask 924672  }
 0x666   : > { %v3888_v57 = vmul.bf16 %v3886_v25, %v7047_v21  ;;  %v3889_v14 = vmul.bf16 %v3882_v45, %v7048_v26  ;;  %v3996_v12 = vpop.permute.xlu1 %3995  ;;  %v7062_v45 = vld [vmem:[#allocation40_spill] sm:$0xff]  ;;  %v5341_v21 = vld [vmem:[%s6824_s10 + $0x20] sm:$0xf]  ;;  %vm7094_vm13 = vmmov %vm7093_vm11 }
 0x668   : > { %5327 = vmatmul.mubr.msk.bf16.vlgmr.msra.gmra.mxu1 %vm575_vm2, %v5326_v30  ;;  %3966 = vmatprep.subr.bf16.mxu0 %v3889_v14  ;;  %v3994_v37 = vpop.permute.xlu0 %3993  ;;  %v5339_v30 = vld [vmem:[%s6824_s10 + $0x1c] sm:$0xf] }
 0x669   : > { %v3997_v32 = vsel %vm1533_vm14, %v3996_v12, %v3994_v37  ;;  %v4001_v44 = vsel %vm1533_vm14, %v3994_v37, %v3996_v12  ;;  %3967 = vmatpush1.bf16.msra.mxu0 %v3888_v57  ;;  %4042 = vmatprep.mubr.bf16.mxu1 %v7025_v51 }
 0x66a   : > { %v4003_v34 = vmul.bf16 %v4001_v44, %v7049_v54  ;;  %v4004_v10 = vmul.bf16 %v3997_v32, %v7050_v9  ;;  %v4056_v39 = vpop.permute.xlu1 %4055 }
 0x66c   : > { %5328 = vmatmul.mubr.msk.bf16.vlgmr.msra.gmra.mxu0 %vm575_vm2, %v3890_v63  ;;  %4024 = vmatprep.subr.bf16.mxu1 %v4004_v10  ;;  %v4054_v47 = vpop.permute.xlu0 %4053 }
 0x66d   : > { %v4057_v41 = vsel %vm1625_vm15, %v4056_v39, %v4054_v47  ;;  %v4061_v35 = vsel %vm1625_vm15, %v4054_v47, %v4056_v39  ;;  %4025 = vmatpush1.bf16.msra.mxu1 %v4003_v34  ;;  %4102 = vmatprep.mubr.bf16.mxu0 %v7025_v51  ;;  %vm7098_vm15 = vcmask 916480  }
 0x66e   : > { %v4063_v27 = vmul.bf16 %v4061_v35, %v7052_v49  ;;  %v4064_v6 = vmul.bf16 %v4057_v41, %v7053_v2  ;;  %v4166_v60 = vpop.permute.xlu1 %4165  ;;  %4134 = vmatprep.subr.bf16.mxu1 %v4114_v29 }
 0x670   : > { %5330 = vmatmul.mubr.msk.bf16.vlgmr.msra.gmra.mxu1 %vm575_vm2, %v5329_v43  ;;  %4084 = vmatprep.subr.bf16.mxu0 %v4064_v6  ;;  %v4164_v59 = vpop.permute.xlu0 %4163 }
 0x671   : > { %v4167_v55 = vsel %vm1803_vm1, %v4164_v59, %v4166_v60  ;;  %v4171_v40 = vsel %vm1803_vm1, %v4166_v60, %v4164_v59  ;;  %4085 = vmatpush1.bf16.msra.mxu0 %v4063_v27  ;;  %4135 = vmatpush1.bf16.msra.mxu1 %v4113_v50  ;;  %vm7099_vm1 = vmmov %vm7098_vm15 }
 0x672   : > { %v4173_v46 = vmul.bf16 %v4167_v55, %v7055_v7  ;;  %v4174_v24 = vmul.bf16 %v4171_v40, %v7056_v0  ;;  %v4226_v15 = vpop.permute.xlu1 %4225  ;;  %4152 = vmatprep.mubr.bf16.mxu1 %v7025_v51 }
 0x674   : > { %5332 = vmatmul.mubr.msk.bf16.vlgmr.msra.gmra.mxu0 %vm575_vm2, %v5331_v31  ;;  %4194 = vmatprep.subr.bf16.mxu0 %v4174_v24  ;;  %v4224_v22 = vpop.permute.xlu0 %4223 }
 0x675   : > { %v4227_v52 = vsel %vm1901_vm9, %v4224_v22, %v4226_v15  ;;  %v4231_v28 = vsel %vm1901_vm9, %v4226_v15, %v4224_v22  ;;  %4195 = vmatpush1.bf16.msra.mxu0 %v4173_v46  ;;  %4212 = vmatprep.mubr.bf16.mxu0 %v7025_v51 }
 0x676   : > { %v4233_v16 = vmul.bf16 %v4227_v52, %v7057_v8  ;;  %v4234_v48 = vmul.bf16 %v4231_v28, %v7058_v23  ;;  %v4286_v19 = vpop.permute.xlu1 %4285 }
 0x678   : > { %v4284_v17 = vpop.permute.xlu0 %4283  ;;  %5334 = vmatmul.mubr.msk.bf16.vlgmr.msra.gmra.mxu1 %vm575_vm2, %v5333_v56  ;;  %4254 = vmatprep.subr.bf16.mxu1 %v4234_v48 }
 0x679   : > { %v4287_v58 = vsel %vm1993_vm8, %v4284_v17, %v4286_v19  ;;  %v4291_v20 = vsel %vm1993_vm8, %v4286_v19, %v4284_v17  ;;  %4255 = vmatpush1.bf16.msra.mxu1 %v4233_v16  ;;  %4272 = vmatprep.mubr.bf16.mxu1 %v7025_v51  ;;  %vm7088_vm8 = vcmask 1039360  }
 0x67a   : > { %v4293_v33 = vmul.bf16 %v4287_v58, %v7059_v1  ;;  %v4294_v5 = vmul.bf16 %v4291_v20, %v7060_v11  ;;  %v4346_v61 = vpop.permute.xlu1 %4345  ;;  %vm7089_vm9 = vmmov %vm7088_vm8 }
 0x67c   : > { %5336 = vmatmul.mubr.msk.bf16.vlgmr.msra.gmra.mxu0 %vm575_vm2, %v5335_v42  ;;  %4314 = vmatprep.subr.bf16.mxu0 %v4294_v5  ;;  %v4344_v4 = vpop.permute.xlu0 %4343 }
 0x67d   : > { %v4347_v18 = vsel %vm2091_vm7, %v4344_v4, %v4346_v61  ;;  %v4351_v13 = vsel %vm2091_vm7, %v4346_v61, %v4344_v4  ;;  %4315 = vmatpush1.bf16.msra.mxu0 %v4293_v33  ;;  %4332 = vmatprep.mubr.bf16.mxu0 %v7025_v51 }
 0x67e   : > { %v4353_v53 = vmul.bf16 %v4347_v18, %v7061_v3  ;;  %v4354_v25 = vmul.bf16 %v4351_v13, %v7062_v45  ;;  %v5006_v45 = vld [vmem:[%s6828_s14] sm:$0xf] }
 0x680   : > { %5338 = vmatmul.mubr.msk.bf16.vlgmr.msra.gmra.mxu1 %vm575_vm2, %v5337_v38  ;;  %4374 = vmatprep.subr.bf16.mxu1 %v4354_v25  ;;  %v4996_v25 = vld [vmem:[%s6827_s13] sm:$0xf] }
 0x681   : > { %4375 = vmatpush1.bf16.msra.mxu1 %v4353_v53  ;;  %4392 = vmatprep.mubr.bf16.mxu1 %v7025_v51 }
 0x684   : > { %5340 = vmatmul.mubr.msk.bf16.vlgmr.msra.gmra.mxu0 %vm575_vm2, %v5339_v30  ;;  %v5028_v30 = vld [vmem:[#allocation2] sm:$0x1] }
 0x685   : > { %4485 = vmatprep.mubr.bf16.mxu0 %v7025_v51 }
 0x688   : > { %5342 = vmatmul.mubr.msk.bf16.vlgmr.msra.gmra.mxu1 %vm575_vm2, %v5341_v21 }
 0x689   : > { %4535 = vmatprep.mubr.bf16.mxu1 %v7025_v51  ;;  %v4407_v58 = vpop.permute.xlu0 %4406 }
 0x728   : > { %v3942_v57 = vpop.f32.mrf.mxu1 }
 0x72a   : > { %v3944_v26 = vpop.f32.mrf.mxu1 }
 0x72c   : > { %v3946_v14 = vpop.f32.mrf.mxu1  ;;  %v3986_v12 = vpop.f32.mrf.mxu0 }
 0x72d   : > { %v3987_v43 = vadd.f32 %v3986_v12, %v3942_v57  ;;  %v7071_v12 = vld [vmem:[#allocation10_spill] sm:$0xff] }
 0x72e   : > { %v3947_v37 = vpop.f32.mrf.mxu1  ;;  %v3988_v32 = vpop.f32.mrf.mxu0 }
 0x72f   : > { %v3989_v2 = vadd.f32 %v3988_v32, %v3944_v26  ;;  %v7072_v32 = vld [vmem:[#allocation9_spill] sm:$0xff] }
 0x730   : > { %v3990_v44 = vpop.f32.mrf.mxu0  ;;  %v4044_v63 = vpop.f32.mrf.mxu1 }
 0x731   : > { %v4051_v6 = vadd.f32 %v4044_v63, %v3987_v43 }
 0x732   : > { %v3991_v54 = vpop.f32.mrf.mxu0  ;;  %v4046_v34 = vpop.f32.mrf.mxu1 }
 0x733   : > { %v4052_v50 = vadd.f32 %v4046_v34, %v3989_v2 }
 0x734   : > { %v4048_v9 = vpop.f32.mrf.mxu1  ;;  %v4104_v10 = vpop.f32.mrf.mxu0 }
 0x735   : > { %v4111_v59 = vadd.f32 %v4104_v10, %v4051_v6  ;;  %v4429_v6 = vld [vmem:[%s6826_s12] sm:$0x3] }
 0x736   : > { %v4049_v39 = vpop.f32.mrf.mxu1  ;;  %v4106_v47 = vpop.f32.mrf.mxu0 }
 0x737   : > { %v4112_v31 = vadd.f32 %v4106_v47, %v4052_v50  ;;  %v5343_v39 = vld [vmem:[%s6826_s12 + $0x2] sm:$0x3]  ;;  %v7073_v47 = vld [vmem:[#allocation8_spill] sm:$0xff] }
 0x738   : > { %v4108_v36 = vpop.f32.mrf.mxu0  ;;  %v4154_v29 = vpop.f32.mrf.mxu1  ;;  %v7079_v50 = vld [vmem:[#allocation12_spill] sm:$0xff] }
 0x739   : > { %v4161_v7 = vadd.f32 %v4154_v29, %v4111_v59  ;;  %v7074_v29 = vld [vmem:[#allocation7_spill] sm:$0xff] }
 0x73a   : > { %v4109_v41 = vpop.f32.mrf.mxu0  ;;  %v4156_v35 = vpop.f32.mrf.mxu1 }
 0x73b   : > { %v4162_v24 = vadd.f32 %v4156_v35, %v4112_v31 }
 0x73c   : > { %v4158_v49 = vpop.f32.mrf.mxu1  ;;  %v4214_v27 = vpop.f32.mrf.mxu0 }
 0x73d   : > { %v4221_v15 = vadd.f32 %v4214_v27, %v4161_v7  ;;  %v7081_v7 = vld [vmem:[#allocation5_spill] sm:$0xff] }
 0x73e   : > { %v4159_v60 = vpop.f32.mrf.mxu1  ;;  %v4216_v62 = vpop.f32.mrf.mxu0 }
 0x73f   : > { %v4222_v28 = vadd.f32 %v4216_v62, %v4162_v24  ;;  %v7078_v60 = vld [vmem:[#allocation11_spill] sm:$0xff] }
 0x740   : > { %v4218_v55 = vpop.f32.mrf.mxu0  ;;  %v4274_v40 = vpop.f32.mrf.mxu1 }
 0x741   : > { %v4281_v56 = vadd.f32 %v4274_v40, %v4221_v15 }
 0x742   : > { %v4219_v46 = vpop.f32.mrf.mxu0  ;;  %v4276_v0 = vpop.f32.mrf.mxu1 }
 0x743   : > { %v4282_v23 = vadd.f32 %v4276_v0, %v4222_v28  ;;  %v7082_v0 = vld [vmem:[#allocation4_spill] sm:$0xff]  ;;  %v7085_v28 = vld [vmem:[#allocation13_spill] sm:$0xff] }
 0x744   : > { %v4278_v22 = vpop.f32.mrf.mxu1  ;;  %v4334_v52 = vpop.f32.mrf.mxu0 }
 0x745   : > { %v4341_v48 = vadd.f32 %v4334_v52, %v4281_v56  ;;  %v5348_v52 = vld [vmem:[%s6826_s12 + $0x4] sm:$0x3] }
 0x746   : > { %v4279_v8 = vpop.f32.mrf.mxu1  ;;  %v4336_v16 = vpop.f32.mrf.mxu0 }
 0x747   : > { %v4342_v20 = vadd.f32 %v4336_v16, %v4282_v23  ;;  %v7086_v8 = vld [vmem:[#allocation14_spill] sm:$0xff] }
 0x748   : > { %v4338_v19 = vpop.f32.mrf.mxu0  ;;  %v4394_v17 = vpop.f32.mrf.mxu1 }
 0x749   : > { %v4401_v42 = vadd.f32 %v4394_v17, %v4341_v48 }
 0x74a   : > { %v4339_v1 = vpop.f32.mrf.mxu0  ;;  %v4396_v33 = vpop.f32.mrf.mxu1 }
 0x74b   : > { %v4409_v11 = vadd.f32 %v4407_v58, %v4401_v42  ;;  %v4402_v5 = vadd.f32 %v4396_v33, %v4342_v20  ;;  %v5351_v42 = vld [vmem:[%s6826_s12 + $0x6] sm:$0x3] }
 0x74c   : > { %v4398_v61 = vpop.f32.mrf.mxu1  ;;  %v7090_v1 = vld [vmem:[#allocation15_spill] sm:$0xff] }
 0x74d   : > { %v4411_v4 = vmax.f32 %v4409_v11, 0.0  ;;  %v4410_v18 = vadd.f32 %v4407_v58, %v4402_v5  ;;  %v7091_v11 = vld [vmem:[#allocation16_spill] sm:$0xff] }
 0x74e   : > { %v4399_v13 = vpop.f32.mrf.mxu1 }
 0x74f   : > { %v6663_v38 = vpack.c.bf16 %v4411_v4, %v4411_v4  ;;  %v4412_v3 = vmax.f32 %v4410_v18, 0.0 }
 0x751   : > { %v6665_v53 = vpack.c.bf16 %v4412_v3, %v4412_v3  ;;  %4432 = vrot.lane.b32.xlu0 %v6663_v38, %s7063_s20  ;;  %v4676_v24 = vmul.bf16 %v6663_v38, %v7082_v0  ;;  %v5354_v3 = vld [vmem:[%s6826_s12 + $0x8] sm:$0x3] }
 0x753   : > { %4430 = vrot.lane.b32.xlu1 %v6665_v53, %s7063_s20  ;;  %v4677_v46 = vmul.bf16 %v6665_v53, %v7081_v7  ;;  %v4684_v17 = vsel %vm1422_vm12, %v4676_v24, 0 }
 0x755   : > { %4419 = vrot.lane.b32.xlu0 %v6663_v38, %s7064_s0 }
 0x757   : > { %4416 = vrot.lane.b32.xlu1 %v6665_v53, %s7064_s0 }
 0x759   : > { %4546 = vrot.lane.b32.xlu0 %v6663_v38, %s7065_s26 }
 0x75b   : > { %4544 = vrot.lane.b32.xlu1 %v6665_v53, %s7065_s26 }
 0x75d   : > { %4612 = vrot.lane.b32.xlu0 %v6663_v38, %s7066_s24 }
 0x75f   : > { %4610 = vrot.lane.b32.xlu1 %v6665_v53, %s7066_s24 }
 0x761   : > { %4734 = vrot.lane.b32.xlu0 %v6665_v53, %s7067_s28 }
 0x763   : > { %4732 = vrot.lane.b32.xlu1 %v6663_v38, %s7067_s28  ;;  %s523_s28 = scalar_lea.vmem %s6830_s16, %s7113_s25 }
 0x765   : > { %4800 = vrot.lane.b32.xlu0 %v6665_v53, %s7068_s22 }
 0x767   : > { %4798 = vrot.lane.b32.xlu1 %v6663_v38, %s7068_s22 }
 0x769   : > { %4866 = vrot.lane.b32.xlu0 %v6665_v53, %s7069_s21 }
 0x76b   : > { %4864 = vrot.lane.b32.xlu1 %v6663_v38, %s7069_s21 }
 0x76d   : > { %4932 = vrot.lane.b32.xlu0 %v6665_v53, %s7070_s15  ;;  %v7095_v53 = vld [vmem:[#allocation17_spill] sm:$0xff] }
 0x76f   : > { %4930 = vrot.lane.b32.xlu1 %v6663_v38, %s7070_s15 }
 0x771   : > { %5009 = vperm.xlu0 %5403, %v5006_v45  }
 0x773   : > { %4999 = vperm.xlu1 %5404, %v4996_v25   ;;  %v7096_v25 = vld [vmem:[#allocation18_spill] sm:$0xff] }
 0x777   : > { %5031 = vperm.xlu1 %5404, %v5028_v30  }
 0x7c3   : > { %v4433_v21 = vpop.permute.xlu0 %4432 }
 0x7c5   : > { %v4431_v57 = vpop.permute.xlu1 %4430 }
 0x7c6   : > { %v4434_v26 = vsel %vm575_vm2, %v4433_v21, %v4431_v57  ;;  %v4438_v14 = vsel %vm575_vm2, %v4431_v57, %v4433_v21  ;;  %vm7075_vm2 = vcmask 64512  }
 0x7c7   : > { %v4440_v37 = vmul.bf16 %v4438_v14, %v7071_v12  ;;  %v4441_v44 = vmul.bf16 %v4434_v26, %v7072_v32  ;;  %v4420_v63 = vpop.permute.xlu0 %4419  ;;  %vm7080_vm4 = vmmov %vm7075_vm2  ;;  %v7100_v32 = vld [vmem:[#allocation19_spill] sm:$0xff] }
 0x7c8   : > { %vm7087_vm7 = vmmov %vm7075_vm2 }
 0x7c9   : > { %5344 = vmatprep.subr.msk.bf16.mxu0 %vm1422_vm12, %v4441_v44  ;;  %v4417_v54 = vpop.permute.xlu1 %4416  ;;  %v4448_v34 = vsel %vm1422_vm12, %v4440_v37, 0  ;;  %vm7092_vm10 = vmmov %vm7075_vm2  ;;  %v5357_v37 = vld [vmem:[%s6826_s12 + $0xa] sm:$0x3] }
 0x7ca   : > { %v4421_v9 = vsel %vm540_vm0, %v4420_v63, %v4417_v54  ;;  %v4425_v10 = vsel %vm540_vm0, %v4417_v54, %v4420_v63  ;;  %4468 = vmatpush1.bf16.msra.mxu0 %v4448_v34  ;;  %vm7077_vm0 = vmmov %vm7076_vm3  ;;  %v7101_v63 = vld [vmem:[#allocation20_spill] sm:$0xff] }
 0x7cb   : > { %v4427_v36 = vmul.bf16 %v4425_v10, %v7073_v47  ;;  %v4428_v41 = vmul.bf16 %v4421_v9, %v7074_v29  ;;  %v4547_v35 = vpop.permute.xlu0 %4546  ;;  %vm7097_vm14 = vmmov %vm7075_vm2  ;;  %v7104_v29 = vld [vmem:[#allocation21_spill] sm:$0xff] }
 0x7cd   : > { %5345 = vmatmul.mubr.msk.bf16.vlgmr.msra.gmra.mxu0 %vm7075_vm2, %v5343_v39  ;;  %5346 = vmatprep.subr.msk.bf16.mxu1 %vm1422_vm12, %v4428_v41  ;;  %v4545_v43 = vpop.permute.xlu1 %4544  ;;  %v4498_v49 = vsel %vm1422_vm12, %v4427_v36, 0  ;;  %v5360_v36 = vld [vmem:[%s6826_s12 + $0xc] sm:$0x3] }
 0x7ce   : > { %v4548_v27 = vsel %vm7076_vm3, %v4547_v35, %v4545_v43  ;;  %v4552_v2 = vsel %vm7077_vm0, %v4545_v43, %v4547_v35  ;;  %4518 = vmatpush1.bf16.msra.mxu1 %v4498_v49  ;;  %4599 = vmatprep.mubr.bf16.mxu0 %v7025_v51  ;;  %vm7102_vm3 = vcmask 908288   ;;  %v7105_v35 = vld [vmem:[#allocation22_spill] sm:$0xff] }
 0x7cf   : > { %v4554_v62 = vmul.bf16 %v4552_v2, %v7078_v60  ;;  %v4555_v59 = vmul.bf16 %v4548_v27, %v7079_v50  ;;  %v4613_v55 = vpop.permute.xlu0 %4612  ;;  %vm7103_vm0 = vmmov %vm7102_vm3  ;;  %v5363_v27 = vld [vmem:[%s6826_s12 + $0xe] sm:$0x3]  ;;  %v5366_v2 = vld [vmem:[%s6826_s12 + $0x10] sm:$0x3] }
 0x7d1   : > { %5347 = vmatmul.mubr.msk.bf16.vlgmr.msra.gmra.mxu1 %vm7080_vm4, %v4429_v6  ;;  %5349 = vmatprep.subr.msk.bf16.mxu0 %vm1422_vm12, %v4555_v59  ;;  %v4611_v40 = vpop.permute.xlu1 %4610  ;;  %v4562_v31 = vsel %vm1422_vm12, %v4554_v62, 0  ;;  %vm7106_vm4 = vmmov %vm7075_vm2 }
 0x7d2   : > { %v4614_v15 = vsel %vm7083_vm5, %v4613_v55, %v4611_v40  ;;  %v4618_v22 = vsel %vm7084_vm6, %v4611_v40, %v4613_v55  ;;  %4582 = vmatpush1.bf16.msra.mxu0 %v4562_v31  ;;  %4665 = vmatprep.mubr.bf16.mxu1 %v7025_v51  ;;  %vm7107_vm5 = vmmov %vm7075_vm2 }
 0x7d3   : > { %v4620_v56 = vmul.bf16 %v4618_v22, %v7085_v28  ;;  %v4621_v16 = vmul.bf16 %v4614_v15, %v7086_v8  ;;  %v4735_v23 = vpop.permute.xlu0 %4734  ;;  %5355 = vmatprep.subr.msk.bf16.mxu0 %vm1422_vm12, %v4677_v46  ;;  %vm7108_vm6 = vmmov %vm7075_vm2 }
 0x7d5   : > { %5350 = vmatmul.mubr.msk.bf16.vlgmr.msra.gmra.mxu0 %vm7087_vm7, %v5348_v52  ;;  %5352 = vmatprep.subr.msk.bf16.mxu1 %vm1422_vm12, %v4621_v16  ;;  %v4733_v48 = vpop.permute.xlu1 %4732  ;;  %v4628_v19 = vsel %vm1422_vm12, %v4620_v56, 0 }
 0x7d6   : > { %v4736_v58 = vsel %vm7088_vm8, %v4733_v48, %v4735_v23  ;;  %v4740_v20 = vsel %vm7089_vm9, %v4735_v23, %v4733_v48  ;;  %4648 = vmatpush1.bf16.msra.mxu1 %v4628_v19  ;;  %4704 = vmatpush1.bf16.msra.mxu0 %v4684_v17 }
 0x7d7   : > { %v4742_v33 = vmul.bf16 %v4736_v58, %v7090_v1  ;;  %v4743_v5 = vmul.bf16 %v4740_v20, %v7091_v11  ;;  %v4801_v61 = vpop.permute.xlu0 %4800  ;;  %4721 = vmatprep.mubr.bf16.mxu0 %v7025_v51 }
 0x7d9   : > { %5353 = vmatmul.mubr.msk.bf16.vlgmr.msra.gmra.mxu1 %vm7092_vm10, %v5351_v42  ;;  %5358 = vmatprep.subr.msk.bf16.mxu1 %vm1422_vm12, %v4743_v5  ;;  %v4799_v4 = vpop.permute.xlu1 %4798  ;;  %v4750_v18 = vsel %vm1422_vm12, %v4742_v33, 0 }
 0x7da   : > { %v4802_v13 = vsel %vm7093_vm11, %v4799_v4, %v4801_v61  ;;  %v4806_v38 = vsel %vm7094_vm13, %v4801_v61, %v4799_v4  ;;  %4770 = vmatpush1.bf16.msra.mxu1 %v4750_v18  ;;  %4787 = vmatprep.mubr.bf16.mxu1 %v7025_v51 }
 0x7db   : > { %v4808_v45 = vmul.bf16 %v4802_v13, %v7095_v53  ;;  %v4809_v30 = vmul.bf16 %v4806_v38, %v7096_v25  ;;  %v4867_v21 = vpop.permute.xlu0 %4866 }
 0x7dd   : > { %v4865_v57 = vpop.permute.xlu1 %4864  ;;  %5356 = vmatmul.mubr.msk.bf16.vlgmr.msra.gmra.mxu0 %vm7097_vm14, %v5354_v3  ;;  %5361 = vmatprep.subr.msk.bf16.mxu0 %vm1422_vm12, %v4809_v30  ;;  %v4816_v26 = vsel %vm1422_vm12, %v4808_v45, 0 }
 0x7de   : > { %v4868_v14 = vsel %vm7098_vm15, %v4865_v57, %v4867_v21  ;;  %v4872_v12 = vsel %vm7099_vm1, %v4867_v21, %v4865_v57  ;;  %4836 = vmatpush1.bf16.msra.mxu0 %v4816_v26  ;;  %4853 = vmatprep.mubr.bf16.mxu0 %v7025_v51 }
 0x7df   : > { %v4874_v44 = vmul.bf16 %v4868_v14, %v7100_v32  ;;  %v4875_v54 = vmul.bf16 %v4872_v12, %v7101_v63  ;;  %v4933_v34 = vpop.permute.xlu0 %4932 }
 0x7e1   : > { %5359 = vmatmul.mubr.msk.bf16.vlgmr.msra.gmra.mxu1 %vm7075_vm2, %v5357_v37  ;;  %5364 = vmatprep.subr.msk.bf16.mxu1 %vm1422_vm12, %v4875_v54  ;;  %v4931_v9 = vpop.permute.xlu1 %4930  ;;  %v4882_v10 = vsel %vm1422_vm12, %v4874_v44, 0 }
 0x7e2   : > { %v4934_v39 = vsel %vm7102_vm3, %v4931_v9, %v4933_v34  ;;  %v4938_v47 = vsel %vm7103_vm0, %v4933_v34, %v4931_v9  ;;  %4902 = vmatpush1.bf16.msra.mxu1 %v4882_v10  ;;  %4919 = vmatprep.mubr.bf16.mxu1 %v7025_v51 }
 0x7e3   : > { %v4940_v41 = vmul.bf16 %v4934_v39, %v7104_v29  ;;  %v4941_v43 = vmul.bf16 %v4938_v47, %v7105_v35 }
 0x7e5   : > { %5362 = vmatmul.mubr.msk.bf16.vlgmr.msra.gmra.mxu0 %vm7106_vm4, %v5360_v36  ;;  %5367 = vmatprep.subr.msk.bf16.mxu0 %vm1422_vm12, %v4941_v43  ;;  %v4948_v49 = vsel %vm1422_vm12, %v4940_v41, 0 }
 0x7e6   : > { %4968 = vmatpush1.bf16.msra.mxu0 %v4948_v49  ;;  %4985 = vmatprep.mubr.bf16.mxu0 %v7025_v51 }
 0x7e9   : > { %5365 = vmatmul.mubr.msk.bf16.vlgmr.msra.gmra.mxu1 %vm7107_vm5, %v5363_v27 }
 0x7ec   : > { %v5010_v47 = vpop.permute.xlu0 %5009 }
 0x7ed   : > { %5368 = vmatmul.mubr.msk.bf16.vlgmr.msra.gmra.mxu0 %vm7108_vm6, %v5366_v2 }
 0x7ee   : > { %v5000_v12 = vpop.permute.xlu1 %4999 }
 0x88d   : > { %v4487_v6 = vpop.f32.mrf.mxu0 }
 0x88f   : > { %v4489_v60 = vpop.f32.mrf.mxu0 }
 0x891   : > { %v4491_v62 = vpop.f32.mrf.mxu0  ;;  %v4537_v50 = vpop.f32.mrf.mxu1 }
 0x892   : > { %v4538_v8 = vadd.f32 %v4537_v50, %v4487_v6 }
 0x893   : > { %v4492_v59 = vpop.f32.mrf.mxu0  ;;  %v4539_v55 = vpop.f32.mrf.mxu1 }
 0x894   : > { %v4540_v48 = vadd.f32 %v4539_v55, %v4489_v60  ;;  %v5506_v55 = vmov 1966171168  }
 0x895   : > { %v4541_v40 = vpop.f32.mrf.mxu1  ;;  %v4601_v31 = vpop.f32.mrf.mxu0 }
 0x896   : > { %v4608_v19 = vadd.f32 %v4601_v31, %v4538_v8  ;;  %v5044_v40 = vunpack.c.l.s4 %v5506_v55  ;;  %v7110_v8 = vld [vmem:[#allocation3_spill] sm:$0xff] }
 0x897   : > { %v4542_v7 = vpop.f32.mrf.mxu1  ;;  %v4603_v46 = vpop.f32.mrf.mxu0 }
 0x898   : > { %v4609_v20 = vadd.f32 %v4603_v46, %v4540_v48  ;;  %v5032_v46 = vpop.permute.xlu1 %5031 }
 0x899   : > { %v4605_v0 = vpop.f32.mrf.mxu0  ;;  %v4667_v51 = vpop.f32.mrf.mxu1 }
 0x89a   : > { %v4674_v42 = vadd.f32 %v4667_v51, %v4608_v19  ;;  %v7111_v19 = vlaneseq }
 0x89b   : > { %v4606_v24 = vpop.f32.mrf.mxu0  ;;  %v4669_v15 = vpop.f32.mrf.mxu1 }
 0x89c   : > { %v4675_v11 = vadd.f32 %v4669_v15, %v4609_v20  ;;  %v5045_v24 = vunpack.c.0.s8 %v5044_v40  ;;  %v7109_v15 = vld [vmem:[#allocation6_spill] sm:$0xff] }
 0x89d   : > { %v4671_v22 = vpop.f32.mrf.mxu1  ;;  %v4723_v52 = vpop.f32.mrf.mxu0 }
 0x89e   : > { %v4730_v5 = vadd.f32 %v4723_v52, %v4674_v42  ;;  %v5037_v22 = vrot.slane %v5032_v46, %v7109_v15 }
 0x89f   : > { %v4672_v28 = vpop.f32.mrf.mxu1  ;;  %v4725_v56 = vpop.f32.mrf.mxu0 }
 0x8a0   : > { %v4731_v18 = vadd.f32 %v4725_v56, %v4675_v11 }
 0x8a1   : > { %v4727_v16 = vpop.f32.mrf.mxu0  ;;  %v4789_v23 = vpop.f32.mrf.mxu1 }
 0x8a2   : > { %v4796_v13 = vadd.f32 %v4789_v23, %v4730_v5  ;;  %v5048_v16 = vsub.s32 %v5045_v24, %v7110_v8 }
 0x8a3   : > { %v4728_v17 = vpop.f32.mrf.mxu0  ;;  %v4791_v58 = vpop.f32.mrf.mxu1 }
 0x8a4   : > { %v4797_v53 = vadd.f32 %v4791_v58, %v4731_v18 }
 0x8a5   : > { %v4793_v1 = vpop.f32.mrf.mxu1  ;;  %v4855_v33 = vpop.f32.mrf.mxu0 }
 0x8a6   : > { %v4862_v45 = vadd.f32 %v4855_v33, %v4796_v13 }
 0x8a7   : > { %v4794_v61 = vpop.f32.mrf.mxu1  ;;  %v4857_v4 = vpop.f32.mrf.mxu0 }
 0x8a8   : > { %v4863_v21 = vadd.f32 %v4857_v4, %v4797_v53 }
 0x8a9   : > { %v4859_v38 = vpop.f32.mrf.mxu0  ;;  %v4921_v3 = vpop.f32.mrf.mxu1 }
 0x8aa   : > { %v4928_v57 = vadd.f32 %v4921_v3, %v4862_v45 }
 0x8ab   : > { %v4860_v25 = vpop.f32.mrf.mxu0  ;;  %v4923_v30 = vpop.f32.mrf.mxu1 }
 0x8ac   : > { %v4929_v37 = vadd.f32 %v4923_v30, %v4863_v21 }
 0x8ad   : > { %v4987_v26 = vpop.f32.mrf.mxu0  ;;  %v4925_v14 = vpop.f32.mrf.mxu1 }
 0x8ae   : > { %v4994_v32 = vadd.f32 %v4987_v26, %v4928_v57 }
 0x8af   : > { %v4989_v44 = vpop.f32.mrf.mxu0  ;;  %v4926_v63 = vpop.f32.mrf.mxu1 }
 0x8b0   : > { %v5002_v54 = vadd.f32 %v5000_v12, %v4994_v32  ;;  %v4995_v34 = vadd.f32 %v4989_v44, %v4929_v37 }
 0x8b1   : > { %v4991_v9 = vpop.f32.mrf.mxu0 }
 0x8b2   : > { %v5004_v10 = vmax.f32 %v5002_v54, 0.0  ;;  %v5003_v39 = vadd.f32 %v5000_v12, %v4995_v34 }
 0x8b3   : > { %v4992_v36 = vpop.f32.mrf.mxu0 }
 0x8b4   : > { %v5012_v29 = vmul.f32 %v5010_v47, %v5004_v10  ;;  %v5005_v41 = vmax.f32 %v5003_v39, 0.0 }
 0x8b6   : > { %v5014_v35 = vsel %vm1422_vm12, %v5012_v29, 0.0  ;;  %v5013_v43 = vmul.f32 %v5010_v47, %v5005_v41 }
 0x8b7   : > { %v5015_v49 = vrot.slane %v5014_v35, 4 }
 0x8b8   : > { %v5021_v27 = vsel %vm1422_vm12, %v5013_v43, 0.0  ;;  %vm5060_vm12 = vcmp.lt.s32.totalorder %v7111_v19, 256 }
 0x8b9   : > { %v5016_v2 = vadd.f32 %v5015_v49, %v5014_v35  ;;  %v5022_v6 = vrot.slane %v5021_v27, 4 }
 0x8bb   : > { %v5017_v60 = vrot.slane %v5016_v2, 2  ;;  %v5023_v62 = vadd.f32 %v5022_v6, %v5021_v27 }
 0x8bd   : > { %v5018_v50 = vadd.f32 %v5017_v60, %v5016_v2  ;;  %v5024_v59 = vrot.slane %v5023_v62, 2 }
 0x8bf   : > { %v5019_v31 = vrot.slane %v5018_v50, 1  ;;  %v5025_v7 = vadd.f32 %v5024_v59, %v5023_v62 }
 0x8c1   : > { %v5020_v0 = vadd.f32 %v5019_v31, %v5018_v50  ;;  %v5026_v51 = vrot.slane %v5025_v7, 1 }
 0x8c3   : > { %v5027_v52 = vadd.f32 %v5026_v51, %v5025_v7  ;;  %v5038_v28 = vadd.f32 %v5037_v22, %v5020_v0 }
 0x8c5   : > { %v5039_v56 = vadd.f32 %v5037_v22, %v5027_v52 }
 0x8c7   : > { %v5042_v23 = vcombine.low %v5038_v28, %v5039_v56 }
 0x8c9   : > { %v5049_v48 = vrot.slane %v5042_v23, %v5048_v16 }
 0x8cb   : > { %v5056_v17 = vrot.slane %v5049_v48, %v5048_v16 }
 0x8cd   : > { %5062 = vst.msk [vmem:[%s523_s28] sm:$0x3] %vm5060_vm12, %v5056_v17 }
 0x8ce PF: > { %s28_s23 = sadd.s32 1, %s5481_s23  }
 0x8cf   : > { %p25_p4 = scmp.ge.s32.totalorder %s28_s23, 4  }
 0x8d1   :  { %27 = sbr.rel (!%p25_p4) target bundleno = 3 (0x3), region = 162 }

</bundles_post_ra>
